<compile_context>
chip_gen: v5e
topology: v5e:2x2
jax: 0.10.0
libtpu: 0.0.40
codegen_flags: <defaults>
</compile_context>

<pallas_src>
import jax
import jax.numpy as jnp
from jax.experimental import pallas as pl
from jax.experimental.pallas import tpu as pltpu

_LANES = 128  # lane width: all feature/output dims are zero-padded to this


def _round_up(x, m):
    return (x + m - 1) // m * m


# ----------------------------- Pallas kernels ------------------------------

def _conv_relu_pool_kernel(col_ref, w_ref, b_ref, o_ref):
    """conv1-as-GEMM + 2x2 max-pool + bias + ReLU for one row tile.

    col_ref: (4, rows, Kpad) bf16 -- im2col patches, one slab per pool slot
    w_ref:   (Kpad, 128)     bf16 -- conv weight (K and Cout zero-padded)
    b_ref:   (1, 128)        f32  -- conv bias (lane-padded)
    o_ref:   (rows, 128)     bf16 -- pooled activations (lane-dense store)
    """
    _, rows, kpad = col_ref.shape
    # One MXU GEMM over all 4 pool slots (layout no-op reshape: rows % 16 == 0),
    # then a 3-op max tree instead of a serial dot->max->dot chain.
    cols = col_ref[...].reshape(4 * rows, kpad)
    y = jnp.dot(cols, w_ref[...], preferred_element_type=jnp.float32)
    y = y.reshape(4, rows, _LANES)
    pooled = jnp.maximum(jnp.maximum(y[0], y[1]), jnp.maximum(y[2], y[3]))
    # max(relu(x+b)) == relu(max(x)+b): bias + ReLU once, in f32 (v5e epilogue),
    # cast to bf16 only at the store.
    o_ref[...] = jnp.maximum(pooled + b_ref[...], 0.0).astype(o_ref.dtype)


def _conv2_mlp_kernel(col_ref, c2w_ref, c2b_ref, w1_ref, b1_ref,
                      w2_ref, b2_ref, w3_ref, b3_ref, o_ref):
    """Fused conv2+bias+ReLU+pool -> fc1 -> ReLU -> fc2 -> ReLU -> fc3.

    col_ref: (4, S, TB, Kpad) bf16 -- conv2 im2col (pool-slot, spatial, batch)
    c2w_ref: (Kpad, 128) bf16 ; c2b_ref: (1, 128) f32
    w1_ref : (S, 128, 128) bf16 -- fc1 weight, one K=128 slab per spatial pos
                                    (NCHW flatten order folded in at prep time)
    w2_ref, w3_ref: (128, 128) bf16 ; b1/b2/b3: (1, 128) f32
    o_ref  : (TB, 128) f32 -- logits (first 10 lanes valid)
    """
    _, S, tb, kpad = col_ref.shape
    # conv2 as one GEMM over all pool slots / spatial positions / batch rows.
    cols = col_ref[...].reshape(4 * S * tb, kpad)          # layout no-op
    y = jnp.dot(cols, c2w_ref[...], preferred_element_type=jnp.float32)
    y = y.reshape(4, S * tb, _LANES)
    pooled = jnp.maximum(jnp.maximum(y[0], y[1]), jnp.maximum(y[2], y[3]))
    act = jnp.maximum(pooled + c2b_ref[...], 0.0)          # f32 epilogue
    act = act.astype(jnp.bfloat16).reshape(S, tb, _LANES)  # (25, TB, 128)

    # fc1: sum over the 25 conv2 output positions of (TB,128)@(128,128) slabs.
    h = jnp.dot(act[0], w1_ref[0], preferred_element_type=jnp.float32)
    for s in range(1, S):
        h = h + jnp.dot(act[s], w1_ref[s], preferred_element_type=jnp.float32)
    h = jnp.maximum(h + b1_ref[...], 0.0).astype(jnp.bfloat16)
    h = jnp.dot(h, w2_ref[...], preferred_element_type=jnp.float32)
    h = jnp.maximum(h + b2_ref[...], 0.0).astype(jnp.bfloat16)
    o_ref[...] = (jnp.dot(h, w3_ref[...], preferred_element_type=jnp.float32)
                  + b3_ref[...])


# ------------------------------ wrapper glue --------------------------------

def _im2col_pooled(x_nhwc, K):
    """im2col per 2x2 pool slot, rows ordered (batch, hp, wp).

    (B, H, W, C) -> (4, B*Hp*Wp, C*K*K); column order (c, kh, kw) matches
    torch conv weight .reshape(Cout, Cin*K*K).  Keeps the input dtype (bf16).
    """
    B, H, W, C = x_nhwc.shape
    Ho, Wo = H - K + 1, W - K + 1
    Hp, Wp = Ho // 2, Wo // 2
    slabs = []
    for dh in (0, 1):
        for dw in (0, 1):
            patches = [
                x_nhwc[:, dh + kh: dh + kh + 2 * Hp: 2,
                          dw + kw: dw + kw + 2 * Wp: 2, :]
                for kh in range(K) for kw in range(K)
            ]                                            # each (B, Hp, Wp, C)
            p = jnp.stack(patches, axis=-1)              # (B, Hp, Wp, C, K*K)
            slabs.append(p.reshape(B * Hp * Wp, C * K * K))
    return jnp.stack(slabs, axis=0), Hp, Wp              # (4, N, C*K*K)


def _im2col_pooled_sb(x_nhwc, K):
    """Same patches, but shaped (4, Hp*Wp, B, C*K*K) (spatial-major, batch
    minor) so one batch tile is a contiguous block along axis 2."""
    B, H, W, C = x_nhwc.shape
    Ho, Wo = H - K + 1, W - K + 1
    Hp, Wp = Ho // 2, Wo // 2
    slabs = []
    for dh in (0, 1):
        for dw in (0, 1):
            patches = [
                x_nhwc[:, dh + kh: dh + kh + 2 * Hp: 2,
                          dw + kw: dw + kw + 2 * Wp: 2, :]
                for kh in range(K) for kw in range(K)
            ]
            p = jnp.stack(patches, axis=-1)                      # (B,Hp,Wp,C,KK)
            p = p.reshape(B, Hp * Wp, C * K * K).transpose(1, 0, 2)
            slabs.append(p)
    return jnp.stack(slabs, axis=0), Hp, Wp                      # (4, S, B, CKK)


def _pick_row_tile(n_rows, cap=512):
    """Row tile: multiple of 16 (packed bf16 sublanes), <= cap, and small
    enough that the grid has >= 2 blocks (keep both v7x TensorCores busy)."""
    n16 = _round_up(n_rows, 16)
    tile = min(cap, n16)
    if _round_up(n_rows, tile) // tile < 2 and tile > 16:
        tile = max(16, _round_up(tile // 2, 16))
    return tile


def _conv_relu_pool(x_nhwc, w_pad, b_pad, cout):
    """conv(valid, 5x5) + bias + ReLU + 2x2/2 max-pool in ONE pallas_call."""
    B = x_nhwc.shape[0]
    cols, Hp, Wp = _im2col_pooled(x_nhwc, 5)          # (4, N, C*25) bf16
    n_rows, kdim = cols.shape[1], cols.shape[2]
    kpad = w_pad.shape[0]

    row_tile = _pick_row_tile(n_rows)
    npad = _round_up(n_rows, row_tile)
    cols = jnp.pad(cols, ((0, 0), (0, npad - n_rows), (0, kpad - kdim)))

    out = pl.pallas_call(
        _conv_relu_pool_kernel,
        out_shape=jax.ShapeDtypeStruct((npad, _LANES), jnp.bfloat16),
        grid_spec=pltpu.PrefetchScalarGridSpec(
            num_scalar_prefetch=0,
            grid=(npad // row_tile,),
            in_specs=[
                pl.BlockSpec((4, row_tile, kpad), lambda i: (0, i, 0)),
                pl.BlockSpec((kpad, _LANES), lambda i: (0, 0)),   # resident
                pl.BlockSpec((1, _LANES), lambda i: (0, 0)),      # resident
            ],
            out_specs=pl.BlockSpec((row_tile, _LANES), lambda i: (i, 0)),
        ),
        compiler_params=pltpu.CompilerParams(
            dimension_semantics=("parallel",)),
    )(cols, w_pad, b_pad)
    return out[:n_rows, :cout].reshape(B, Hp, Wp, cout)   # NHWC, bf16


def _conv2_mlp(x_nhwc, p):
    """conv2 + bias + ReLU + pool and the whole MLP in ONE pallas_call,
    gridded over batch tiles; all inter-layer activations stay in VMEM."""
    B = x_nhwc.shape[0]
    cols, Hp, Wp = _im2col_pooled_sb(x_nhwc, 5)       # (4, 25, B, 150) bf16
    S, kdim = Hp * Wp, cols.shape[-1]
    kpad = p["c2w"].shape[0]

    tb = 16 if B <= 64 else 64                        # batch tile (mult. of 16)
    bpad = _round_up(B, tb)
    cols = jnp.pad(cols, ((0, 0), (0, 0), (0, bpad - B), (0, kpad - kdim)))

    out = pl.pallas_call(
        _conv2_mlp_kernel,
        out_shape=jax.ShapeDtypeStruct((bpad, _LANES), jnp.float32),
        grid_spec=pltpu.PrefetchScalarGridSpec(
            num_scalar_prefetch=0,
            grid=(bpad // tb,),
            in_specs=[
                pl.BlockSpec((4, S, tb, kpad), lambda i: (0, 0, i, 0)),
                pl.BlockSpec(p["c2w"].shape, lambda i: (0, 0)),      # resident
                pl.BlockSpec(p["c2b"].shape, lambda i: (0, 0)),
                pl.BlockSpec(p["f1w"].shape, lambda i: (0, 0, 0)),
                pl.BlockSpec(p["f1b"].shape, lambda i: (0, 0)),
                pl.BlockSpec(p["f2w"].shape, lambda i: (0, 0)),
                pl.BlockSpec(p["f2b"].shape, lambda i: (0, 0)),
                pl.BlockSpec(p["f3w"].shape, lambda i: (0, 0)),
                pl.BlockSpec(p["f3b"].shape, lambda i: (0, 0)),
            ],
            out_specs=pl.BlockSpec((tb, _LANES), lambda i: (i, 0)),
        ),
        compiler_params=pltpu.CompilerParams(
            dimension_semantics=("parallel",)),
    )(cols, p["c2w"], p["c2b"], p["f1w"], p["f1b"],
      p["f2w"], p["f2b"], p["f3w"], p["f3b"])
    return out[:B, :10]


# --------------------------------- model ------------------------------------

def init_params(key):
    # deterministic init mimicking PyTorch's default U(-1/sqrt(fan_in), +...)
    def uni(k, shape, fan_in):
        bound = 1.0 / jnp.sqrt(jnp.float32(fan_in))
        return jax.random.uniform(k, shape, jnp.float32, -bound, bound)

    ks = jax.random.split(key, 10)
    return {
        "conv1_w": uni(ks[0], (6, 3, 5, 5), 3 * 25),
        "conv1_b": uni(ks[1], (6,), 3 * 25),
        "conv2_w": uni(ks[2], (16, 6, 5, 5), 6 * 25),
        "conv2_b": uni(ks[3], (16,), 6 * 25),
        "fc1_w": uni(ks[4], (120, 400), 400),
        "fc1_b": uni(ks[5], (120,), 400),
        "fc2_w": uni(ks[6], (84, 120), 120),
        "fc2_b": uni(ks[7], (84,), 120),
        "fc3_w": uni(ks[8], (10, 84), 84),
        "fc3_b": uni(ks[9], (10,), 84),
    }


def prepare_params(params):
    """One-time weight prep: GEMM layouts, zero-padding to (16,128)-friendly
    sizes, bf16 matmul operands (biases stay f32).  fc1 is stored as 25
    (128 -> 128) slabs, one per conv2 output position, with PyTorch's NCHW
    flatten order folded into the slab/row permutation."""
    def conv_prep(w, b, kpad):
        cout = w.shape[0]
        w2d = w.reshape(cout, -1).T                               # (CinKK, Cout)
        w2d = jnp.pad(w2d, ((0, kpad - w2d.shape[0]), (0, _LANES - cout)))
        b2d = jnp.pad(b.reshape(1, -1), ((0, 0), (0, _LANES - cout)))
        return w2d.astype(jnp.bfloat16), b2d.astype(jnp.float32)

    def fc_prep(w, b):
        out_f, in_f = w.shape
        w2d = jnp.pad(w.T, ((0, _LANES - in_f), (0, _LANES - out_f)))
        b2d = jnp.pad(b.reshape(1, -1), ((0, 0), (0, _LANES - out_f)))
        return w2d.astype(jnp.bfloat16), b2d.astype(jnp.float32)

    c1w, c1b = conv_prep(params["conv1_w"], params["conv1_b"], 128)  # 75 -> 128
    c2w, c2b = conv_prep(params["conv2_w"], params["conv2_b"], 256)  # 150 -> 256

    # fc1: torch input flat index = c*25 + (hp*5 + wp); the kernel iterates
    # spatial position s = hp*5 + wp with a (batch, channel) slab each, so the
    # weight becomes (25, Cpad=128, OutPad=128).
    w1 = params["fc1_w"].reshape(120, 16, 25)          # (out, c, s)
    w1 = jnp.transpose(w1, (2, 1, 0))                  # (s, c, out)
    w1 = jnp.pad(w1, ((0, 0), (0, _LANES - 16), (0, _LANES - 120)))
    f1w = w1.astype(jnp.bfloat16)
    f1b = jnp.pad(params["fc1_b"].reshape(1, -1),
                  ((0, 0), (0, _LANES - 120))).astype(jnp.float32)

    f2w, f2b = fc_prep(params["fc2_w"], params["fc2_b"])   # 120->128, 84->128
    f3w, f3b = fc_prep(params["fc3_w"], params["fc3_b"])   # 84->128, 10->128
    return {"c1w": c1w, "c1b": c1b, "c2w": c2w, "c2b": c2b,
            "f1w": f1w, "f1b": f1b, "f2w": f2w, "f2b": f2b,
            "f3w": f3w, "f3b": f3b}


@jax.jit
def net_forward(prepped, x_nchw):
    # (B,3,32,32) NCHW -> NHWC + bf16 once; activations stay bf16 to the logits.
    x = x_nchw.transpose(0, 2, 3, 1).astype(jnp.bfloat16)        # (B,32,32,3)
    x = _conv_relu_pool(x, prepped["c1w"], prepped["c1b"], 6)    # (B,14,14,6)
    return _conv2_mlp(x, prepped)                                # (B,10) f32


def net_reference(params, x):
    # pure-JAX reference for correctness check
    def conv(x, w, b):
        y = jax.lax.conv_general_dilated(
            x, w, (1, 1), "VALID", dimension_numbers=("NCHW", "OIHW", "NCHW"))
        return y + b.reshape(1, -1, 1, 1)

    def pool(x):
        return jax.lax.reduce_window(x, -jnp.inf, jax.lax.max,
                                     (1, 1, 2, 2), (1, 1, 2, 2), "VALID")

    x = pool(jax.nn.relu(conv(x, params["conv1_w"], params["conv1_b"])))
    x = pool(jax.nn.relu(conv(x, params["conv2_w"], params["conv2_b"])))
    x = x.reshape(x.shape[0], -1)
    x = jax.nn.relu(x @ params["fc1_w"].T + params["fc1_b"])
    x = jax.nn.relu(x @ params["fc2_w"].T + params["fc2_b"])
    return x @ params["fc3_w"].T + params["fc3_b"]


if __name__ == "__main__":
    key = jax.random.PRNGKey(0)
    pkey, xkey = jax.random.split(key)
    params = init_params(pkey)
    prepped = prepare_params(params)
    x = jax.random.normal(xkey, (2, 3, 32, 32), jnp.float32)

    out = jax.block_until_ready(net_forward(prepped, x))
    ref = jax.block_until_ready(net_reference(params, x))

    assert out.shape == (2, 10) and out.dtype == jnp.float32
    assert bool(jnp.all(jnp.isfinite(out)))
    err = float(jnp.max(jnp.abs(out - ref)))
    assert bool(jnp.allclose(out, ref, atol=1e-2, rtol=1e-2)), \
        f"max abs err = {err}"
    print("KERNEL_OK")
</pallas_src>

<mosaic_0001>
module attributes {stable_mosaic.version = 11 : i64} {
  func.func @_conv_relu_pool_kernel(%arg0: i32, %arg1: memref<4x208x128xbf16, #tpu.memory_space<vmem>>, %arg2: memref<128x128xbf16, #tpu.memory_space<vmem>>, %arg3: memref<1x128xf32, #tpu.memory_space<vmem>>, %arg4: memref<208x128xbf16, #tpu.memory_space<vmem>>) attributes {dimension_semantics = [#tpu.dimension_semantics<parallel>], iteration_bounds = array<i64: 2>, scalar_prefetch = 0 : i64, scratch_operands = 0 : i64, tpu.core_type = #tpu.core_type<tc>, window_params = [{transform_indices = @transform_0, window_bounds = array<i64: 4, 208, 128>}, {pipeline_mode = #tpu.pipeline_mode<synchronous>, transform_indices = @transform_1, window_bounds = array<i64: 128, 128>}, {pipeline_mode = #tpu.pipeline_mode<synchronous>, transform_indices = @transform_2, window_bounds = array<i64: 1, 128>}, {transform_indices = @transform_3, window_bounds = array<i64: 208, 128>}]} {
    %c0 = arith.constant 0 : index
    %c0_0 = arith.constant 0 : index
    %c0_1 = arith.constant 0 : index
    %0 = vector.load %arg1[%c0, %c0_0, %c0_1] : memref<4x208x128xbf16, #tpu.memory_space<vmem>>, vector<4x208x128xbf16>
    %1 = vector.shape_cast %0 : vector<4x208x128xbf16> to vector<832x128xbf16>
    %c0_2 = arith.constant 0 : index
    %c0_3 = arith.constant 0 : index
    %2 = vector.load %arg2[%c0_2, %c0_3] : memref<128x128xbf16, #tpu.memory_space<vmem>>, vector<128x128xbf16>
    %cst = arith.constant dense<0.000000e+00> : vector<832x128xf32>
    %3 = tpu.matmul %1, %2, %cst {dimension_numbers = #tpu.dot_dimension_numbers<[1], [0], [0], [1], [0, 0, 1, 1], [], []>} : vector<832x128xbf16>, vector<128x128xbf16>, vector<832x128xf32> -> vector<832x128xf32>
    %4 = vector.shape_cast %3 : vector<832x128xf32> to vector<4x208x128xf32>
    %5 = vector.extract_strided_slice %4 {offsets = [0, 0, 0], sizes = [1, 208, 128], strides = [1, 1, 1]} : vector<4x208x128xf32> to vector<1x208x128xf32>
    %6 = vector.shape_cast %5 : vector<1x208x128xf32> to vector<208x128xf32>
    %7 = vector.extract_strided_slice %4 {offsets = [1, 0, 0], sizes = [1, 208, 128], strides = [1, 1, 1]} : vector<4x208x128xf32> to vector<1x208x128xf32>
    %8 = vector.shape_cast %7 : vector<1x208x128xf32> to vector<208x128xf32>
    %9 = arith.maximumf %6, %8 : vector<208x128xf32>
    %10 = vector.extract_strided_slice %4 {offsets = [2, 0, 0], sizes = [1, 208, 128], strides = [1, 1, 1]} : vector<4x208x128xf32> to vector<1x208x128xf32>
    %11 = vector.shape_cast %10 : vector<1x208x128xf32> to vector<208x128xf32>
    %12 = vector.extract_strided_slice %4 {offsets = [3, 0, 0], sizes = [1, 208, 128], strides = [1, 1, 1]} : vector<4x208x128xf32> to vector<1x208x128xf32>
    %13 = vector.shape_cast %12 : vector<1x208x128xf32> to vector<208x128xf32>
    %14 = arith.maximumf %11, %13 : vector<208x128xf32>
    %15 = arith.maximumf %9, %14 : vector<208x128xf32>
    %c0_4 = arith.constant 0 : index
    %c0_5 = arith.constant 0 : index
    %16 = vector.load %arg3[%c0_4, %c0_5] : memref<1x128xf32, #tpu.memory_space<vmem>>, vector<1x128xf32>
    %17 = vector.broadcast %16 : vector<1x128xf32> to vector<208x128xf32>
    %18 = arith.addf %15, %17 : vector<208x128xf32>
    %cst_6 = arith.constant 0.000000e+00 : f32
    %19 = vector.broadcast %cst_6 : f32 to vector<208x128xf32>
    %20 = arith.maximumf %18, %19 : vector<208x128xf32>
    %21 = arith.truncf %20 : vector<208x128xf32> to vector<208x128xbf16>
    %c0_7 = arith.constant 0 : index
    %c0_8 = arith.constant 0 : index
    %22 = vector.load %arg4[%c0_7, %c0_8] : memref<208x128xbf16, #tpu.memory_space<vmem>>, vector<208x128xbf16>
    tpu.vector_store %arg4[%c0_7, %c0_8], %21 {strides = array<i32>} : memref<208x128xbf16, #tpu.memory_space<vmem>>, vector<208x128xbf16>,
    return
  }
  func.func @transform_0(%arg0: i32) -> (i32, i32, i32) {
    %c0_i32 = arith.constant 0 : i32
    %c0_i32_0 = arith.constant 0 : i32
    %c0_i32_1 = arith.constant 0 : i32
    return %c0_i32, %arg0, %c0_i32_0 : i32, i32, i32
  }
  func.func @transform_1(%arg0: i32) -> (i32, i32) {
    %c0_i32 = arith.constant 0 : i32
    %c0_i32_0 = arith.constant 0 : i32
    %c0_i32_1 = arith.constant 0 : i32
    return %c0_i32, %c0_i32_0 : i32, i32
  }
  func.func @transform_2(%arg0: i32) -> (i32, i32) {
    %c0_i32 = arith.constant 0 : i32
    %c0_i32_0 = arith.constant 0 : i32
    %c0_i32_1 = arith.constant 0 : i32
    return %c0_i32, %c0_i32_0 : i32, i32
  }
  func.func @transform_3(%arg0: i32) -> (i32, i32) {
    %c0_i32 = arith.constant 0 : i32
    %c0_i32_0 = arith.constant 0 : i32
    return %arg0, %c0_i32 : i32, i32
  }
}

module attributes {stable_mosaic.version = 11 : i64} {
  func.func @_conv2_mlp_kernel(%arg0: i32, %arg1: memref<4x25x16x256xbf16, #tpu.memory_space<vmem>>, %arg2: memref<256x128xbf16, #tpu.memory_space<vmem>>, %arg3: memref<1x128xf32, #tpu.memory_space<vmem>>, %arg4: memref<25x128x128xbf16, #tpu.memory_space<vmem>>, %arg5: memref<1x128xf32, #tpu.memory_space<vmem>>, %arg6: memref<128x128xbf16, #tpu.memory_space<vmem>>, %arg7: memref<1x128xf32, #tpu.memory_space<vmem>>, %arg8: memref<128x128xbf16, #tpu.memory_space<vmem>>, %arg9: memref<1x128xf32, #tpu.memory_space<vmem>>, %arg10: memref<16x128xf32, #tpu.memory_space<vmem>>) attributes {dimension_semantics = [#tpu.dimension_semantics<parallel>], iteration_bounds = array<i64: 1>, scalar_prefetch = 0 : i64, scratch_operands = 0 : i64, tpu.core_type = #tpu.core_type<tc>, window_params = [{transform_indices = @transform_0, window_bounds = array<i64: 4, 25, 16, 256>}, {pipeline_mode = #tpu.pipeline_mode<synchronous>, transform_indices = @transform_1, window_bounds = array<i64: 256, 128>}, {pipeline_mode = #tpu.pipeline_mode<synchronous>, transform_indices = @transform_2, window_bounds = array<i64: 1, 128>}, {pipeline_mode = #tpu.pipeline_mode<synchronous>, transform_indices = @transform_3, window_bounds = array<i64: 25, 128, 128>}, {pipeline_mode = #tpu.pipeline_mode<synchronous>, transform_indices = @transform_4, window_bounds = array<i64: 1, 128>}, {pipeline_mode = #tpu.pipeline_mode<synchronous>, transform_indices = @transform_5, window_bounds = array<i64: 128, 128>}, {pipeline_mode = #tpu.pipeline_mode<synchronous>, transform_indices = @transform_6, window_bounds = array<i64: 1, 128>}, {pipeline_mode = #tpu.pipeline_mode<synchronous>, transform_indices = @transform_7, window_bounds = array<i64: 128, 128>}, {pipeline_mode = #tpu.pipeline_mode<synchronous>, transform_indices = @transform_8, window_bounds = array<i64: 1, 128>}, {transform_indices = @transform_9, window_bounds = array<i64: 16, 128>}]} {
    %c0 = arith.constant 0 : index
    %c0_0 = arith.constant 0 : index
    %c0_1 = arith.constant 0 : index
    %c0_2 = arith.constant 0 : index
    %0 = vector.load %arg1[%c0, %c0_0, %c0_1, %c0_2] : memref<4x25x16x256xbf16, #tpu.memory_space<vmem>>, vector<4x25x16x256xbf16>
    %1 = vector.shape_cast %0 : vector<4x25x16x256xbf16> to vector<1600x256xbf16>
    %c0_3 = arith.constant 0 : index
    %c0_4 = arith.constant 0 : index
    %2 = vector.load %arg2[%c0_3, %c0_4] : memref<256x128xbf16, #tpu.memory_space<vmem>>, vector<256x128xbf16>
    %cst = arith.constant dense<0.000000e+00> : vector<1600x128xf32>
    %3 = tpu.matmul %1, %2, %cst {dimension_numbers = #tpu.dot_dimension_numbers<[1], [0], [0], [1], [0, 0, 1, 1], [], []>} : vector<1600x256xbf16>, vector<256x128xbf16>, vector<1600x128xf32> -> vector<1600x128xf32>
    %4 = vector.shape_cast %3 : vector<1600x128xf32> to vector<4x400x128xf32>
    %5 = vector.extract_strided_slice %4 {offsets = [0, 0, 0], sizes = [1, 400, 128], strides = [1, 1, 1]} : vector<4x400x128xf32> to vector<1x400x128xf32>
    %6 = vector.shape_cast %5 : vector<1x400x128xf32> to vector<400x128xf32>
    %7 = vector.extract_strided_slice %4 {offsets = [1, 0, 0], sizes = [1, 400, 128], strides = [1, 1, 1]} : vector<4x400x128xf32> to vector<1x400x128xf32>
    %8 = vector.shape_cast %7 : vector<1x400x128xf32> to vector<400x128xf32>
    %9 = arith.maximumf %6, %8 : vector<400x128xf32>
    %10 = vector.extract_strided_slice %4 {offsets = [2, 0, 0], sizes = [1, 400, 128], strides = [1, 1, 1]} : vector<4x400x128xf32> to vector<1x400x128xf32>
    %11 = vector.shape_cast %10 : vector<1x400x128xf32> to vector<400x128xf32>
    %12 = vector.extract_strided_slice %4 {offsets = [3, 0, 0], sizes = [1, 400, 128], strides = [1, 1, 1]} : vector<4x400x128xf32> to vector<1x400x128xf32>
    %13 = vector.shape_cast %12 : vector<1x400x128xf32> to vector<400x128xf32>
    %14 = arith.maximumf %11, %13 : vector<400x128xf32>
    %15 = arith.maximumf %9, %14 : vector<400x128xf32>
    %c0_5 = arith.constant 0 : index
    %c0_6 = arith.constant 0 : index
    %16 = vector.load %arg3[%c0_5, %c0_6] : memref<1x128xf32, #tpu.memory_space<vmem>>, vector<1x128xf32>
    %17 = vector.broadcast %16 : vector<1x128xf32> to vector<400x128xf32>
    %18 = arith.addf %15, %17 : vector<400x128xf32>
    %cst_7 = arith.constant 0.000000e+00 : f32
    %19 = vector.broadcast %cst_7 : f32 to vector<400x128xf32>
    %20 = arith.maximumf %18, %19 : vector<400x128xf32>
    %21 = arith.truncf %20 : vector<400x128xf32> to vector<400x128xbf16>
    %22 = vector.shape_cast %21 : vector<400x128xbf16> to vector<25x16x128xbf16>
    %23 = vector.extract_strided_slice %22 {offsets = [0, 0, 0], sizes = [1, 16, 128], strides = [1, 1, 1]} : vector<25x16x128xbf16> to vector<1x16x128xbf16>
    %24 = vector.shape_cast %23 : vector<1x16x128xbf16> to vector<16x128xbf16>
    %c0_8 = arith.constant 0 : index
    %c0_9 = arith.constant 0 : index
    %c0_10 = arith.constant 0 : index
    %25 = vector.load %arg4[%c0_8, %c0_9, %c0_10] : memref<25x128x128xbf16, #tpu.memory_space<vmem>>, vector<1x128x128xbf16>
    %26 = vector.shape_cast %25 : vector<1x128x128xbf16> to vector<128x128xbf16>
    %cst_11 = arith.constant dense<0.000000e+00> : vector<16x128xf32>
    %27 = tpu.matmul %24, %26, %cst_11 {dimension_numbers = #tpu.dot_dimension_numbers<[1], [0], [0], [1], [0, 0, 1, 1], [], []>} : vector<16x128xbf16>, vector<128x128xbf16>, vector<16x128xf32> -> vector<16x128xf32>
    %28 = vector.extract_strided_slice %22 {offsets = [1, 0, 0], sizes = [1, 16, 128], strides = [1, 1, 1]} : vector<25x16x128xbf16> to vector<1x16x128xbf16>
    %29 = vector.shape_cast %28 : vector<1x16x128xbf16> to vector<16x128xbf16>
    %c1 = arith.constant 1 : index
    %c0_12 = arith.constant 0 : index
    %c0_13 = arith.constant 0 : index
    %30 = vector.load %arg4[%c1, %c0_12, %c0_13] : memref<25x128x128xbf16, #tpu.memory_space<vmem>>, vector<1x128x128xbf16>
    %31 = vector.shape_cast %30 : vector<1x128x128xbf16> to vector<128x128xbf16>
    %cst_14 = arith.constant dense<0.000000e+00> : vector<16x128xf32>
    %32 = tpu.matmul %29, %31, %cst_14 {dimension_numbers = #tpu.dot_dimension_numbers<[1], [0], [0], [1], [0, 0, 1, 1], [], []>} : vector<16x128xbf16>, vector<128x128xbf16>, vector<16x128xf32> -> vector<16x128xf32>
    %33 = arith.addf %27, %32 : vector<16x128xf32>
    %34 = vector.extract_strided_slice %22 {offsets = [2, 0, 0], sizes = [1, 16, 128], strides = [1, 1, 1]} : vector<25x16x128xbf16> to vector<1x16x128xbf16>
    %35 = vector.shape_cast %34 : vector<1x16x128xbf16> to vector<16x128xbf16>
    %c2 = arith.constant 2 : index
    %c0_15 = arith.constant 0 : index
    %c0_16 = arith.constant 0 : index
    %36 = vector.load %arg4[%c2, %c0_15, %c0_16] : memref<25x128x128xbf16, #tpu.memory_space<vmem>>, vector<1x128x128xbf16>
    %37 = vector.shape_cast %36 : vector<1x128x128xbf16> to vector<128x128xbf16>
    %cst_17 = arith.constant dense<0.000000e+00> : vector<16x128xf32>
    %38 = tpu.matmul %35, %37, %cst_17 {dimension_numbers = #tpu.dot_dimension_numbers<[1], [0], [0], [1], [0, 0, 1, 1], [], []>} : vector<16x128xbf16>, vector<128x128xbf16>, vector<16x128xf32> -> vector<16x128xf32>
    %39 = arith.addf %33, %38 : vector<16x128xf32>
    %40 = vector.extract_strided_slice %22 {offsets = [3, 0, 0], sizes = [1, 16, 128], strides = [1, 1, 1]} : vector<25x16x128xbf16> to vector<1x16x128xbf16>
    %41 = vector.shape_cast %40 : vector<1x16x128xbf16> to vector<16x128xbf16>
    %c3 = arith.constant 3 : index
    %c0_18 = arith.constant 0 : index
    %c0_19 = arith.constant 0 : index
    %42 = vector.load %arg4[%c3, %c0_18, %c0_19] : memref<25x128x128xbf16, #tpu.memory_space<vmem>>, vector<1x128x128xbf16>
    %43 = vector.shape_cast %42 : vector<1x128x128xbf16> to vector<128x128xbf16>
    %cst_20 = arith.constant dense<0.000000e+00> : vector<16x128xf32>
    %44 = tpu.matmul %41, %43, %cst_20 {dimension_numbers = #tpu.dot_dimension_numbers<[1], [0], [0], [1], [0, 0, 1, 1], [], []>} : vector<16x128xbf16>, vector<128x128xbf16>, vector<16x128xf32> -> vector<16x128xf32>
    %45 = arith.addf %39, %44 : vector<16x128xf32>
    %46 = vector.extract_strided_slice %22 {offsets = [4, 0, 0], sizes = [1, 16, 128], strides = [1, 1, 1]} : vector<25x16x128xbf16> to vector<1x16x128xbf16>
    %47 = vector.shape_cast %46 : vector<1x16x128xbf16> to vector<16x128xbf16>
    %c4 = arith.constant 4 : index
    %c0_21 = arith.constant 0 : index
    %c0_22 = arith.constant 0 : index
    %48 = vector.load %arg4[%c4, %c0_21, %c0_22] : memref<25x128x128xbf16, #tpu.memory_space<vmem>>, vector<1x128x128xbf16>
    %49 = vector.shape_cast %48 : vector<1x128x128xbf16> to vector<128x128xbf16>
    %cst_23 = arith.constant dense<0.000000e+00> : vector<16x128xf32>
    %50 = tpu.matmul %47, %49, %cst_23 {dimension_numbers = #tpu.dot_dimension_numbers<[1], [0], [0], [1], [0, 0, 1, 1], [], []>} : vector<16x128xbf16>, vector<128x128xbf16>, vector<16x128xf32> -> vector<16x128xf32>
    %51 = arith.addf %45, %50 : vector<16x128xf32>
    %52 = vector.extract_strided_slice %22 {offsets = [5, 0, 0], sizes = [1, 16, 128], strides = [1, 1, 1]} : vector<25x16x128xbf16> to vector<1x16x128xbf16>
    %53 = vector.shape_cast %52 : vector<1x16x128xbf16> to vector<16x128xbf16>
    %c5 = arith.constant 5 : index
    %c0_24 = arith.constant 0 : index
    %c0_25 = arith.constant 0 : index
    %54 = vector.load %arg4[%c5, %c0_24, %c0_25] : memref<25x128x128xbf16, #tpu.memory_space<vmem>>, vector<1x128x128xbf16>
    %55 = vector.shape_cast %54 : vector<1x128x128xbf16> to vector<128x128xbf16>
    %cst_26 = arith.constant dense<0.000000e+00> : vector<16x128xf32>
    %56 = tpu.matmul %53, %55, %cst_26 {dimension_numbers = #tpu.dot_dimension_numbers<[1], [0], [0], [1], [0, 0, 1, 1], [], []>} : vector<16x128xbf16>, vector<128x128xbf16>, vector<16x128xf32> -> vector<16x128xf32>
    %57 = arith.addf %51, %56 : vector<16x128xf32>
    %58 = vector.extract_strided_slice %22 {offsets = [6, 0, 0], sizes = [1, 16, 128], strides = [1, 1, 1]} : vector<25x16x128xbf16> to vector<1x16x128xbf16>
    %59 = vector.shape_cast %58 : vector<1x16x128xbf16> to vector<16x128xbf16>
    %c6 = arith.constant 6 : index
    %c0_27 = arith.constant 0 : index
    %c0_28 = arith.constant 0 : index
    %60 = vector.load %arg4[%c6, %c0_27, %c0_28] : memref<25x128x128xbf16, #tpu.memory_space<vmem>>, vector<1x128x128xbf16>
    %61 = vector.shape_cast %60 : vector<1x128x128xbf16> to vector<128x128xbf16>
    %cst_29 = arith.constant dense<0.000000e+00> : vector<16x128xf32>
    %62 = tpu.matmul %59, %61, %cst_29 {dimension_numbers = #tpu.dot_dimension_numbers<[1], [0], [0], [1], [0, 0, 1, 1], [], []>} : vector<16x128xbf16>, vector<128x128xbf16>, vector<16x128xf32> -> vector<16x128xf32>
    %63 = arith.addf %57, %62 : vector<16x128xf32>
    %64 = vector.extract_strided_slice %22 {offsets = [7, 0, 0], sizes = [1, 16, 128], strides = [1, 1, 1]} : vector<25x16x128xbf16> to vector<1x16x128xbf16>
    %65 = vector.shape_cast %64 : vector<1x16x128xbf16> to vector<16x128xbf16>
    %c7 = arith.constant 7 : index
    %c0_30 = arith.constant 0 : index
    %c0_31 = arith.constant 0 : index
    %66 = vector.load %arg4[%c7, %c0_30, %c0_31] : memref<25x128x128xbf16, #tpu.memory_space<vmem>>, vector<1x128x128xbf16>
    %67 = vector.shape_cast %66 : vector<1x128x128xbf16> to vector<128x128xbf16>
    %cst_32 = arith.constant dense<0.000000e+00> : vector<16x128xf32>
    %68 = tpu.matmul %65, %67, %cst_32 {dimension_numbers = #tpu.dot_dimension_numbers<[1], [0], [0], [1], [0, 0, 1, 1], [], []>} : vector<16x128xbf16>, vector<128x128xbf16>, vector<16x128xf32> -> vector<16x128xf32>
    %69 = arith.addf %63, %68 : vector<16x128xf32>
    %70 = vector.extract_strided_slice %22 {offsets = [8, 0, 0], sizes = [1, 16, 128], strides = [1, 1, 1]} : vector<25x16x128xbf16> to vector<1x16x128xbf16>
    %71 = vector.shape_cast %70 : vector<1x16x128xbf16> to vector<16x128xbf16>
    %c8 = arith.constant 8 : index
    %c0_33 = arith.constant 0 : index
    %c0_34 = arith.constant 0 : index
    %72 = vector.load %arg4[%c8, %c0_33, %c0_34] : memref<25x128x128xbf16, #tpu.memory_space<vmem>>, vector<1x128x128xbf16>
    %73 = vector.shape_cast %72 : vector<1x128x128xbf16> to vector<128x128xbf16>
    %cst_35 = arith.constant dense<0.000000e+00> : vector<16x128xf32>
    %74 = tpu.matmul %71, %73, %cst_35 {dimension_numbers = #tpu.dot_dimension_numbers<[1], [0], [0], [1], [0, 0, 1, 1], [], []>} : vector<16x128xbf16>, vector<128x128xbf16>, vector<16x128xf32> -> vector<16x128xf32>
    %75 = arith.addf %69, %74 : vector<16x128xf32>
    %76 = vector.extract_strided_slice %22 {offsets = [9, 0, 0], sizes = [1, 16, 128], strides = [1, 1, 1]} : vector<25x16x128xbf16> to vector<1x16x128xbf16>
    %77 = vector.shape_cast %76 : vector<1x16x128xbf16> to vector<16x128xbf16>
    %c9 = arith.constant 9 : index
    %c0_36 = arith.constant 0 : index
    %c0_37 = arith.constant 0 : index
    %78 = vector.load %arg4[%c9, %c0_36, %c0_37] : memref<25x128x128xbf16, #tpu.memory_space<vmem>>, vector<1x128x128xbf16>
    %79 = vector.shape_cast %78 : vector<1x128x128xbf16> to vector<128x128xbf16>
    %cst_38 = arith.constant dense<0.000000e+00> : vector<16x128xf32>
    %80 = tpu.matmul %77, %79, %cst_38 {dimension_numbers = #tpu.dot_dimension_numbers<[1], [0], [0], [1], [0, 0, 1, 1], [], []>} : vector<16x128xbf16>, vector<128x128xbf16>, vector<16x128xf32> -> vector<16x128xf32>
    %81 = arith.addf %75, %80 : vector<16x128xf32>
    %82 = vector.extract_strided_slice %22 {offsets = [10, 0, 0], sizes = [1, 16, 128], strides = [1, 1, 1]} : vector<25x16x128xbf16> to vector<1x16x128xbf16>
    %83 = vector.shape_cast %82 : vector<1x16x128xbf16> to vector<16x128xbf16>
    %c10 = arith.constant 10 : index
    %c0_39 = arith.constant 0 : index
    %c0_40 = arith.constant 0 : index
    %84 = vector.load %arg4[%c10, %c0_39, %c0_40] : memref<25x128x128xbf16, #tpu.memory_space<vmem>>, vector<1x128x128xbf16>
    %85 = vector.shape_cast %84 : vector<1x128x128xbf16> to vector<128x128xbf16>
    %cst_41 = arith.constant dense<0.000000e+00> : vector<16x128xf32>
    %86 = tpu.matmul %83, %85, %cst_41 {dimension_numbers = #tpu.dot_dimension_numbers<[1], [0], [0], [1], [0, 0, 1, 1], [], []>} : vector<16x128xbf16>, vector<128x128xbf16>, vector<16x128xf32> -> vector<16x128xf32>
    %87 = arith.addf %81, %86 : vector<16x128xf32>
    %88 = vector.extract_strided_slice %22 {offsets = [11, 0, 0], sizes = [1, 16, 128], strides = [1, 1, 1]} : vector<25x16x128xbf16> to vector<1x16x128xbf16>
    %89 = vector.shape_cast %88 : vector<1x16x128xbf16> to vector<16x128xbf16>
    %c11 = arith.constant 11 : index
    %c0_42 = arith.constant 0 : index
    %c0_43 = arith.constant 0 : index
    %90 = vector.load %arg4[%c11, %c0_42, %c0_43] : memref<25x128x128xbf16, #tpu.memory_space<vmem>>, vector<1x128x128xbf16>
    %91 = vector.shape_cast %90 : vector<1x128x128xbf16> to vector<128x128xbf16>
    %cst_44 = arith.constant dense<0.000000e+00> : vector<16x128xf32>
    %92 = tpu.matmul %89, %91, %cst_44 {dimension_numbers = #tpu.dot_dimension_numbers<[1], [0], [0], [1], [0, 0, 1, 1], [], []>} : vector<16x128xbf16>, vector<128x128xbf16>, vector<16x128xf32> -> vector<16x128xf32>
    %93 = arith.addf %87, %92 : vector<16x128xf32>
    %94 = vector.extract_strided_slice %22 {offsets = [12, 0, 0], sizes = [1, 16, 128], strides = [1, 1, 1]} : vector<25x16x128xbf16> to vector<1x16x128xbf16>
    %95 = vector.shape_cast %94 : vector<1x16x128xbf16> to vector<16x128xbf16>
    %c12 = arith.constant 12 : index
    %c0_45 = arith.constant 0 : index
    %c0_46 = arith.constant 0 : index
    %96 = vector.load %arg4[%c12, %c0_45, %c0_46] : memref<25x128x128xbf16, #tpu.memory_space<vmem>>, vector<1x128x128xbf16>
    %97 = vector.shape_cast %96 : vector<1x128x128xbf16> to vector<128x128xbf16>
    %cst_47 = arith.constant dense<0.000000e+00> : vector<16x128xf32>
    %98 = tpu.matmul %95, %97, %cst_47 {dimension_numbers = #tpu.dot_dimension_numbers<[1], [0], [0], [1], [0, 0, 1, 1], [], []>} : vector<16x128xbf16>, vector<128x128xbf16>, vector<16x128xf32> -> vector<16x128xf32>
    %99 = arith.addf %93, %98 : vector<16x128xf32>
    %100 = vector.extract_strided_slice %22 {offsets = [13, 0, 0], sizes = [1, 16, 128], strides = [1, 1, 1]} : vector<25x16x128xbf16> to vector<1x16x128xbf16>
    %101 = vector.shape_cast %100 : vector<1x16x128xbf16> to vector<16x128xbf16>
    %c13 = arith.constant 13 : index
    %c0_48 = arith.constant 0 : index
    %c0_49 = arith.constant 0 : index
    %102 = vector.load %arg4[%c13, %c0_48, %c0_49] : memref<25x128x128xbf16, #tpu.memory_space<vmem>>, vector<1x128x128xbf16>
    %103 = vector.shape_cast %102 : vector<1x128x128xbf16> to vector<128x128xbf16>
    %cst_50 = arith.constant dense<0.000000e+00> : vector<16x128xf32>
    %104 = tpu.matmul %101, %103, %cst_50 {dimension_numbers = #tpu.dot_dimension_numbers<[1], [0], [0], [1], [0, 0, 1, 1], [], []>} : vector<16x128xbf16>, vector<128x128xbf16>, vector<16x128xf32> -> vector<16x128xf32>
    %105 = arith.addf %99, %104 : vector<16x128xf32>
    %106 = vector.extract_strided_slice %22 {offsets = [14, 0, 0], sizes = [1, 16, 128], strides = [1, 1, 1]} : vector<25x16x128xbf16> to vector<1x16x128xbf16>
    %107 = vector.shape_cast %106 : vector<1x16x128xbf16> to vector<16x128xbf16>
    %c14 = arith.constant 14 : index
    %c0_51 = arith.constant 0 : index
    %c0_52 = arith.constant 0 : index
    %108 = vector.load %arg4[%c14, %c0_51, %c0_52] : memref<25x128x128xbf16, #tpu.memory_space<vmem>>, vector<1x128x128xbf16>
    %109 = vector.shape_cast %108 : vector<1x128x128xbf16> to vector<128x128xbf16>
    %cst_53 = arith.constant dense<0.000000e+00> : vector<16x128xf32>
    %110 = tpu.matmul %107, %109, %cst_53 {dimension_numbers = #tpu.dot_dimension_numbers<[1], [0], [0], [1], [0, 0, 1, 1], [], []>} : vector<16x128xbf16>, vector<128x128xbf16>, vector<16x128xf32> -> vector<16x128xf32>
    %111 = arith.addf %105, %110 : vector<16x128xf32>
    %112 = vector.extract_strided_slice %22 {offsets = [15, 0, 0], sizes = [1, 16, 128], strides = [1, 1, 1]} : vector<25x16x128xbf16> to vector<1x16x128xbf16>
    %113 = vector.shape_cast %112 : vector<1x16x128xbf16> to vector<16x128xbf16>
    %c15 = arith.constant 15 : index
    %c0_54 = arith.constant 0 : index
    %c0_55 = arith.constant 0 : index
    %114 = vector.load %arg4[%c15, %c0_54, %c0_55] : memref<25x128x128xbf16, #tpu.memory_space<vmem>>, vector<1x128x128xbf16>
    %115 = vector.shape_cast %114 : vector<1x128x128xbf16> to vector<128x128xbf16>
    %cst_56 = arith.constant dense<0.000000e+00> : vector<16x128xf32>
    %116 = tpu.matmul %113, %115, %cst_56 {dimension_numbers = #tpu.dot_dimension_numbers<[1], [0], [0], [1], [0, 0, 1, 1], [], []>} : vector<16x128xbf16>, vector<128x128xbf16>, vector<16x128xf32> -> vector<16x128xf32>
    %117 = arith.addf %111, %116 : vector<16x128xf32>
    %118 = vector.extract_strided_slice %22 {offsets = [16, 0, 0], sizes = [1, 16, 128], strides = [1, 1, 1]} : vector<25x16x128xbf16> to vector<1x16x128xbf16>
    %119 = vector.shape_cast %118 : vector<1x16x128xbf16> to vector<16x128xbf16>
    %c16 = arith.constant 16 : index
    %c0_57 = arith.constant 0 : index
    %c0_58 = arith.constant 0 : index
    %120 = vector.load %arg4[%c16, %c0_57, %c0_58] : memref<25x128x128xbf16, #tpu.memory_space<vmem>>, vector<1x128x128xbf16>
    %121 = vector.shape_cast %120 : vector<1x128x128xbf16> to vector<128x128xbf16>
    %cst_59 = arith.constant dense<0.000000e+00> : vector<16x128xf32>
    %122 = tpu.matmul %119, %121, %cst_59 {dimension_numbers = #tpu.dot_dimension_numbers<[1], [0], [0], [1], [0, 0, 1, 1], [], []>} : vector<16x128xbf16>, vector<128x128xbf16>, vector<16x128xf32> -> vector<16x128xf32>
    %123 = arith.addf %117, %122 : vector<16x128xf32>
    %124 = vector.extract_strided_slice %22 {offsets = [17, 0, 0], sizes = [1, 16, 128], strides = [1, 1, 1]} : vector<25x16x128xbf16> to vector<1x16x128xbf16>
    %125 = vector.shape_cast %124 : vector<1x16x128xbf16> to vector<16x128xbf16>
    %c17 = arith.constant 17 : index
    %c0_60 = arith.constant 0 : index
    %c0_61 = arith.constant 0 : index
    %126 = vector.load %arg4[%c17, %c0_60, %c0_61] : memref<25x128x128xbf16, #tpu.memory_space<vmem>>, vector<1x128x128xbf16>
    %127 = vector.shape_cast %126 : vector<1x128x128xbf16> to vector<128x128xbf16>
    %cst_62 = arith.constant dense<0.000000e+00> : vector<16x128xf32>
    %128 = tpu.matmul %125, %127, %cst_62 {dimension_numbers = #tpu.dot_dimension_numbers<[1], [0], [0], [1], [0, 0, 1, 1], [], []>} : vector<16x128xbf16>, vector<128x128xbf16>, vector<16x128xf32> -> vector<16x128xf32>
    %129 = arith.addf %123, %128 : vector<16x128xf32>
    %130 = vector.extract_strided_slice %22 {offsets = [18, 0, 0], sizes = [1, 16, 128], strides = [1, 1, 1]} : vector<25x16x128xbf16> to vector<1x16x128xbf16>
    %131 = vector.shape_cast %130 : vector<1x16x128xbf16> to vector<16x128xbf16>
    %c18 = arith.constant 18 : index
    %c0_63 = arith.constant 0 : index
    %c0_64 = arith.constant 0 : index
    %132 = vector.load %arg4[%c18, %c0_63, %c0_64] : memref<25x128x128xbf16, #tpu.memory_space<vmem>>, vector<1x128x128xbf16>
    %133 = vector.shape_cast %132 : vector<1x128x128xbf16> to vector<128x128xbf16>
    %cst_65 = arith.constant dense<0.000000e+00> : vector<16x128xf32>
    %134 = tpu.matmul %131, %133, %cst_65 {dimension_numbers = #tpu.dot_dimension_numbers<[1], [0], [0], [1], [0, 0, 1, 1], [], []>} : vector<16x128xbf16>, vector<128x128xbf16>, vector<16x128xf32> -> vector<16x128xf32>
    %135 = arith.addf %129, %134 : vector<16x128xf32>
    %136 = vector.extract_strided_slice %22 {offsets = [19, 0, 0], sizes = [1, 16, 128], strides = [1, 1, 1]} : vector<25x16x128xbf16> to vector<1x16x128xbf16>
    %137 = vector.shape_cast %136 : vector<1x16x128xbf16> to vector<16x128xbf16>
    %c19 = arith.constant 19 : index
    %c0_66 = arith.constant 0 : index
    %c0_67 = arith.constant 0 : index
    %138 = vector.load %arg4[%c19, %c0_66, %c0_67] : memref<25x128x128xbf16, #tpu.memory_space<vmem>>, vector<1x128x128xbf16>
    %139 = vector.shape_cast %138 : vector<1x128x128xbf16> to vector<128x128xbf16>
    %cst_68 = arith.constant dense<0.000000e+00> : vector<16x128xf32>
    %140 = tpu.matmul %137, %139, %cst_68 {dimension_numbers = #tpu.dot_dimension_numbers<[1], [0], [0], [1], [0, 0, 1, 1], [], []>} : vector<16x128xbf16>, vector<128x128xbf16>, vector<16x128xf32> -> vector<16x128xf32>
    %141 = arith.addf %135, %140 : vector<16x128xf32>
    %142 = vector.extract_strided_slice %22 {offsets = [20, 0, 0], sizes = [1, 16, 128], strides = [1, 1, 1]} : vector<25x16x128xbf16> to vector<1x16x128xbf16>
    %143 = vector.shape_cast %142 : vector<1x16x128xbf16> to vector<16x128xbf16>
    %c20 = arith.constant 20 : index
    %c0_69 = arith.constant 0 : index
    %c0_70 = arith.constant 0 : index
    %144 = vector.load %arg4[%c20, %c0_69, %c0_70] : memref<25x128x128xbf16, #tpu.memory_space<vmem>>, vector<1x128x128xbf16>
    %145 = vector.shape_cast %144 : vector<1x128x128xbf16> to vector<128x128xbf16>
    %cst_71 = arith.constant dense<0.000000e+00> : vector<16x128xf32>
    %146 = tpu.matmul %143, %145, %cst_71 {dimension_numbers = #tpu.dot_dimension_numbers<[1], [0], [0], [1], [0, 0, 1, 1], [], []>} : vector<16x128xbf16>, vector<128x128xbf16>, vector<16x128xf32> -> vector<16x128xf32>
    %147 = arith.addf %141, %146 : vector<16x128xf32>
    %148 = vector.extract_strided_slice %22 {offsets = [21, 0, 0], sizes = [1, 16, 128], strides = [1, 1, 1]} : vector<25x16x128xbf16> to vector<1x16x128xbf16>
    %149 = vector.shape_cast %148 : vector<1x16x128xbf16> to vector<16x128xbf16>
    %c21 = arith.constant 21 : index
    %c0_72 = arith.constant 0 : index
    %c0_73 = arith.constant 0 : index
    %150 = vector.load %arg4[%c21, %c0_72, %c0_73] : memref<25x128x128xbf16, #tpu.memory_space<vmem>>, vector<1x128x128xbf16>
    %151 = vector.shape_cast %150 : vector<1x128x128xbf16> to vector<128x128xbf16>
    %cst_74 = arith.constant dense<0.000000e+00> : vector<16x128xf32>
    %152 = tpu.matmul %149, %151, %cst_74 {dimension_numbers = #tpu.dot_dimension_numbers<[1], [0], [0], [1], [0, 0, 1, 1], [], []>} : vector<16x128xbf16>, vector<128x128xbf16>, vector<16x128xf32> -> vector<16x128xf32>
    %153 = arith.addf %147, %152 : vector<16x128xf32>
    %154 = vector.extract_strided_slice %22 {offsets = [22, 0, 0], sizes = [1, 16, 128], strides = [1, 1, 1]} : vector<25x16x128xbf16> to vector<1x16x128xbf16>
    %155 = vector.shape_cast %154 : vector<1x16x128xbf16> to vector<16x128xbf16>
    %c22 = arith.constant 22 : index
    %c0_75 = arith.constant 0 : index
    %c0_76 = arith.constant 0 : index
    %156 = vector.load %arg4[%c22, %c0_75, %c0_76] : memref<25x128x128xbf16, #tpu.memory_space<vmem>>, vector<1x128x128xbf16>
    %157 = vector.shape_cast %156 : vector<1x128x128xbf16> to vector<128x128xbf16>
    %cst_77 = arith.constant dense<0.000000e+00> : vector<16x128xf32>
    %158 = tpu.matmul %155, %157, %cst_77 {dimension_numbers = #tpu.dot_dimension_numbers<[1], [0], [0], [1], [0, 0, 1, 1], [], []>} : vector<16x128xbf16>, vector<128x128xbf16>, vector<16x128xf32> -> vector<16x128xf32>
    %159 = arith.addf %153, %158 : vector<16x128xf32>
    %160 = vector.extract_strided_slice %22 {offsets = [23, 0, 0], sizes = [1, 16, 128], strides = [1, 1, 1]} : vector<25x16x128xbf16> to vector<1x16x128xbf16>
    %161 = vector.shape_cast %160 : vector<1x16x128xbf16> to vector<16x128xbf16>
    %c23 = arith.constant 23 : index
    %c0_78 = arith.constant 0 : index
    %c0_79 = arith.constant 0 : index
    %162 = vector.load %arg4[%c23, %c0_78, %c0_79] : memref<25x128x128xbf16, #tpu.memory_space<vmem>>, vector<1x128x128xbf16>
    %163 = vector.shape_cast %162 : vector<1x128x128xbf16> to vector<128x128xbf16>
    %cst_80 = arith.constant dense<0.000000e+00> : vector<16x128xf32>
    %164 = tpu.matmul %161, %163, %cst_80 {dimension_numbers = #tpu.dot_dimension_numbers<[1], [0], [0], [1], [0, 0, 1, 1], [], []>} : vector<16x128xbf16>, vector<128x128xbf16>, vector<16x128xf32> -> vector<16x128xf32>
    %165 = arith.addf %159, %164 : vector<16x128xf32>
    %166 = vector.extract_strided_slice %22 {offsets = [24, 0, 0], sizes = [1, 16, 128], strides = [1, 1, 1]} : vector<25x16x128xbf16> to vector<1x16x128xbf16>
    %167 = vector.shape_cast %166 : vector<1x16x128xbf16> to vector<16x128xbf16>
    %c24 = arith.constant 24 : index
    %c0_81 = arith.constant 0 : index
    %c0_82 = arith.constant 0 : index
    %168 = vector.load %arg4[%c24, %c0_81, %c0_82] : memref<25x128x128xbf16, #tpu.memory_space<vmem>>, vector<1x128x128xbf16>
    %169 = vector.shape_cast %168 : vector<1x128x128xbf16> to vector<128x128xbf16>
    %cst_83 = arith.constant dense<0.000000e+00> : vector<16x128xf32>
    %170 = tpu.matmul %167, %169, %cst_83 {dimension_numbers = #tpu.dot_dimension_numbers<[1], [0], [0], [1], [0, 0, 1, 1], [], []>} : vector<16x128xbf16>, vector<128x128xbf16>, vector<16x128xf32> -> vector<16x128xf32>
    %171 = arith.addf %165, %170 : vector<16x128xf32>
    %c0_84 = arith.constant 0 : index
    %c0_85 = arith.constant 0 : index
    %172 = vector.load %arg5[%c0_84, %c0_85] : memref<1x128xf32, #tpu.memory_space<vmem>>, vector<1x128xf32>
    %173 = vector.broadcast %172 : vector<1x128xf32> to vector<16x128xf32>
    %174 = arith.addf %171, %173 : vector<16x128xf32>
    %cst_86 = arith.constant 0.000000e+00 : f32
    %175 = vector.broadcast %cst_86 : f32 to vector<16x128xf32>
    %176 = arith.maximumf %174, %175 : vector<16x128xf32>
    %177 = arith.truncf %176 : vector<16x128xf32> to vector<16x128xbf16>
    %c0_87 = arith.constant 0 : index
    %c0_88 = arith.constant 0 : index
    %178 = vector.load %arg6[%c0_87, %c0_88] : memref<128x128xbf16, #tpu.memory_space<vmem>>, vector<128x128xbf16>
    %cst_89 = arith.constant dense<0.000000e+00> : vector<16x128xf32>
    %179 = tpu.matmul %177, %178, %cst_89 {dimension_numbers = #tpu.dot_dimension_numbers<[1], [0], [0], [1], [0, 0, 1, 1], [], []>} : vector<16x128xbf16>, vector<128x128xbf16>, vector<16x128xf32> -> vector<16x128xf32>
    %c0_90 = arith.constant 0 : index
    %c0_91 = arith.constant 0 : index
    %180 = vector.load %arg7[%c0_90, %c0_91] : memref<1x128xf32, #tpu.memory_space<vmem>>, vector<1x128xf32>
    %181 = vector.broadcast %180 : vector<1x128xf32> to vector<16x128xf32>
    %182 = arith.addf %179, %181 : vector<16x128xf32>
    %cst_92 = arith.constant 0.000000e+00 : f32
    %183 = vector.broadcast %cst_92 : f32 to vector<16x128xf32>
    %184 = arith.maximumf %182, %183 : vector<16x128xf32>
    %185 = arith.truncf %184 : vector<16x128xf32> to vector<16x128xbf16>
    %c0_93 = arith.constant 0 : index
    %c0_94 = arith.constant 0 : index
    %186 = vector.load %arg8[%c0_93, %c0_94] : memref<128x128xbf16, #tpu.memory_space<vmem>>, vector<128x128xbf16>
    %cst_95 = arith.constant dense<0.000000e+00> : vector<16x128xf32>
    %187 = tpu.matmul %185, %186, %cst_95 {dimension_numbers = #tpu.dot_dimension_numbers<[1], [0], [0], [1], [0, 0, 1, 1], [], []>} : vector<16x128xbf16>, vector<128x128xbf16>, vector<16x128xf32> -> vector<16x128xf32>
    %c0_96 = arith.constant 0 : index
    %c0_97 = arith.constant 0 : index
    %188 = vector.load %arg9[%c0_96, %c0_97] : memref<1x128xf32, #tpu.memory_space<vmem>>, vector<1x128xf32>
    %189 = vector.broadcast %188 : vector<1x128xf32> to vector<16x128xf32>
    %190 = arith.addf %187, %189 : vector<16x128xf32>
    %c0_98 = arith.constant 0 : index
    %c0_99 = arith.constant 0 : index
    %191 = vector.load %arg10[%c0_98, %c0_99] : memref<16x128xf32, #tpu.memory_space<vmem>>, vector<16x128xf32>
    tpu.vector_store %arg10[%c0_98, %c0_99], %190 {strides = array<i32>} : memref<16x128xf32, #tpu.memory_space<vmem>>, vector<16x128xf32>,
    return
  }
  func.func @transform_0(%arg0: i32) -> (i32, i32, i32, i32) {
    %c0_i32 = arith.constant 0 : i32
    %c0_i32_0 = arith.constant 0 : i32
    %c0_i32_1 = arith.constant 0 : i32
    %c0_i32_2 = arith.constant 0 : i32
    return %c0_i32, %c0_i32_0, %arg0, %c0_i32_1 : i32, i32, i32, i32
  }
  func.func @transform_1(%arg0: i32) -> (i32, i32) {
    %c0_i32 = arith.constant 0 : i32
    %c0_i32_0 = arith.constant 0 : i32
    %c0_i32_1 = arith.constant 0 : i32
    return %c0_i32, %c0_i32_0 : i32, i32
  }
  func.func @transform_2(%arg0: i32) -> (i32, i32) {
    %c0_i32 = arith.constant 0 : i32
    %c0_i32_0 = arith.constant 0 : i32
    %c0_i32_1 = arith.constant 0 : i32
    return %c0_i32, %c0_i32_0 : i32, i32
  }
  func.func @transform_3(%arg0: i32) -> (i32, i32, i32) {
    %c0_i32 = arith.constant 0 : i32
    %c0_i32_0 = arith.constant 0 : i32
    %c0_i32_1 = arith.constant 0 : i32
    %c0_i32_2 = arith.constant 0 : i32
    return %c0_i32, %c0_i32_0, %c0_i32_1 : i32, i32, i32
  }
  func.func @transform_4(%arg0: i32) -> (i32, i32) {
    %c0_i32 = arith.constant 0 : i32
    %c0_i32_0 = arith.constant 0 : i32
    %c0_i32_1 = arith.constant 0 : i32
    return %c0_i32, %c0_i32_0 : i32, i32
  }
  func.func @transform_5(%arg0: i32) -> (i32, i32) {
    %c0_i32 = arith.constant 0 : i32
    %c0_i32_0 = arith.constant 0 : i32
    %c0_i32_1 = arith.constant 0 : i32
    return %c0_i32, %c0_i32_0 : i32, i32
  }
  func.func @transform_6(%arg0: i32) -> (i32, i32) {
    %c0_i32 = arith.constant 0 : i32
    %c0_i32_0 = arith.constant 0 : i32
    %c0_i32_1 = arith.constant 0 : i32
    return %c0_i32, %c0_i32_0 : i32, i32
  }
  func.func @transform_7(%arg0: i32) -> (i32, i32) {
    %c0_i32 = arith.constant 0 : i32
    %c0_i32_0 = arith.constant 0 : i32
    %c0_i32_1 = arith.constant 0 : i32
    return %c0_i32, %c0_i32_0 : i32, i32
  }
  func.func @transform_8(%arg0: i32) -> (i32, i32) {
    %c0_i32 = arith.constant 0 : i32
    %c0_i32_0 = arith.constant 0 : i32
    %c0_i32_1 = arith.constant 0 : i32
    return %c0_i32, %c0_i32_0 : i32, i32
  }
  func.func @transform_9(%arg0: i32) -> (i32, i32) {
    %c0_i32 = arith.constant 0 : i32
    %c0_i32_0 = arith.constant 0 : i32
    return %arg0, %c0_i32 : i32, i32
  }
}

</mosaic_0001>

<bundles_post_ra>
// kernel: net_forward.2
= control target key start
LH: loop header
LB: loop body
LE: loop exit
PB: predicated region body
PF: predicated region fallthrough
CT: control target
= control target key end

     0   :  { %s2108_s12 = smov 0   ;;  %s2110_s13 = smov 0   ;;  %s2392_s0 = inlined_call_operand.vmem [shape: bf16[4,416,128], index: 0, kind: input, shape index: {}]   ;;  %s2393_s1 = inlined_call_operand.vmem [shape: bf16[128,128], index: 1, kind: input, shape index: {}]   ;;  %s2394_s2 = inlined_call_operand.vmem [shape: f32[1,128], index: 2, kind: input, shape index: {}]   ;;  %s2395_s3 = inlined_call_operand.vmem [shape: bf16[416,128], index: 3, kind: output, shape index: {}]  }
   0x1   :  { %s2112_s14 = smov 0  }
   0x2 LB: > { %s1626_s15 = sadd.s32 4294967295, %s2086_s14   ;;  %s2125_s16 = sadd.s32 1, %s2086_s14   ;;  %s2086_s14 = sphi %s2112_s14, %s2398_s14   ;;  %s2082_s13 = sphi %s2110_s13, %s2397_s13   ;;  %s2078_s12 = sphi %s2108_s12, %s2396_s12  }
   0x3   : > { %s17_s17 = ssub.s32 %s2086_s14, %s2125_s16  ;;  %s20_s18 = sadd.s32 1, %s2082_s13 }
   0x4   : > { %p18_p0 = scmp.eq.s32.totalorder %s17_s17, 0  ;;  %p27_p1 = scmp.ne.s32.totalorder %s2082_s13, %s2078_s12 }
   0x5   : > { %p28_p2 = scmp.eq.s32.totalorder %s2086_s14, 0  ;;  %p1629_p4 = scmp.ge.s32.totalorder %s2086_s14, 2 }
   0x6   : > { %s2134_s19 = scalar_select %p18_p0, %s2082_s13, %s20_s18  }
   0x7   : > { %p29_p3 = por %p28_p2, %p27_p1  ;;  %127 = sbr.rel (%p1629_p4) target bundleno = 69 (0x45), region = 24 }
   0xc   : > { %130 = sbr.rel (!%p29_p3) target bundleno = 69 (0x45), region = 28  ;;  %s132_s20 = sand.u32 (%p29_p3), 1, %s2082_s13  }
   0xd   : > { %s1875_s21 = smul.u32 (%p29_p3), 104, %s2086_s14 }
   0xe   : > { %s2037_s22 = smul.u32 (%p29_p3), 416, %s132_s20 }
   0xf   : > { %s2142_s25 = scalar_lea.vmem (%p29_p3), %s2392_s0, %s1875_s21 }
  0x10   : > { %v154_v0 = vld [vmem:[%s2142_s25] sm:$0xff] (%p29_p3)   ;;  %v158_v1 = vld [vmem:[%s2142_s25 + $0x8] sm:$0xff] (%p29_p3)   ;;  %v162_v2 = vld [vmem:[%s2142_s25 + $0x10] sm:$0xff] (%p29_p3)   ;;  %s2147_s26 = scalar_lea.vmem (%p29_p3), [#allocation2], %s2037_s22 }
  0x11   : > { %155 = vst [vmem:[%s2147_s26] sm:$0xff] %v154_v0   ;;  %v166_v3 = vld [vmem:[%s2142_s25 + $0x18] sm:$0xff]   ;;  %v170_v4 = vld [vmem:[%s2142_s25 + $0x20] sm:$0xff]   ;;  %v174_v5 = vld [vmem:[%s2142_s25 + $0x28] sm:$0xff]  }
  0x12   : > { %159 = vst [vmem:[%s2147_s26 + $0x8] sm:$0xff] %v158_v1   ;;  %v178_v6 = vld [vmem:[%s2142_s25 + $0x30] sm:$0xff]   ;;  %v182_v7 = vld [vmem:[%s2142_s25 + $0x38] sm:$0xff]   ;;  %v186_v8 = vld [vmem:[%s2142_s25 + $0x40] sm:$0xff]  }
  0x13   : > { %163 = vst [vmem:[%s2147_s26 + $0x10] sm:$0xff] %v162_v2   ;;  %v190_v9 = vld [vmem:[%s2142_s25 + $0x48] sm:$0xff]   ;;  %v194_v10 = vld [vmem:[%s2142_s25 + $0x50] sm:$0xff]   ;;  %v198_v11 = vld [vmem:[%s2142_s25 + $0x58] sm:$0xff]  }
  0x14   : > { %167 = vst [vmem:[%s2147_s26 + $0x18] sm:$0xff] %v166_v3   ;;  %v202_v12 = vld [vmem:[%s2142_s25 + $0x60] sm:$0xff]   ;;  %v206_v13 = vld [vmem:[%s2142_s25 + $0xd0] sm:$0xff]   ;;  %v210_v14 = vld [vmem:[%s2142_s25 + $0xd8] sm:$0xff]  }
  0x15   : > { %171 = vst [vmem:[%s2147_s26 + $0x20] sm:$0xff] %v170_v4   ;;  %v214_v15 = vld [vmem:[%s2142_s25 + $0xe0] sm:$0xff]   ;;  %v218_v16 = vld [vmem:[%s2142_s25 + $0xe8] sm:$0xff]   ;;  %v222_v17 = vld [vmem:[%s2142_s25 + $0xf0] sm:$0xff]  }
  0x16   : > { %175 = vst [vmem:[%s2147_s26 + $0x28] sm:$0xff] %v174_v5   ;;  %v226_v18 = vld [vmem:[%s2142_s25 + $0xf8] sm:$0xff]   ;;  %v230_v19 = vld [vmem:[%s2142_s25 + $0x100] sm:$0xff]   ;;  %v234_v20 = vld [vmem:[%s2142_s25 + $0x108] sm:$0xff]  }
  0x17   : > { %179 = vst [vmem:[%s2147_s26 + $0x30] sm:$0xff] %v178_v6   ;;  %v238_v21 = vld [vmem:[%s2142_s25 + $0x110] sm:$0xff]   ;;  %v242_v22 = vld [vmem:[%s2142_s25 + $0x118] sm:$0xff]   ;;  %v246_v23 = vld [vmem:[%s2142_s25 + $0x120] sm:$0xff]  }
  0x18   : > { %183 = vst [vmem:[%s2147_s26 + $0x38] sm:$0xff] %v182_v7   ;;  %v250_v24 = vld [vmem:[%s2142_s25 + $0x128] sm:$0xff]   ;;  %v254_v25 = vld [vmem:[%s2142_s25 + $0x130] sm:$0xff]   ;;  %v258_v26 = vld [vmem:[%s2142_s25 + $0x1a0] sm:$0xff]  }
  0x19   : > { %187 = vst [vmem:[%s2147_s26 + $0x40] sm:$0xff] %v186_v8   ;;  %v262_v27 = vld [vmem:[%s2142_s25 + $0x1a8] sm:$0xff]   ;;  %v266_v28 = vld [vmem:[%s2142_s25 + $0x1b0] sm:$0xff]   ;;  %v270_v29 = vld [vmem:[%s2142_s25 + $0x1b8] sm:$0xff]  }
  0x1a   : > { %191 = vst [vmem:[%s2147_s26 + $0x48] sm:$0xff] %v190_v9   ;;  %v274_v30 = vld [vmem:[%s2142_s25 + $0x1c0] sm:$0xff]   ;;  %v278_v31 = vld [vmem:[%s2142_s25 + $0x1c8] sm:$0xff]   ;;  %v282_v32 = vld [vmem:[%s2142_s25 + $0x1d0] sm:$0xff]  }
  0x1b   : > { %195 = vst [vmem:[%s2147_s26 + $0x50] sm:$0xff] %v194_v10   ;;  %v286_v33 = vld [vmem:[%s2142_s25 + $0x1d8] sm:$0xff]   ;;  %v290_v34 = vld [vmem:[%s2142_s25 + $0x1e0] sm:$0xff]   ;;  %v294_v35 = vld [vmem:[%s2142_s25 + $0x1e8] sm:$0xff]  }
  0x1c   : > { %199 = vst [vmem:[%s2147_s26 + $0x58] sm:$0xff] %v198_v11   ;;  %v298_v36 = vld [vmem:[%s2142_s25 + $0x1f0] sm:$0xff]   ;;  %v302_v37 = vld [vmem:[%s2142_s25 + $0x1f8] sm:$0xff]   ;;  %v306_v38 = vld [vmem:[%s2142_s25 + $0x200] sm:$0xff]  }
  0x1d   : > { %203 = vst [vmem:[%s2147_s26 + $0x60] sm:$0xff] %v202_v12   ;;  %v310_v39 = vld [vmem:[%s2142_s25 + $0x270] sm:$0xff]   ;;  %v314_v40 = vld [vmem:[%s2142_s25 + $0x278] sm:$0xff]   ;;  %v318_v41 = vld [vmem:[%s2142_s25 + $0x280] sm:$0xff]  }
  0x1e   : > { %207 = vst [vmem:[%s2147_s26 + $0x68] sm:$0xff] %v206_v13   ;;  %v322_v42 = vld [vmem:[%s2142_s25 + $0x288] sm:$0xff]   ;;  %v326_v43 = vld [vmem:[%s2142_s25 + $0x290] sm:$0xff]   ;;  %v330_v44 = vld [vmem:[%s2142_s25 + $0x298] sm:$0xff]  }
  0x1f   : > { %211 = vst [vmem:[%s2147_s26 + $0x70] sm:$0xff] %v210_v14   ;;  %v334_v45 = vld [vmem:[%s2142_s25 + $0x2a0] sm:$0xff]   ;;  %v338_v46 = vld [vmem:[%s2142_s25 + $0x2a8] sm:$0xff]   ;;  %v342_v47 = vld [vmem:[%s2142_s25 + $0x2b0] sm:$0xff]  }
  0x20   : > { %215 = vst [vmem:[%s2147_s26 + $0x78] sm:$0xff] %v214_v15   ;;  %v346_v48 = vld [vmem:[%s2142_s25 + $0x2b8] sm:$0xff]   ;;  %v350_v49 = vld [vmem:[%s2142_s25 + $0x2c0] sm:$0xff]   ;;  %v354_v50 = vld [vmem:[%s2142_s25 + $0x2c8] sm:$0xff]  }
  0x21   : > { %219 = vst [vmem:[%s2147_s26 + $0x80] sm:$0xff] %v218_v16   ;;  %v358_v51 = vld [vmem:[%s2142_s25 + $0x2d0] sm:$0xff]  }
  0x22   : > { %223 = vst [vmem:[%s2147_s26 + $0x88] sm:$0xff] %v222_v17  }
  0x23   : > { %227 = vst [vmem:[%s2147_s26 + $0x90] sm:$0xff] %v226_v18  }
  0x24   : > { %231 = vst [vmem:[%s2147_s26 + $0x98] sm:$0xff] %v230_v19  }
  0x25   : > { %235 = vst [vmem:[%s2147_s26 + $0xa0] sm:$0xff] %v234_v20  }
  0x26   : > { %239 = vst [vmem:[%s2147_s26 + $0xa8] sm:$0xff] %v238_v21  }
  0x27   : > { %243 = vst [vmem:[%s2147_s26 + $0xb0] sm:$0xff] %v242_v22  }
  0x28   : > { %247 = vst [vmem:[%s2147_s26 + $0xb8] sm:$0xff] %v246_v23  }
  0x29   : > { %251 = vst [vmem:[%s2147_s26 + $0xc0] sm:$0xff] %v250_v24  }
  0x2a   : > { %255 = vst [vmem:[%s2147_s26 + $0xc8] sm:$0xff] %v254_v25  }
  0x2b   : > { %259 = vst [vmem:[%s2147_s26 + $0xd0] sm:$0xff] %v258_v26  }
  0x2c   : > { %263 = vst [vmem:[%s2147_s26 + $0xd8] sm:$0xff] %v262_v27  }
  0x2d   : > { %267 = vst [vmem:[%s2147_s26 + $0xe0] sm:$0xff] %v266_v28  }
  0x2e   : > { %271 = vst [vmem:[%s2147_s26 + $0xe8] sm:$0xff] %v270_v29  }
  0x2f   : > { %275 = vst [vmem:[%s2147_s26 + $0xf0] sm:$0xff] %v274_v30  }
  0x30   : > { %279 = vst [vmem:[%s2147_s26 + $0xf8] sm:$0xff] %v278_v31  }
  0x31   : > { %283 = vst [vmem:[%s2147_s26 + $0x100] sm:$0xff] %v282_v32  }
  0x32   : > { %287 = vst [vmem:[%s2147_s26 + $0x108] sm:$0xff] %v286_v33  }
  0x33   : > { %291 = vst [vmem:[%s2147_s26 + $0x110] sm:$0xff] %v290_v34  }
  0x34   : > { %295 = vst [vmem:[%s2147_s26 + $0x118] sm:$0xff] %v294_v35  }
  0x35   : > { %299 = vst [vmem:[%s2147_s26 + $0x120] sm:$0xff] %v298_v36  }
  0x36   : > { %303 = vst [vmem:[%s2147_s26 + $0x128] sm:$0xff] %v302_v37  }
  0x37   : > { %307 = vst [vmem:[%s2147_s26 + $0x130] sm:$0xff] %v306_v38  }
  0x38   : > { %311 = vst [vmem:[%s2147_s26 + $0x138] sm:$0xff] %v310_v39  }
  0x39   : > { %315 = vst [vmem:[%s2147_s26 + $0x140] sm:$0xff] %v314_v40  }
  0x3a   : > { %319 = vst [vmem:[%s2147_s26 + $0x148] sm:$0xff] %v318_v41  }
  0x3b   : > { %323 = vst [vmem:[%s2147_s26 + $0x150] sm:$0xff] %v322_v42  }
  0x3c   : > { %327 = vst [vmem:[%s2147_s26 + $0x158] sm:$0xff] %v326_v43  }
  0x3d   : > { %331 = vst [vmem:[%s2147_s26 + $0x160] sm:$0xff] %v330_v44  }
  0x3e   : > { %335 = vst [vmem:[%s2147_s26 + $0x168] sm:$0xff] %v334_v45  }
  0x3f   : > { %339 = vst [vmem:[%s2147_s26 + $0x170] sm:$0xff] %v338_v46  }
  0x40   : > { %343 = vst [vmem:[%s2147_s26 + $0x178] sm:$0xff] %v342_v47  }
  0x41   : > { %347 = vst [vmem:[%s2147_s26 + $0x180] sm:$0xff] %v346_v48  }
  0x42   : > { %351 = vst [vmem:[%s2147_s26 + $0x188] sm:$0xff] %v350_v49  }
  0x43   : > { %355 = vst [vmem:[%s2147_s26 + $0x190] sm:$0xff] %v354_v50  }
  0x44   : > { %359 = vst [vmem:[%s2147_s26 + $0x198] sm:$0xff] %v358_v51  }
  0x45 PF: > { %p1631_p5 = scmp.ge.s32.totalorder %s2086_s14, 1  ;;  %p592_p6 = scmp.lt.s32.totalorder %s2086_s14, 3 }
  0x47   : > { %p593_p7 = pnand %p1631_p5, %p592_p6 }
  0x48   : > { %s599_s17 = sand.u32 (!%p593_p7), 1, %s2078_s12   ;;  %s623_s12 = smul.u32 (!%p593_p7), 26, %s1626_s15 }
  0x49   : > { %596 = sbr.rel (%p593_p7) target bundleno = 454 (0x1c6), region = 69 }
  0x4a   : > { %s2038_s21 = smul.u32 (!%p593_p7), 416, %s599_s17  ;;  %p624_p8 = scmp.lt.s32.totalorder (!%p593_p7), %s623_s12, 51 }
  0x4c   : > { %s2277_s24 = scalar_lea.vmem (!%p593_p7), [#allocation2], %s2038_s21 }
  0x4e   : > { %v1935_v52 = vld [vmem:[%s2393_s1 + $0x38] sm:$0xff]  ;;  %v1934_v53 = vld [vmem:[%s2393_s1 + $0x30] sm:$0xff]  ;;  %v1933_v54 = vld [vmem:[%s2393_s1 + $0x28] sm:$0xff]  ;;  %s2400_s12 = smov (!%p624_p8, %s623_s12), 51 }
  0x4f   : > { %1109 = vmatpush.bf16.msra.mxu0 %v1935_v52  ;;  %2013 = vmatpush.bf16.msra.mxu1 %v1935_v52  ;;  %v1932_v55 = vld [vmem:[%s2393_s1 + $0x20] sm:$0xff]  ;;  %v1931_v56 = vld [vmem:[%s2393_s1 + $0x18] sm:$0xff]  ;;  %v1930_v57 = vld [vmem:[%s2393_s1 + $0x10] sm:$0xff]  ;;  %s1632_s14 = sshll.u32 %s2400_s12, 2 }
  0x50   : > { %2014 = vmatpush.bf16.msra.mxu2 %v1935_v52  ;;  %2015 = vmatpush.bf16.msra.mxu3 %v1935_v52  ;;  %v1929_v58 = vld [vmem:[%s2393_s1 + $0x8] sm:$0xff]  ;;  %v1928_v59 = vld [vmem:[%s2393_s1] sm:$0xff]  ;;  %v1902_v62 = vld [vmem:[%s2277_s24 + $0xd0] sm:$0xff]  ;;  %s2331_s28 = scalar_lea.vmem %s2395_s3, %s1632_s14 }
  0x51   : > { %v1876_v60 = vld [vmem:[%s2277_s24] sm:$0xff]  ;;  %v1889_v61 = vld [vmem:[%s2277_s24 + $0x68] sm:$0xff]  ;;  %v1915_v63 = vld [vmem:[%s2277_s24 + $0x138] sm:$0xff] }
  0x52   : > { %v1877_v0 = vld [vmem:[%s2277_s24 + $0x8] sm:$0xff]  ;;  %v1890_v1 = vld [vmem:[%s2277_s24 + $0x70] sm:$0xff]  ;;  %v1903_v2 = vld [vmem:[%s2277_s24 + $0xd8] sm:$0xff] }
  0x53   : > { %1110 = vmatpush.bf16.msra.mxu0 %v1934_v53  ;;  %2016 = vmatpush.bf16.msra.mxu1 %v1934_v53  ;;  %v1916_v3 = vld [vmem:[%s2277_s24 + $0x140] sm:$0xff]  ;;  %v1878_v4 = vld [vmem:[%s2277_s24 + $0x10] sm:$0xff]  ;;  %v1891_v5 = vld [vmem:[%s2277_s24 + $0x78] sm:$0xff] }
  0x54   : > { %2017 = vmatpush.bf16.msra.mxu2 %v1934_v53  ;;  %2018 = vmatpush.bf16.msra.mxu3 %v1934_v53  ;;  %v1904_v6 = vld [vmem:[%s2277_s24 + $0xe0] sm:$0xff]  ;;  %v1917_v7 = vld [vmem:[%s2277_s24 + $0x148] sm:$0xff]  ;;  %v1879_v8 = vld [vmem:[%s2277_s24 + $0x18] sm:$0xff] }
  0x55   : > { %v1892_v9 = vld [vmem:[%s2277_s24 + $0x80] sm:$0xff]  ;;  %v1905_v10 = vld [vmem:[%s2277_s24 + $0xe8] sm:$0xff]  ;;  %v1918_v11 = vld [vmem:[%s2277_s24 + $0x150] sm:$0xff] }
  0x56   : > { %v1880_v12 = vld [vmem:[%s2277_s24 + $0x20] sm:$0xff]  ;;  %v1893_v13 = vld [vmem:[%s2277_s24 + $0x88] sm:$0xff]  ;;  %v1906_v14 = vld [vmem:[%s2277_s24 + $0xf0] sm:$0xff] }
  0x57   : > { %1111 = vmatpush.bf16.msra.mxu0 %v1933_v54  ;;  %2019 = vmatpush.bf16.msra.mxu1 %v1933_v54  ;;  %v1919_v15 = vld [vmem:[%s2277_s24 + $0x158] sm:$0xff]  ;;  %v1881_v16 = vld [vmem:[%s2277_s24 + $0x28] sm:$0xff]  ;;  %v1894_v17 = vld [vmem:[%s2277_s24 + $0x90] sm:$0xff] }
  0x58   : > { %2020 = vmatpush.bf16.msra.mxu2 %v1933_v54  ;;  %2021 = vmatpush.bf16.msra.mxu3 %v1933_v54  ;;  %v1907_v18 = vld [vmem:[%s2277_s24 + $0xf8] sm:$0xff]  ;;  %v1920_v19 = vld [vmem:[%s2277_s24 + $0x160] sm:$0xff]  ;;  %v1882_v20 = vld [vmem:[%s2277_s24 + $0x30] sm:$0xff] }
  0x59   : > { %v1895_v21 = vld [vmem:[%s2277_s24 + $0x98] sm:$0xff]  ;;  %v1908_v22 = vld [vmem:[%s2277_s24 + $0x100] sm:$0xff]  ;;  %v1921_v23 = vld [vmem:[%s2277_s24 + $0x168] sm:$0xff] }
  0x5a   : > { %v1883_v24 = vld [vmem:[%s2277_s24 + $0x38] sm:$0xff]  ;;  %v1896_v25 = vld [vmem:[%s2277_s24 + $0xa0] sm:$0xff]  ;;  %v1909_v26 = vld [vmem:[%s2277_s24 + $0x108] sm:$0xff] }
  0x5b   : > { %1112 = vmatpush.bf16.msra.mxu0 %v1932_v55  ;;  %2022 = vmatpush.bf16.msra.mxu1 %v1932_v55  ;;  %v1922_v27 = vld [vmem:[%s2277_s24 + $0x170] sm:$0xff]  ;;  %v1884_v28 = vld [vmem:[%s2277_s24 + $0x40] sm:$0xff]  ;;  %v1897_v29 = vld [vmem:[%s2277_s24 + $0xa8] sm:$0xff] }
  0x5c   : > { %2023 = vmatpush.bf16.msra.mxu2 %v1932_v55  ;;  %2024 = vmatpush.bf16.msra.mxu3 %v1932_v55  ;;  %v1910_v32 = vld [vmem:[%s2277_s24 + $0x110] sm:$0xff]  ;;  %v1923_v33 = vld [vmem:[%s2277_s24 + $0x178] sm:$0xff]  ;;  %v2320_v41 = vld [vmem:[%s2394_s2] ss:$0 sm:$0xff] }
  0x5d   : > { %v1885_v44 = vld [vmem:[%s2277_s24 + $0x48] sm:$0xff]  ;;  %v1898_v45 = vld [vmem:[%s2277_s24 + $0xb0] sm:$0xff]  ;;  %v1911_v50 = vld [vmem:[%s2277_s24 + $0x118] sm:$0xff] }
  0x5e   : > { %v1924_v51 = vld [vmem:[%s2277_s24 + $0x180] sm:$0xff] }
  0x5f   : > { %1113 = vmatpush.bf16.msra.mxu0 %v1931_v56  ;;  %2025 = vmatpush.bf16.msra.mxu1 %v1931_v56 }
  0x60   : > { %2026 = vmatpush.bf16.msra.mxu2 %v1931_v56  ;;  %2027 = vmatpush.bf16.msra.mxu3 %v1931_v56 }
  0x63   : > { %1114 = vmatpush.bf16.msra.mxu0 %v1930_v57  ;;  %2028 = vmatpush.bf16.msra.mxu1 %v1930_v57 }
  0x64   : > { %2029 = vmatpush.bf16.msra.mxu2 %v1930_v57  ;;  %2030 = vmatpush.bf16.msra.mxu3 %v1930_v57 }
  0x67   : > { %1115 = vmatpush.bf16.msra.mxu0 %v1929_v58  ;;  %2031 = vmatpush.bf16.msra.mxu1 %v1929_v58 }
  0x68   : > { %2032 = vmatpush.bf16.msra.mxu2 %v1929_v58  ;;  %2033 = vmatpush.bf16.msra.mxu3 %v1929_v58 }
  0x6b   : > { %1116 = vmatpush.bf16.msra.mxu0 %v1928_v59  ;;  %2034 = vmatpush.bf16.msra.mxu1 %v1928_v59 }
  0x6c   : > { %2035 = vmatpush.bf16.msra.mxu2 %v1928_v59  ;;  %2036 = vmatpush.bf16.msra.mxu3 %v1928_v59 }
  0x6e   : > { %1117 = vmatmul.bf16.vlgmr.msra.gmra.mxu0 %v1876_v60  ;;  %1182 = vmatmul.bf16.vlgmr.msra.gmra.mxu1 %v1889_v61 }
  0x6f   : > { %1247 = vmatmul.bf16.vlgmr.msra.gmra.mxu2 %v1902_v62  ;;  %1312 = vmatmul.bf16.vlgmr.msra.gmra.mxu3 %v1915_v63 }
  0x7e   : > { %1122 = vmatmul.bf16.gmra.mxu0 %v1877_v0  ;;  %1187 = vmatmul.bf16.gmra.mxu1 %v1890_v1 }
  0x7f   : > { %1252 = vmatmul.bf16.gmra.mxu2 %v1903_v2  ;;  %1317 = vmatmul.bf16.gmra.mxu3 %v1916_v3  ;;  %v1886_v3 = vld [vmem:[%s2277_s24 + $0x50] sm:$0xff] }
  0x8e   : > { %1127 = vmatmul.bf16.gmra.mxu0 %v1878_v4  ;;  %1192 = vmatmul.bf16.gmra.mxu1 %v1891_v5  ;;  %v1899_v4 = vld [vmem:[%s2277_s24 + $0xb8] sm:$0xff] }
  0x8f   : > { %1257 = vmatmul.bf16.gmra.mxu2 %v1904_v6  ;;  %1322 = vmatmul.bf16.gmra.mxu3 %v1917_v7 }
  0x9e   : > { %1132 = vmatmul.bf16.gmra.mxu0 %v1879_v8  ;;  %1197 = vmatmul.bf16.gmra.mxu1 %v1892_v9  ;;  %v1912_v9 = vld [vmem:[%s2277_s24 + $0x120] sm:$0xff] }
  0x9f   : > { %1262 = vmatmul.bf16.gmra.mxu2 %v1905_v10  ;;  %1327 = vmatmul.bf16.gmra.mxu3 %v1918_v11  ;;  %v1925_v10 = vld [vmem:[%s2277_s24 + $0x188] sm:$0xff] }
  0xae   : > { %1137 = vmatmul.bf16.gmra.mxu0 %v1880_v12  ;;  %1202 = vmatmul.bf16.gmra.mxu1 %v1893_v13 }
  0xaf   : > { %1267 = vmatmul.bf16.gmra.mxu2 %v1906_v14  ;;  %1332 = vmatmul.bf16.gmra.mxu3 %v1919_v15 }
  0xbe   : > { %1142 = vmatmul.bf16.gmra.mxu0 %v1881_v16  ;;  %1207 = vmatmul.bf16.gmra.mxu1 %v1894_v17 }
  0xbf   : > { %1272 = vmatmul.bf16.gmra.mxu2 %v1907_v18  ;;  %1337 = vmatmul.bf16.gmra.mxu3 %v1920_v19 }
  0xce   : > { %1147 = vmatmul.bf16.gmra.mxu0 %v1882_v20  ;;  %1212 = vmatmul.bf16.gmra.mxu1 %v1895_v21 }
  0xcf   : > { %1277 = vmatmul.bf16.gmra.mxu2 %v1908_v22  ;;  %1342 = vmatmul.bf16.gmra.mxu3 %v1921_v23 }
  0xde   : > { %1152 = vmatmul.bf16.gmra.mxu0 %v1883_v24  ;;  %1217 = vmatmul.bf16.gmra.mxu1 %v1896_v25 }
  0xdf   : > { %1282 = vmatmul.bf16.gmra.mxu2 %v1909_v26  ;;  %1347 = vmatmul.bf16.gmra.mxu3 %v1922_v27  ;;  %v1887_v26 = vld [vmem:[%s2277_s24 + $0x58] sm:$0xff]  ;;  %v1900_v27 = vld [vmem:[%s2277_s24 + $0xc0] sm:$0xff] }
  0xeb   : > { %v1118_v30 = vpop.f32.mrf.mxu0  ;;  %v1183_v31 = vpop.f32.mrf.mxu1 }
  0xec   : > { %v1378_v38 = vmax.f32 %v1118_v30, %v1183_v31 }
  0xee   : > { %1157 = vmatmul.bf16.gmra.mxu0 %v1884_v28  ;;  %1222 = vmatmul.bf16.gmra.mxu1 %v1897_v29 }
  0xef   : > { %1287 = vmatmul.bf16.gmra.mxu2 %v1910_v32  ;;  %1352 = vmatmul.bf16.gmra.mxu3 %v1923_v33  ;;  %v1913_v32 = vld [vmem:[%s2277_s24 + $0x128] sm:$0xff]  ;;  %v1926_v33 = vld [vmem:[%s2277_s24 + $0x190] sm:$0xff] }
  0xf2   : > { %v1248_v34 = vpop.f32.mrf.mxu2  ;;  %v1313_v35 = vpop.f32.mrf.mxu3 }
  0xf3   : > { %v1120_v36 = vpop.f32.mrf.mxu0  ;;  %v1185_v37 = vpop.f32.mrf.mxu1  ;;  %v1404_v39 = vmax.f32 %v1248_v34, %v1313_v35 }
  0xf4   : > { %v1379_v46 = vmax.f32 %v1120_v36, %v1185_v37 }
  0xf5   : > { %v1430_v40 = vmax.f32 %v1378_v38, %v1404_v39 }
  0xf7   : > { %v1460_v52 = vadd.f32 %v2320_v41, %v1430_v40 }
  0xf9   : > { %v1486_v55 = vmax.f32 %v1460_v52, 0.0 }
  0xfa   : > { %v1250_v42 = vpop.f32.mrf.mxu2  ;;  %v1315_v43 = vpop.f32.mrf.mxu3 }
  0xfb   : > { %v1405_v47 = vmax.f32 %v1250_v42, %v1315_v43  ;;  %v1123_v48 = vpop.f32.mrf.mxu0  ;;  %v1188_v49 = vpop.f32.mrf.mxu1 }
  0xfc   : > { %v1380_v62 = vmax.f32 %v1123_v48, %v1188_v49 }
  0xfd   : > { %v1431_v53 = vmax.f32 %v1379_v46, %v1405_v47 }
  0xfe   : > { %1162 = vmatmul.bf16.gmra.mxu0 %v1885_v44  ;;  %1227 = vmatmul.bf16.gmra.mxu1 %v1898_v45 }
  0xff   : > { %v1461_v54 = vadd.f32 %v2320_v41, %v1431_v53  ;;  %1292 = vmatmul.bf16.gmra.mxu2 %v1911_v50  ;;  %1357 = vmatmul.bf16.gmra.mxu3 %v1924_v51  ;;  %v1888_v50 = vld [vmem:[%s2277_s24 + $0x60] sm:$0xff]  ;;  %v1901_v51 = vld [vmem:[%s2277_s24 + $0xc8] sm:$0xff] }
 0x101   : > { %v1487_v56 = vmax.f32 %v1461_v54, 0.0 }
 0x102   : > { %v1253_v57 = vpop.f32.mrf.mxu2  ;;  %v1318_v58 = vpop.f32.mrf.mxu3 }
 0x103   : > { %v1939_v59 = vpack.c.bf16 %v1487_v56, %v1486_v55  ;;  %v1125_v60 = vpop.f32.mrf.mxu0  ;;  %v1190_v61 = vpop.f32.mrf.mxu1  ;;  %v1406_v63 = vmax.f32 %v1253_v57, %v1318_v58  ;;  %v1914_v56 = vld [vmem:[%s2277_s24 + $0x130] sm:$0xff]  ;;  %v1927_v57 = vld [vmem:[%s2277_s24 + $0x198] sm:$0xff] }
 0x104   : > { %v1381_v5 = vmax.f32 %v1125_v60, %v1190_v61 }
 0x105   : > { %1940 = vst [vmem:[%s2331_s28] sm:$0xff] %v1939_v59   ;;  %v1432_v0 = vmax.f32 %v1380_v62, %v1406_v63 }
 0x107   : > { %v1462_v11 = vadd.f32 %v2320_v41, %v1432_v0 }
 0x109   : > { %v1488_v14 = vmax.f32 %v1462_v11, 0.0 }
 0x10a   : > { %v1255_v1 = vpop.f32.mrf.mxu2  ;;  %v1320_v2 = vpop.f32.mrf.mxu3 }
 0x10b   : > { %v1407_v6 = vmax.f32 %v1255_v1, %v1320_v2  ;;  %v1128_v7 = vpop.f32.mrf.mxu0  ;;  %v1193_v8 = vpop.f32.mrf.mxu1 }
 0x10c   : > { %v1382_v21 = vmax.f32 %v1128_v7, %v1193_v8 }
 0x10d   : > { %v1433_v12 = vmax.f32 %v1381_v5, %v1407_v6 }
 0x10e   : > { %1167 = vmatmul.bf16.gmra.mxu0 %v1886_v3  ;;  %1232 = vmatmul.bf16.gmra.mxu1 %v1899_v4 }
 0x10f   : > { %v1463_v13 = vadd.f32 %v2320_v41, %v1433_v12  ;;  %1297 = vmatmul.bf16.gmra.mxu2 %v1912_v9  ;;  %1362 = vmatmul.bf16.gmra.mxu3 %v1925_v10 }
 0x111   : > { %v1489_v15 = vmax.f32 %v1463_v13, 0.0 }
 0x112   : > { %v1258_v16 = vpop.f32.mrf.mxu2  ;;  %v1323_v17 = vpop.f32.mrf.mxu3 }
 0x113   : > { %v1944_v18 = vpack.c.bf16 %v1489_v15, %v1488_v14  ;;  %v1130_v19 = vpop.f32.mrf.mxu0  ;;  %v1195_v20 = vpop.f32.mrf.mxu1  ;;  %v1408_v22 = vmax.f32 %v1258_v16, %v1323_v17 }
 0x114   : > { %v1383_v28 = vmax.f32 %v1130_v19, %v1195_v20 }
 0x115   : > { %2001 = vst [vmem:[%s2331_s28 + $0x8] sm:$0xff] %v1944_v18   ;;  %v1434_v23 = vmax.f32 %v1382_v21, %v1408_v22 }
 0x117   : > { %v1464_v34 = vadd.f32 %v2320_v41, %v1434_v23 }
 0x119   : > { %v1490_v37 = vmax.f32 %v1464_v34, 0.0 }
 0x11a   : > { %v1260_v24 = vpop.f32.mrf.mxu2  ;;  %v1325_v25 = vpop.f32.mrf.mxu3 }
 0x11b   : > { %v1409_v29 = vmax.f32 %v1260_v24, %v1325_v25  ;;  %v1133_v30 = vpop.f32.mrf.mxu0  ;;  %v1198_v31 = vpop.f32.mrf.mxu1 }
 0x11c   : > { %v1384_v45 = vmax.f32 %v1133_v30, %v1198_v31 }
 0x11d   : > { %v1435_v35 = vmax.f32 %v1383_v28, %v1409_v29 }
 0x11e   : > { %1172 = vmatmul.bf16.gmra.mxu0 %v1887_v26  ;;  %1237 = vmatmul.bf16.gmra.mxu1 %v1900_v27 }
 0x11f   : > { %v1465_v36 = vadd.f32 %v2320_v41, %v1435_v35  ;;  %1302 = vmatmul.bf16.gmra.mxu2 %v1913_v32  ;;  %1367 = vmatmul.bf16.gmra.mxu3 %v1926_v33 }
 0x121   : > { %v1491_v38 = vmax.f32 %v1465_v36, 0.0 }
 0x122   : > { %v1263_v39 = vpop.f32.mrf.mxu2  ;;  %v1328_v40 = vpop.f32.mrf.mxu3 }
 0x123   : > { %v1949_v42 = vpack.c.bf16 %v1491_v38, %v1490_v37  ;;  %v1135_v43 = vpop.f32.mrf.mxu0  ;;  %v1200_v44 = vpop.f32.mrf.mxu1  ;;  %v1410_v46 = vmax.f32 %v1263_v39, %v1328_v40 }
 0x124   : > { %v1385_v52 = vmax.f32 %v1135_v43, %v1200_v44 }
 0x125   : > { %2002 = vst [vmem:[%s2331_s28 + $0x10] sm:$0xff] %v1949_v42   ;;  %v1436_v47 = vmax.f32 %v1384_v45, %v1410_v46 }
 0x127   : > { %v1466_v58 = vadd.f32 %v2320_v41, %v1436_v47 }
 0x129   : > { %v1492_v61 = vmax.f32 %v1466_v58, 0.0 }
 0x12a   : > { %v1265_v48 = vpop.f32.mrf.mxu2  ;;  %v1330_v49 = vpop.f32.mrf.mxu3 }
 0x12b   : > { %v1411_v53 = vmax.f32 %v1265_v48, %v1330_v49  ;;  %v1138_v54 = vpop.f32.mrf.mxu0  ;;  %v1203_v55 = vpop.f32.mrf.mxu1 }
 0x12c   : > { %v1386_v4 = vmax.f32 %v1138_v54, %v1203_v55 }
 0x12d   : > { %v1437_v59 = vmax.f32 %v1385_v52, %v1411_v53 }
 0x12e   : > { %1177 = vmatmul.bf16.gmra.mxu0 %v1888_v50  ;;  %1242 = vmatmul.bf16.gmra.mxu1 %v1901_v51 }
 0x12f   : > { %v1467_v60 = vadd.f32 %v2320_v41, %v1437_v59  ;;  %1307 = vmatmul.bf16.gmra.mxu2 %v1914_v56  ;;  %1372 = vmatmul.bf16.gmra.mxu3 %v1927_v57 }
 0x131   : > { %v1493_v62 = vmax.f32 %v1467_v60, 0.0 }
 0x132   : > { %v1268_v63 = vpop.f32.mrf.mxu2  ;;  %v1333_v0 = vpop.f32.mrf.mxu3 }
 0x133   : > { %v1954_v1 = vpack.c.bf16 %v1493_v62, %v1492_v61  ;;  %v1140_v2 = vpop.f32.mrf.mxu0  ;;  %v1205_v3 = vpop.f32.mrf.mxu1  ;;  %v1412_v5 = vmax.f32 %v1268_v63, %v1333_v0 }
 0x134   : > { %v1387_v9 = vmax.f32 %v1140_v2, %v1205_v3 }
 0x135   : > { %2003 = vst [vmem:[%s2331_s28 + $0x18] sm:$0xff] %v1954_v1   ;;  %v1438_v6 = vmax.f32 %v1386_v4, %v1412_v5 }
 0x137   : > { %v1468_v13 = vadd.f32 %v2320_v41, %v1438_v6 }
 0x139   : > { %v1494_v16 = vmax.f32 %v1468_v13, 0.0 }
 0x13a   : > { %v1270_v7 = vpop.f32.mrf.mxu2  ;;  %v1335_v8 = vpop.f32.mrf.mxu3 }
 0x13b   : > { %v1413_v10 = vmax.f32 %v1270_v7, %v1335_v8  ;;  %v1143_v11 = vpop.f32.mrf.mxu0  ;;  %v1208_v12 = vpop.f32.mrf.mxu1 }
 0x13c   : > { %v1388_v23 = vmax.f32 %v1143_v11, %v1208_v12 }
 0x13d   : > { %v1439_v14 = vmax.f32 %v1387_v9, %v1413_v10 }
 0x13f   : > { %v1469_v15 = vadd.f32 %v2320_v41, %v1439_v14 }
 0x141   : > { %v1495_v17 = vmax.f32 %v1469_v15, 0.0 }
 0x142   : > { %v1273_v18 = vpop.f32.mrf.mxu2  ;;  %v1338_v19 = vpop.f32.mrf.mxu3 }
 0x143   : > { %v1959_v20 = vpack.c.bf16 %v1495_v17, %v1494_v16  ;;  %v1145_v21 = vpop.f32.mrf.mxu0  ;;  %v1210_v22 = vpop.f32.mrf.mxu1  ;;  %v1414_v24 = vmax.f32 %v1273_v18, %v1338_v19 }
 0x144   : > { %v1389_v28 = vmax.f32 %v1145_v21, %v1210_v22 }
 0x145   : > { %2004 = vst [vmem:[%s2331_s28 + $0x20] sm:$0xff] %v1959_v20   ;;  %v1440_v25 = vmax.f32 %v1388_v23, %v1414_v24 }
 0x147   : > { %v1470_v32 = vadd.f32 %v2320_v41, %v1440_v25 }
 0x149   : > { %v1496_v35 = vmax.f32 %v1470_v32, 0.0 }
 0x14a   : > { %v1275_v26 = vpop.f32.mrf.mxu2  ;;  %v1340_v27 = vpop.f32.mrf.mxu3 }
 0x14b   : > { %v1415_v29 = vmax.f32 %v1275_v26, %v1340_v27  ;;  %v1148_v30 = vpop.f32.mrf.mxu0  ;;  %v1213_v31 = vpop.f32.mrf.mxu1 }
 0x14c   : > { %v1390_v43 = vmax.f32 %v1148_v30, %v1213_v31 }
 0x14d   : > { %v1441_v33 = vmax.f32 %v1389_v28, %v1415_v29 }
 0x14f   : > { %v1471_v34 = vadd.f32 %v2320_v41, %v1441_v33 }
 0x151   : > { %v1497_v36 = vmax.f32 %v1471_v34, 0.0 }
 0x152   : > { %v1278_v37 = vpop.f32.mrf.mxu2  ;;  %v1343_v38 = vpop.f32.mrf.mxu3 }
 0x153   : > { %v1964_v39 = vpack.c.bf16 %v1497_v36, %v1496_v35  ;;  %v1150_v40 = vpop.f32.mrf.mxu0  ;;  %v1215_v42 = vpop.f32.mrf.mxu1  ;;  %v1416_v44 = vmax.f32 %v1278_v37, %v1343_v38 }
 0x154   : > { %v1391_v48 = vmax.f32 %v1150_v40, %v1215_v42 }
 0x155   : > { %2005 = vst [vmem:[%s2331_s28 + $0x28] sm:$0xff] %v1964_v39   ;;  %v1442_v45 = vmax.f32 %v1390_v43, %v1416_v44 }
 0x157   : > { %v1472_v52 = vadd.f32 %v2320_v41, %v1442_v45 }
 0x159   : > { %v1498_v55 = vmax.f32 %v1472_v52, 0.0 }
 0x15a   : > { %v1280_v46 = vpop.f32.mrf.mxu2  ;;  %v1345_v47 = vpop.f32.mrf.mxu3 }
 0x15b   : > { %v1417_v49 = vmax.f32 %v1280_v46, %v1345_v47  ;;  %v1153_v50 = vpop.f32.mrf.mxu0  ;;  %v1218_v51 = vpop.f32.mrf.mxu1 }
 0x15c   : > { %v1392_v62 = vmax.f32 %v1153_v50, %v1218_v51 }
 0x15d   : > { %v1443_v53 = vmax.f32 %v1391_v48, %v1417_v49 }
 0x15f   : > { %v1473_v54 = vadd.f32 %v2320_v41, %v1443_v53 }
 0x161   : > { %v1499_v56 = vmax.f32 %v1473_v54, 0.0 }
 0x162   : > { %v1283_v57 = vpop.f32.mrf.mxu2  ;;  %v1348_v58 = vpop.f32.mrf.mxu3 }
 0x163   : > { %v1969_v59 = vpack.c.bf16 %v1499_v56, %v1498_v55  ;;  %v1155_v60 = vpop.f32.mrf.mxu0  ;;  %v1220_v61 = vpop.f32.mrf.mxu1  ;;  %v1418_v63 = vmax.f32 %v1283_v57, %v1348_v58 }
 0x164   : > { %v1393_v3 = vmax.f32 %v1155_v60, %v1220_v61 }
 0x165   : > { %2006 = vst [vmem:[%s2331_s28 + $0x30] sm:$0xff] %v1969_v59   ;;  %v1444_v0 = vmax.f32 %v1392_v62, %v1418_v63 }
 0x167   : > { %v1474_v7 = vadd.f32 %v2320_v41, %v1444_v0 }
 0x169   : > { %v1500_v10 = vmax.f32 %v1474_v7, 0.0 }
 0x16a   : > { %v1285_v1 = vpop.f32.mrf.mxu2  ;;  %v1350_v2 = vpop.f32.mrf.mxu3 }
 0x16b   : > { %v1419_v4 = vmax.f32 %v1285_v1, %v1350_v2  ;;  %v1158_v5 = vpop.f32.mrf.mxu0  ;;  %v1223_v6 = vpop.f32.mrf.mxu1 }
 0x16c   : > { %v1394_v17 = vmax.f32 %v1158_v5, %v1223_v6 }
 0x16d   : > { %v1445_v8 = vmax.f32 %v1393_v3, %v1419_v4 }
 0x16f   : > { %v1475_v9 = vadd.f32 %v2320_v41, %v1445_v8 }
 0x171   : > { %v1501_v11 = vmax.f32 %v1475_v9, 0.0 }
 0x172   : > { %v1288_v12 = vpop.f32.mrf.mxu2  ;;  %v1353_v13 = vpop.f32.mrf.mxu3 }
 0x173   : > { %v1974_v14 = vpack.c.bf16 %v1501_v11, %v1500_v10  ;;  %v1160_v15 = vpop.f32.mrf.mxu0  ;;  %v1225_v16 = vpop.f32.mrf.mxu1  ;;  %v1420_v18 = vmax.f32 %v1288_v12, %v1353_v13 }
 0x174   : > { %v1395_v22 = vmax.f32 %v1160_v15, %v1225_v16 }
 0x175   : > { %2007 = vst [vmem:[%s2331_s28 + $0x38] sm:$0xff] %v1974_v14   ;;  %v1446_v19 = vmax.f32 %v1394_v17, %v1420_v18 }
 0x177   : > { %v1476_v26 = vadd.f32 %v2320_v41, %v1446_v19 }
 0x179   : > { %v1502_v29 = vmax.f32 %v1476_v26, 0.0 }
 0x17a   : > { %v1290_v20 = vpop.f32.mrf.mxu2  ;;  %v1355_v21 = vpop.f32.mrf.mxu3 }
 0x17b   : > { %v1421_v23 = vmax.f32 %v1290_v20, %v1355_v21  ;;  %v1163_v24 = vpop.f32.mrf.mxu0  ;;  %v1228_v25 = vpop.f32.mrf.mxu1 }
 0x17c   : > { %v1396_v36 = vmax.f32 %v1163_v24, %v1228_v25 }
 0x17d   : > { %v1447_v27 = vmax.f32 %v1395_v22, %v1421_v23 }
 0x17f   : > { %v1477_v28 = vadd.f32 %v2320_v41, %v1447_v27 }
 0x181   : > { %v1503_v30 = vmax.f32 %v1477_v28, 0.0 }
 0x182   : > { %v1293_v31 = vpop.f32.mrf.mxu2  ;;  %v1358_v32 = vpop.f32.mrf.mxu3 }
 0x183   : > { %v1979_v33 = vpack.c.bf16 %v1503_v30, %v1502_v29  ;;  %v1165_v34 = vpop.f32.mrf.mxu0  ;;  %v1230_v35 = vpop.f32.mrf.mxu1  ;;  %v1422_v37 = vmax.f32 %v1293_v31, %v1358_v32 }
 0x184   : > { %v1397_v42 = vmax.f32 %v1165_v34, %v1230_v35 }
 0x185   : > { %2008 = vst [vmem:[%s2331_s28 + $0x40] sm:$0xff] %v1979_v33   ;;  %v1448_v38 = vmax.f32 %v1396_v36, %v1422_v37 }
 0x187   : > { %v1478_v46 = vadd.f32 %v2320_v41, %v1448_v38 }
 0x189   : > { %v1504_v49 = vmax.f32 %v1478_v46, 0.0 }
 0x18a   : > { %v1295_v39 = vpop.f32.mrf.mxu2  ;;  %v1360_v40 = vpop.f32.mrf.mxu3 }
 0x18b   : > { %v1423_v43 = vmax.f32 %v1295_v39, %v1360_v40  ;;  %v1168_v44 = vpop.f32.mrf.mxu0  ;;  %v1233_v45 = vpop.f32.mrf.mxu1 }
 0x18c   : > { %v1398_v56 = vmax.f32 %v1168_v44, %v1233_v45 }
 0x18d   : > { %v1449_v47 = vmax.f32 %v1397_v42, %v1423_v43 }
 0x18f   : > { %v1479_v48 = vadd.f32 %v2320_v41, %v1449_v47 }
 0x191   : > { %v1505_v50 = vmax.f32 %v1479_v48, 0.0 }
 0x192   : > { %v1298_v51 = vpop.f32.mrf.mxu2  ;;  %v1363_v52 = vpop.f32.mrf.mxu3 }
 0x193   : > { %v1984_v53 = vpack.c.bf16 %v1505_v50, %v1504_v49  ;;  %v1170_v54 = vpop.f32.mrf.mxu0  ;;  %v1235_v55 = vpop.f32.mrf.mxu1  ;;  %v1424_v57 = vmax.f32 %v1298_v51, %v1363_v52 }
 0x194   : > { %v1399_v61 = vmax.f32 %v1170_v54, %v1235_v55 }
 0x195   : > { %2009 = vst [vmem:[%s2331_s28 + $0x48] sm:$0xff] %v1984_v53   ;;  %v1450_v58 = vmax.f32 %v1398_v56, %v1424_v57 }
 0x197   : > { %v1480_v1 = vadd.f32 %v2320_v41, %v1450_v58 }
 0x199   : > { %v1506_v4 = vmax.f32 %v1480_v1, 0.0 }
 0x19a   : > { %v1300_v59 = vpop.f32.mrf.mxu2  ;;  %v1365_v60 = vpop.f32.mrf.mxu3 }
 0x19b   : > { %v1425_v62 = vmax.f32 %v1300_v59, %v1365_v60  ;;  %v1173_v63 = vpop.f32.mrf.mxu0  ;;  %v1238_v0 = vpop.f32.mrf.mxu1 }
 0x19c   : > { %v1400_v11 = vmax.f32 %v1173_v63, %v1238_v0 }
 0x19d   : > { %v1451_v2 = vmax.f32 %v1399_v61, %v1425_v62 }
 0x19f   : > { %v1481_v3 = vadd.f32 %v2320_v41, %v1451_v2 }
 0x1a1   : > { %v1507_v5 = vmax.f32 %v1481_v3, 0.0 }
 0x1a2   : > { %v1303_v6 = vpop.f32.mrf.mxu2  ;;  %v1368_v7 = vpop.f32.mrf.mxu3 }
 0x1a3   : > { %v1989_v8 = vpack.c.bf16 %v1507_v5, %v1506_v4  ;;  %v1175_v9 = vpop.f32.mrf.mxu0  ;;  %v1240_v10 = vpop.f32.mrf.mxu1  ;;  %v1426_v12 = vmax.f32 %v1303_v6, %v1368_v7 }
 0x1a4   : > { %v1401_v16 = vmax.f32 %v1175_v9, %v1240_v10 }
 0x1a5   : > { %2010 = vst [vmem:[%s2331_s28 + $0x50] sm:$0xff] %v1989_v8   ;;  %v1452_v13 = vmax.f32 %v1400_v11, %v1426_v12 }
 0x1a7   : > { %v1482_v18 = vadd.f32 %v2320_v41, %v1452_v13 }
 0x1a9   : > { %v1508_v23 = vmax.f32 %v1482_v18, 0.0 }
 0x1aa   : > { %v1305_v14 = vpop.f32.mrf.mxu2  ;;  %v1370_v15 = vpop.f32.mrf.mxu3 }
 0x1ab   : > { %v1427_v17 = vmax.f32 %v1305_v14, %v1370_v15  ;;  %v1178_v20 = vpop.f32.mrf.mxu0  ;;  %v1243_v21 = vpop.f32.mrf.mxu1 }
 0x1ac   : > { %v1402_v28 = vmax.f32 %v1178_v20, %v1243_v21 }
 0x1ad   : > { %v1453_v19 = vmax.f32 %v1401_v16, %v1427_v17 }
 0x1af   : > { %v1483_v22 = vadd.f32 %v2320_v41, %v1453_v19 }
 0x1b1   : > { %v1509_v24 = vmax.f32 %v1483_v22, 0.0 }
 0x1b2   : > { %v1308_v25 = vpop.f32.mrf.mxu2  ;;  %v1373_v26 = vpop.f32.mrf.mxu3 }
 0x1b3   : > { %v1994_v27 = vpack.c.bf16 %v1509_v24, %v1508_v23  ;;  %v1428_v29 = vmax.f32 %v1308_v25, %v1373_v26  ;;  %v1180_v30 = vpop.f32.mrf.mxu0  ;;  %v1245_v31 = vpop.f32.mrf.mxu1 }
 0x1b4   : > { %v1403_v35 = vmax.f32 %v1180_v30, %v1245_v31 }
 0x1b5   : > { %2011 = vst [vmem:[%s2331_s28 + $0x58] sm:$0xff] %v1994_v27   ;;  %v1454_v32 = vmax.f32 %v1402_v28, %v1428_v29 }
 0x1b7   : > { %v1484_v37 = vadd.f32 %v2320_v41, %v1454_v32 }
 0x1b9   : > { %v1510_v40 = vmax.f32 %v1484_v37, 0.0 }
 0x1ba   : > { %v1310_v33 = vpop.f32.mrf.mxu2  ;;  %v1375_v34 = vpop.f32.mrf.mxu3 }
 0x1bb   : > { %v1429_v36 = vmax.f32 %v1310_v33, %v1375_v34 }
 0x1bd   : > { %v1455_v38 = vmax.f32 %v1403_v35, %v1429_v36 }
 0x1bf   : > { %v1485_v39 = vadd.f32 %v2320_v41, %v1455_v38 }
 0x1c1   : > { %v1511_v42 = vmax.f32 %v1485_v39, 0.0 }
 0x1c3   : > { %v1999_v43 = vpack.c.bf16 %v1511_v42, %v1510_v40 }
 0x1c5   : > { %2012 = vst [vmem:[%s2331_s28 + $0x60] sm:$0xff] %v1999_v43  }
 0x1c6 PF: > { %p10_p9 = scmp.ge.s32.totalorder %s2125_s16, 4   ;;  %s2396_s12 = smov %s2082_s13 }
 0x1c7   : > { %s2397_s13 = smov %s2134_s19  ;;  %s2398_s14 = smov %s2125_s16 }
 0x1c8   :  { %12 = sbr.rel (!%p10_p9) target bundleno = 2 (0x2), region = 108 }

// kernel: net_forward.3
= control target key start
LH: loop header
LB: loop body
LE: loop exit
PB: predicated region body
PF: predicated region fallthrough
CT: control target
= control target key end

     0   :  { %s10205_s1 = inlined_call_operand.vmem [shape: bf16[256,128], index: 1, kind: input, shape index: {}]   ;;  %s10206_s0 = inlined_call_operand.vmem [shape: bf16[4,25,16,256], index: 0, kind: input, shape index: {}]   ;;  %s10207_s3 = inlined_call_operand.vmem [shape: bf16[25,128,128], index: 3, kind: input, shape index: {}]   ;;  %s10208_s2 = inlined_call_operand.vmem [shape: f32[1,128], index: 2, kind: input, shape index: {}]   ;;  %s10209_s4 = inlined_call_operand.vmem [shape: f32[1,128], index: 4, kind: input, shape index: {}]   ;;  %s10210_s6 = inlined_call_operand.vmem [shape: f32[1,128], index: 6, kind: input, shape index: {}]   ;;  %s10211_s5 = inlined_call_operand.vmem [shape: bf16[128,128], index: 5, kind: input, shape index: {}]   ;;  %s10212_s7 = inlined_call_operand.vmem [shape: bf16[128,128], index: 7, kind: input, shape index: {}]   ;;  %s10213_s8 = inlined_call_operand.vmem [shape: f32[1,128], index: 8, kind: input, shape index: {}]   ;;  %s10214_s9 = inlined_call_operand.vmem [shape: f32[16,128], index: 9, kind: output, shape index: {}]  }
   0x1   :  { %v7353_v0 = vld [vmem:[%s10205_s1 + $0x38] sm:$0xff]  ;;  %v7352_v2 = vld [vmem:[%s10205_s1 + $0x30] sm:$0xff]  ;;  %v7351_v4 = vld [vmem:[%s10205_s1 + $0x28] sm:$0xff] }
   0x2   :  { %v7361_v1 = vld [vmem:[%s10205_s1 + $0x78] sm:$0xff]  ;;  %1360 = vmatpush.bf16.msra.mxu0 %v7353_v0  ;;  %7578 = vmatpush.bf16.msra.mxu3 %v7353_v0  ;;  %v7360_v3 = vld [vmem:[%s10205_s1 + $0x70] sm:$0xff]  ;;  %v7359_v5 = vld [vmem:[%s10205_s1 + $0x68] sm:$0xff] }
   0x3   :  { %1869 = vmatpush.bf16.msra.mxu1 %v7361_v1  ;;  %7586 = vmatpush.bf16.msra.mxu2 %v7361_v1  ;;  %v7350_v6 = vld [vmem:[%s10205_s1 + $0x20] sm:$0xff]  ;;  %v7349_v8 = vld [vmem:[%s10205_s1 + $0x18] sm:$0xff]  ;;  %v7348_v10 = vld [vmem:[%s10205_s1 + $0x10] sm:$0xff] }
   0x4   :  { %v7358_v7 = vld [vmem:[%s10205_s1 + $0x60] sm:$0xff]  ;;  %v7357_v9 = vld [vmem:[%s10205_s1 + $0x58] sm:$0xff]  ;;  %v7356_v11 = vld [vmem:[%s10205_s1 + $0x50] sm:$0xff] }
   0x5   :  { %v7347_v12 = vld [vmem:[%s10205_s1 + $0x8] sm:$0xff]  ;;  %v7346_v14 = vld [vmem:[%s10205_s1] sm:$0xff]  ;;  %v5540_v18 = vld [vmem:[%s10206_s0 + $0x3f0] sm:$0xf] }
   0x6   :  { %1361 = vmatpush.bf16.msra.mxu0 %v7352_v2  ;;  %7579 = vmatpush.bf16.msra.mxu3 %v7352_v2  ;;  %v7355_v13 = vld [vmem:[%s10205_s1 + $0x48] sm:$0xff]  ;;  %v7354_v15 = vld [vmem:[%s10205_s1 + $0x40] sm:$0xff]  ;;  %v7273_v19 = vld [vmem:[%s10206_s0 + $0x3f4] sm:$0xf0] }
   0x7   :  { %1870 = vmatpush.bf16.msra.mxu1 %v7360_v3  ;;  %7587 = vmatpush.bf16.msra.mxu2 %v7360_v3  ;;  %v5036_v16 = vld [vmem:[%s10206_s0] sm:$0xf]  ;;  %v7147_v17 = vld [vmem:[%s10206_s0 + $0x4] sm:$0xf0]  ;;  %v7146_v20 = vld [vmem:[%s10206_s0 + $0x4] sm:$0xf]  ;;  %v5541_v25 = vor.u32 %v7273_v19, %v5540_v18 }
   0x8   :  { %v5038_v21 = vld [vmem:[%s10206_s0 + $0x8] sm:$0xf0]  ;;  %v7272_v22 = vld [vmem:[%s10206_s0 + $0x3f4] sm:$0xf]  ;;  %v5542_v23 = vld [vmem:[%s10206_s0 + $0x3f8] sm:$0xf0]  ;;  %v5037_v24 = vor.u32 %v7147_v17, %v5036_v16 }
   0x9   :  { %v5041_v26 = vor.u32 %v7146_v20, %v5038_v21  ;;  %v5545_v27 = vor.u32 %v7272_v22, %v5542_v23  ;;  %v5044_v28 = vld [vmem:[%s10206_s0 + $0x10] sm:$0xf]  ;;  %v7149_v29 = vld [vmem:[%s10206_s0 + $0x14] sm:$0xf0]  ;;  %v5548_v30 = vld [vmem:[%s10206_s0 + $0x400] sm:$0xf] }
   0xa   :  { %1362 = vmatpush.bf16.msra.mxu0 %v7351_v4  ;;  %7580 = vmatpush.bf16.msra.mxu3 %v7351_v4  ;;  %v7275_v31 = vld [vmem:[%s10206_s0 + $0x404] sm:$0xf0]  ;;  %v7148_v32 = vld [vmem:[%s10206_s0 + $0x14] sm:$0xf]  ;;  %v5046_v33 = vld [vmem:[%s10206_s0 + $0x18] sm:$0xf0]  ;;  %v5045_v36 = vor.u32 %v7149_v29, %v5044_v28 }
   0xb   :  { %1871 = vmatpush.bf16.msra.mxu1 %v7359_v5  ;;  %7588 = vmatpush.bf16.msra.mxu2 %v7359_v5  ;;  %v7274_v34 = vld [vmem:[%s10206_s0 + $0x404] sm:$0xf]  ;;  %v5550_v35 = vld [vmem:[%s10206_s0 + $0x408] sm:$0xf0]  ;;  %v5549_v37 = vor.u32 %v7275_v31, %v5548_v30  ;;  %v5049_v38 = vor.u32 %v7148_v32, %v5046_v33  ;;  %v5052_v40 = vld [vmem:[%s10206_s0 + $0x20] sm:$0xf] }
   0xc   :  { %v5553_v39 = vor.u32 %v7274_v34, %v5550_v35  ;;  %v7151_v41 = vld [vmem:[%s10206_s0 + $0x24] sm:$0xf0]  ;;  %v5556_v42 = vld [vmem:[%s10206_s0 + $0x410] sm:$0xf]  ;;  %v7277_v43 = vld [vmem:[%s10206_s0 + $0x414] sm:$0xf0] }
   0xd   :  { %v7150_v44 = vld [vmem:[%s10206_s0 + $0x24] sm:$0xf]  ;;  %v5054_v45 = vld [vmem:[%s10206_s0 + $0x28] sm:$0xf0]  ;;  %v7276_v46 = vld [vmem:[%s10206_s0 + $0x414] sm:$0xf]  ;;  %v5053_v48 = vor.u32 %v7151_v41, %v5052_v40  ;;  %v5557_v49 = vor.u32 %v7277_v43, %v5556_v42 }
   0xe   :  { %1363 = vmatpush.bf16.msra.mxu0 %v7350_v6  ;;  %7581 = vmatpush.bf16.msra.mxu3 %v7350_v6  ;;  %v5558_v47 = vld [vmem:[%s10206_s0 + $0x418] sm:$0xf0]  ;;  %v5057_v50 = vor.u32 %v7150_v44, %v5054_v45  ;;  %v5060_v52 = vld [vmem:[%s10206_s0 + $0x30] sm:$0xf]  ;;  %v7153_v53 = vld [vmem:[%s10206_s0 + $0x34] sm:$0xf0] }
   0xf   :  { %1872 = vmatpush.bf16.msra.mxu1 %v7358_v7  ;;  %7589 = vmatpush.bf16.msra.mxu2 %v7358_v7  ;;  %v5561_v51 = vor.u32 %v7276_v46, %v5558_v47  ;;  %v5564_v54 = vld [vmem:[%s10206_s0 + $0x420] sm:$0xf]  ;;  %v7279_v55 = vld [vmem:[%s10206_s0 + $0x424] sm:$0xf0]  ;;  %v7152_v56 = vld [vmem:[%s10206_s0 + $0x34] sm:$0xf]  ;;  %v5061_v60 = vor.u32 %v7153_v53, %v5060_v52 }
  0x10   :  { %v5062_v57 = vld [vmem:[%s10206_s0 + $0x38] sm:$0xf0]  ;;  %v7278_v58 = vld [vmem:[%s10206_s0 + $0x424] sm:$0xf]  ;;  %v5566_v59 = vld [vmem:[%s10206_s0 + $0x428] sm:$0xf0]  ;;  %v5565_v61 = vor.u32 %v7279_v55, %v5564_v54 }
  0x11   :  { %v5065_v62 = vor.u32 %v7152_v56, %v5062_v57  ;;  %v5569_v63 = vor.u32 %v7278_v58, %v5566_v59  ;;  %v5068_v0 = vld [vmem:[%s10206_s0 + $0x40] sm:$0xf]  ;;  %v7155_v1 = vld [vmem:[%s10206_s0 + $0x44] sm:$0xf0]  ;;  %v5572_v2 = vld [vmem:[%s10206_s0 + $0x430] sm:$0xf] }
  0x12   :  { %1364 = vmatpush.bf16.msra.mxu0 %v7349_v8  ;;  %7582 = vmatpush.bf16.msra.mxu3 %v7349_v8  ;;  %v7281_v3 = vld [vmem:[%s10206_s0 + $0x434] sm:$0xf0]  ;;  %v7154_v4 = vld [vmem:[%s10206_s0 + $0x44] sm:$0xf]  ;;  %v5070_v5 = vld [vmem:[%s10206_s0 + $0x48] sm:$0xf0]  ;;  %v5069_v8 = vor.u32 %v7155_v1, %v5068_v0 }
  0x13   :  { %1873 = vmatpush.bf16.msra.mxu1 %v7357_v9  ;;  %7590 = vmatpush.bf16.msra.mxu2 %v7357_v9  ;;  %v7280_v6 = vld [vmem:[%s10206_s0 + $0x434] sm:$0xf]  ;;  %v5574_v7 = vld [vmem:[%s10206_s0 + $0x438] sm:$0xf0]  ;;  %v5573_v9 = vor.u32 %v7281_v3, %v5572_v2  ;;  %v7282_v18 = vld [vmem:[%s10206_s0 + $0x444] sm:$0xf] }
  0x14   :  { %v7156_v16 = vld [vmem:[%s10206_s0 + $0x54] sm:$0xf]  ;;  %v5078_v17 = vld [vmem:[%s10206_s0 + $0x58] sm:$0xf0]  ;;  %v5582_v19 = vld [vmem:[%s10206_s0 + $0x448] sm:$0xf0] }
  0x15   :  { %v5081_v22 = vor.u32 %v7156_v16, %v5078_v17  ;;  %v5585_v23 = vor.u32 %v7282_v18, %v5582_v19  ;;  %v7158_v28 = vld [vmem:[%s10206_s0 + $0x64] sm:$0xf]  ;;  %v5086_v29 = vld [vmem:[%s10206_s0 + $0x68] sm:$0xf0]  ;;  %v7284_v30 = vld [vmem:[%s10206_s0 + $0x454] sm:$0xf] }
  0x16   :  { %1365 = vmatpush.bf16.msra.mxu0 %v7348_v10  ;;  %7583 = vmatpush.bf16.msra.mxu3 %v7348_v10  ;;  %v5073_v10 = vor.u32 %v7154_v4, %v5070_v5  ;;  %v5590_v31 = vld [vmem:[%s10206_s0 + $0x458] sm:$0xf0]  ;;  %v5089_v34 = vor.u32 %v7158_v28, %v5086_v29  ;;  %v7160_v40 = vld [vmem:[%s10206_s0 + $0x74] sm:$0xf]  ;;  %v7286_v42 = vld [vmem:[%s10206_s0 + $0x464] sm:$0xf] }
  0x17   :  { %1874 = vmatpush.bf16.msra.mxu1 %v7356_v11  ;;  %7591 = vmatpush.bf16.msra.mxu2 %v7356_v11  ;;  %v5577_v11 = vor.u32 %v7280_v6, %v5574_v7  ;;  %v5593_v35 = vor.u32 %v7284_v30, %v5590_v31  ;;  %v5094_v41 = vld [vmem:[%s10206_s0 + $0x78] sm:$0xf0]  ;;  %v5598_v43 = vld [vmem:[%s10206_s0 + $0x468] sm:$0xf0]  ;;  %v7162_v52 = vld [vmem:[%s10206_s0 + $0x84] sm:$0xf] }
  0x18   :  { %v5097_v46 = vor.u32 %v7160_v40, %v5094_v41  ;;  %v5601_v47 = vor.u32 %v7286_v42, %v5598_v43  ;;  %v5102_v53 = vld [vmem:[%s10206_s0 + $0x88] sm:$0xf0]  ;;  %v7288_v54 = vld [vmem:[%s10206_s0 + $0x474] sm:$0xf]  ;;  %v5606_v55 = vld [vmem:[%s10206_s0 + $0x478] sm:$0xf0] }
  0x19   :  { %v5105_v59 = vor.u32 %v7162_v52, %v5102_v53  ;;  %v5108_v5 = vld [vmem:[%s10206_s0 + $0x90] sm:$0xf]  ;;  %v7165_v6 = vld [vmem:[%s10206_s0 + $0x94] sm:$0xf0]  ;;  %v5612_v7 = vld [vmem:[%s10206_s0 + $0x480] sm:$0xf] }
  0x1a   :  { %1366 = vmatpush.bf16.msra.mxu0 %v7347_v12  ;;  %7584 = vmatpush.bf16.msra.mxu3 %v7347_v12  ;;  %v5076_v12 = vld [vmem:[%s10206_s0 + $0x50] sm:$0xf]  ;;  %v5116_v29 = vld [vmem:[%s10206_s0 + $0xa0] sm:$0xf]  ;;  %v7167_v30 = vld [vmem:[%s10206_s0 + $0xa4] sm:$0xf0] }
  0x1b   :  { %1875 = vmatpush.bf16.msra.mxu1 %v7355_v13  ;;  %7592 = vmatpush.bf16.msra.mxu2 %v7355_v13  ;;  %v7157_v13 = vld [vmem:[%s10206_s0 + $0x54] sm:$0xf0]  ;;  %v5620_v31 = vld [vmem:[%s10206_s0 + $0x490] sm:$0xf] }
  0x1c   :  { %v5077_v20 = vor.u32 %v7157_v13, %v5076_v12  ;;  %v5614_v12 = vld [vmem:[%s10206_s0 + $0x488] sm:$0xf0]  ;;  %v5124_v53 = vld [vmem:[%s10206_s0 + $0xb0] sm:$0xf] }
  0x1e   :  { %1367 = vmatpush.bf16.msra.mxu0 %v7346_v14  ;;  %7585 = vmatpush.bf16.msra.mxu3 %v7346_v14  ;;  %v5580_v14 = vld [vmem:[%s10206_s0 + $0x440] sm:$0xf] }
  0x1f   :  { %1876 = vmatpush.bf16.msra.mxu1 %v7354_v15  ;;  %7593 = vmatpush.bf16.msra.mxu2 %v7354_v15  ;;  %v7283_v15 = vld [vmem:[%s10206_s0 + $0x444] sm:$0xf0] }
  0x20   :  { %v5581_v21 = vor.u32 %v7283_v15, %v5580_v14  ;;  %v5109_v15 = vor.u32 %v7165_v6, %v5108_v5 }
  0x21   :  { %1368 = vmatmul.bf16.vlgmr.msra.gmra.mxu0 %v5037_v24  ;;  %1683 = vmatmul.bf16.vlgmr.msra.gmra.mxu3 %v5541_v25  ;;  %v5084_v24 = vld [vmem:[%s10206_s0 + $0x60] sm:$0xf]  ;;  %v7159_v25 = vld [vmem:[%s10206_s0 + $0x64] sm:$0xf0] }
  0x22   :  { %1877 = vmatmul.bf16.vlgmr.msra.gmra.mxu1 %v5041_v26  ;;  %2192 = vmatmul.bf16.vlgmr.msra.gmra.mxu2 %v5545_v27  ;;  %v5588_v26 = vld [vmem:[%s10206_s0 + $0x450] sm:$0xf]  ;;  %v7285_v27 = vld [vmem:[%s10206_s0 + $0x454] sm:$0xf0]  ;;  %v5085_v32 = vor.u32 %v7159_v25, %v5084_v24 }
  0x23   :  { %v5589_v33 = vor.u32 %v7285_v27, %v5588_v26 }
  0x31   :  { %1373 = vmatmul.bf16.gmra.mxu0 %v5045_v36  ;;  %1688 = vmatmul.bf16.gmra.mxu3 %v5549_v37  ;;  %v5092_v36 = vld [vmem:[%s10206_s0 + $0x70] sm:$0xf]  ;;  %v7161_v37 = vld [vmem:[%s10206_s0 + $0x74] sm:$0xf0] }
  0x32   :  { %1882 = vmatmul.bf16.gmra.mxu1 %v5049_v38  ;;  %2197 = vmatmul.bf16.gmra.mxu2 %v5553_v39  ;;  %v5596_v38 = vld [vmem:[%s10206_s0 + $0x460] sm:$0xf]  ;;  %v7287_v39 = vld [vmem:[%s10206_s0 + $0x464] sm:$0xf0]  ;;  %v5093_v44 = vor.u32 %v7161_v37, %v5092_v36  ;;  %v5622_v36 = vld [vmem:[%s10206_s0 + $0x498] sm:$0xf0] }
  0x33   :  { %v5597_v45 = vor.u32 %v7287_v39, %v5596_v38  ;;  %v5117_v39 = vor.u32 %v7167_v30, %v5116_v29 }
  0x41   :  { %1378 = vmatmul.bf16.gmra.mxu0 %v5053_v48  ;;  %1693 = vmatmul.bf16.gmra.mxu3 %v5557_v49  ;;  %v5100_v48 = vld [vmem:[%s10206_s0 + $0x80] sm:$0xf]  ;;  %v7163_v49 = vld [vmem:[%s10206_s0 + $0x84] sm:$0xf0] }
  0x42   :  { %1887 = vmatmul.bf16.gmra.mxu1 %v5057_v50  ;;  %2202 = vmatmul.bf16.gmra.mxu2 %v5561_v51  ;;  %v5604_v50 = vld [vmem:[%s10206_s0 + $0x470] sm:$0xf]  ;;  %v7289_v51 = vld [vmem:[%s10206_s0 + $0x474] sm:$0xf0]  ;;  %v5101_v56 = vor.u32 %v7163_v49, %v5100_v48 }
  0x43   :  { %v5605_v57 = vor.u32 %v7289_v51, %v5604_v50 }
  0x51   :  { %1383 = vmatmul.bf16.gmra.mxu0 %v5061_v60  ;;  %1698 = vmatmul.bf16.gmra.mxu3 %v5565_v61  ;;  %v5609_v60 = vor.u32 %v7288_v54, %v5606_v55  ;;  %v7169_v54 = vld [vmem:[%s10206_s0 + $0xb4] sm:$0xf0]  ;;  %v5628_v55 = vld [vmem:[%s10206_s0 + $0x4a0] sm:$0xf] }
  0x52   :  { %1892 = vmatmul.bf16.gmra.mxu1 %v5065_v62  ;;  %2207 = vmatmul.bf16.gmra.mxu2 %v5569_v63 }
  0x61   :  { %1388 = vmatmul.bf16.gmra.mxu0 %v5069_v8  ;;  %1703 = vmatmul.bf16.gmra.mxu3 %v5573_v9  ;;  %v7291_v8 = vld [vmem:[%s10206_s0 + $0x484] sm:$0xf0]  ;;  %v7164_v9 = vld [vmem:[%s10206_s0 + $0x94] sm:$0xf] }
  0x62   :  { %1897 = vmatmul.bf16.gmra.mxu1 %v5073_v10  ;;  %2212 = vmatmul.bf16.gmra.mxu2 %v5577_v11  ;;  %v5110_v10 = vld [vmem:[%s10206_s0 + $0x98] sm:$0xf0]  ;;  %v7290_v11 = vld [vmem:[%s10206_s0 + $0x484] sm:$0xf]  ;;  %v5613_v16 = vor.u32 %v7291_v8, %v5612_v7 }
  0x63   :  { %v5113_v19 = vor.u32 %v7164_v9, %v5110_v10 }
  0x71   :  { %1393 = vmatmul.bf16.gmra.mxu0 %v5077_v20  ;;  %1708 = vmatmul.bf16.gmra.mxu3 %v5581_v21  ;;  %v5617_v20 = vor.u32 %v7290_v11, %v5614_v12 }
  0x72   :  { %1902 = vmatmul.bf16.gmra.mxu1 %v5081_v22  ;;  %2217 = vmatmul.bf16.gmra.mxu2 %v5585_v23 }
  0x81   :  { %1398 = vmatmul.bf16.gmra.mxu0 %v5085_v32  ;;  %1713 = vmatmul.bf16.gmra.mxu3 %v5589_v33  ;;  %v7293_v32 = vld [vmem:[%s10206_s0 + $0x494] sm:$0xf0]  ;;  %v7166_v33 = vld [vmem:[%s10206_s0 + $0xa4] sm:$0xf] }
  0x82   :  { %1907 = vmatmul.bf16.gmra.mxu1 %v5089_v34  ;;  %2222 = vmatmul.bf16.gmra.mxu2 %v5593_v35  ;;  %v5118_v34 = vld [vmem:[%s10206_s0 + $0xa8] sm:$0xf0]  ;;  %v7292_v35 = vld [vmem:[%s10206_s0 + $0x494] sm:$0xf]  ;;  %v5621_v40 = vor.u32 %v7293_v32, %v5620_v31 }
  0x83   :  { %v5121_v43 = vor.u32 %v7166_v33, %v5118_v34 }
  0x91   :  { %1403 = vmatmul.bf16.gmra.mxu0 %v5093_v44  ;;  %1718 = vmatmul.bf16.gmra.mxu3 %v5597_v45  ;;  %v5625_v44 = vor.u32 %v7292_v35, %v5622_v36 }
  0x92   :  { %1912 = vmatmul.bf16.gmra.mxu1 %v5097_v46  ;;  %2227 = vmatmul.bf16.gmra.mxu2 %v5601_v47 }
  0x9e   :  { %v1369_v58 = vpop.f32.mrf.mxu0 }
  0x9f   :  { %v1878_v61 = vpop.f32.mrf.mxu1 }
  0xa0   :  { %v7913_v62 = vadd.f32 %v1878_v61, %v1369_v58  ;;  %v5126_v58 = vld [vmem:[%s10206_s0 + $0xb8] sm:$0xf0] }
  0xa1   :  { %1408 = vmatmul.bf16.gmra.mxu0 %v5101_v56  ;;  %1723 = vmatmul.bf16.gmra.mxu3 %v5605_v57  ;;  %v7295_v56 = vld [vmem:[%s10206_s0 + $0x4a4] sm:$0xf0]  ;;  %v7168_v57 = vld [vmem:[%s10206_s0 + $0xb4] sm:$0xf] }
  0xa2   :  { %10255 = vst [vmem:[#allocation2_spill] sm:$0xff] %v7913_v62  ;;  %1917 = vmatmul.bf16.gmra.mxu1 %v5105_v59  ;;  %2232 = vmatmul.bf16.gmra.mxu2 %v5609_v60  ;;  %v7294_v59 = vld [vmem:[%s10206_s0 + $0x4a4] sm:$0xf]  ;;  %v5630_v60 = vld [vmem:[%s10206_s0 + $0x4a8] sm:$0xf0]  ;;  %v5129_v6 = vor.u32 %v7168_v57, %v5126_v58 }
  0xa3   :  { %v5633_v7 = vor.u32 %v7294_v59, %v5630_v60 }
  0xa4   :  { %v1684_v63 = vpop.f32.mrf.mxu3 }
  0xa5   :  { %v2193_v0 = vpop.f32.mrf.mxu2 }
  0xa6   :  { %v7915_v1 = vadd.f32 %v2193_v0, %v1684_v63  ;;  %v1371_v2 = vpop.f32.mrf.mxu0  ;;  %v5125_v0 = vor.u32 %v7169_v54, %v5124_v53  ;;  %v5142_v53 = vld [vmem:[%s10206_s0 + $0xd8] sm:$0xf0]  ;;  %v7298_v54 = vld [vmem:[%s10206_s0 + $0x4c4] sm:$0xf] }
  0xa7   :  { %v1880_v3 = vpop.f32.mrf.mxu1 }
  0xa8   :  { %v7917_v4 = vadd.f32 %v1880_v3, %v1371_v2  ;;  %v5629_v2 = vor.u32 %v7295_v56, %v5628_v55  ;;  %v5646_v55 = vld [vmem:[%s10206_s0 + $0x4c8] sm:$0xf0] }
  0xaa   :  { %10256 = vst [vmem:[#allocation3_spill] sm:$0xff] %v7917_v4 }
  0xac   :  { %v1686_v13 = vpop.f32.mrf.mxu3 }
  0xad   :  { %v2195_v14 = vpop.f32.mrf.mxu2 }
  0xae   :  { %v7943_v17 = vadd.f32 %v2195_v14, %v1686_v13  ;;  %v1374_v18 = vpop.f32.mrf.mxu0 }
  0xaf   :  { %v1883_v21 = vpop.f32.mrf.mxu1 }
  0xb0   :  { %v7945_v22 = vadd.f32 %v1883_v21, %v1374_v18  ;;  %v7171_v18 = vld [vmem:[%s10206_s0 + $0xc4] sm:$0xf0]  ;;  %v7170_v21 = vld [vmem:[%s10206_s0 + $0xc4] sm:$0xf] }
  0xb1   :  { %1413 = vmatmul.bf16.gmra.mxu0 %v5109_v15  ;;  %1728 = vmatmul.bf16.gmra.mxu3 %v5613_v16  ;;  %v5132_v16 = vld [vmem:[%s10206_s0 + $0xc0] sm:$0xf] }
  0xb2   :  { %10257 = vst [vmem:[#allocation4_spill] sm:$0xff] %v7945_v22  ;;  %1922 = vmatmul.bf16.gmra.mxu1 %v5113_v19  ;;  %2237 = vmatmul.bf16.gmra.mxu2 %v5617_v20  ;;  %v5636_v19 = vld [vmem:[%s10206_s0 + $0x4b0] sm:$0xf]  ;;  %v7297_v20 = vld [vmem:[%s10206_s0 + $0x4b4] sm:$0xf0]  ;;  %v5133_v30 = vor.u32 %v7171_v18, %v5132_v16 }
  0xb3   :  { %v5637_v31 = vor.u32 %v7297_v20, %v5636_v19  ;;  %v7175_v16 = vld [vmem:[%s10206_s0 + $0xe4] sm:$0xf0]  ;;  %v5652_v18 = vld [vmem:[%s10206_s0 + $0x4d0] sm:$0xf]  ;;  %v7301_v19 = vld [vmem:[%s10206_s0 + $0x4d4] sm:$0xf0] }
  0xb4   :  { %v1689_v23 = vpop.f32.mrf.mxu3  ;;  %v7174_v20 = vld [vmem:[%s10206_s0 + $0xe4] sm:$0xf] }
  0xb5   :  { %v2198_v24 = vpop.f32.mrf.mxu2 }
  0xb6   :  { %v7947_v25 = vadd.f32 %v2198_v24, %v1689_v23  ;;  %v1376_v26 = vpop.f32.mrf.mxu0  ;;  %v5134_v23 = vld [vmem:[%s10206_s0 + $0xc8] sm:$0xf0]  ;;  %v7296_v24 = vld [vmem:[%s10206_s0 + $0x4b4] sm:$0xf] }
  0xb7   :  { %v1885_v27 = vpop.f32.mrf.mxu1  ;;  %v5137_v34 = vor.u32 %v7170_v21, %v5134_v23  ;;  %v5150_v21 = vld [vmem:[%s10206_s0 + $0xe8] sm:$0xf0]  ;;  %v7300_v23 = vld [vmem:[%s10206_s0 + $0x4d4] sm:$0xf] }
  0xb8   :  { %v7949_v28 = vadd.f32 %v1885_v27, %v1376_v26  ;;  %v5638_v26 = vld [vmem:[%s10206_s0 + $0x4b8] sm:$0xf0] }
  0xb9   :  { %v5641_v35 = vor.u32 %v7296_v24, %v5638_v26  ;;  %v5654_v24 = vld [vmem:[%s10206_s0 + $0x4d8] sm:$0xf0] }
  0xba   :  { %10258 = vst [vmem:[#allocation5_spill] sm:$0xff] %v7949_v28  ;;  %v7368_v28 = vld [vmem:[%s10207_s3 + $0x30] sm:$0xff] }
  0xbc   :  { %v1691_v37 = vpop.f32.mrf.mxu3 }
  0xbd   :  { %v2200_v38 = vpop.f32.mrf.mxu2 }
  0xbe   :  { %v7975_v41 = vadd.f32 %v2200_v38, %v1691_v37  ;;  %v1379_v42 = vpop.f32.mrf.mxu0 }
  0xbf   :  { %v1888_v45 = vpop.f32.mrf.mxu1 }
  0xc0   :  { %v7977_v46 = vadd.f32 %v1888_v45, %v1379_v42  ;;  %v5140_v45 = vld [vmem:[%s10206_s0 + $0xd0] sm:$0xf] }
  0xc1   :  { %1418 = vmatmul.bf16.gmra.mxu0 %v5117_v39  ;;  %1733 = vmatmul.bf16.gmra.mxu3 %v5621_v40 }
  0xc2   :  { %10259 = vst [vmem:[#allocation6_spill] sm:$0xff] %v7977_v46  ;;  %1927 = vmatmul.bf16.gmra.mxu1 %v5121_v43  ;;  %2242 = vmatmul.bf16.gmra.mxu2 %v5625_v44 }
  0xc4   :  { %v1694_v47 = vpop.f32.mrf.mxu3 }
  0xc5   :  { %v2203_v48 = vpop.f32.mrf.mxu2 }
  0xc6   :  { %v7979_v49 = vadd.f32 %v2203_v48, %v1694_v47  ;;  %v1381_v50 = vpop.f32.mrf.mxu0  ;;  %v7173_v47 = vld [vmem:[%s10206_s0 + $0xd4] sm:$0xf0]  ;;  %v5644_v48 = vld [vmem:[%s10206_s0 + $0x4c0] sm:$0xf] }
  0xc7   :  { %v1890_v51 = vpop.f32.mrf.mxu1  ;;  %v5141_v58 = vor.u32 %v7173_v47, %v5140_v45 }
  0xc8   :  { %v7981_v52 = vadd.f32 %v1890_v51, %v1381_v50  ;;  %v7299_v50 = vld [vmem:[%s10206_s0 + $0x4c4] sm:$0xf0]  ;;  %v7172_v51 = vld [vmem:[%s10206_s0 + $0xd4] sm:$0xf] }
  0xc9   :  { %v5645_v59 = vor.u32 %v7299_v50, %v5644_v48  ;;  %v5156_v50 = vld [vmem:[%s10206_s0 + $0xf0] sm:$0xf] }
  0xca   :  { %10260 = vst [vmem:[#allocation7_spill] sm:$0xff] %v7981_v52 }
  0xcc   :  { %v1696_v61 = vpop.f32.mrf.mxu3 }
  0xcd   :  { %v2205_v63 = vpop.f32.mrf.mxu2 }
  0xce   :  { %v8007_v3 = vadd.f32 %v2205_v63, %v1696_v61  ;;  %v1384_v5 = vpop.f32.mrf.mxu0  ;;  %v5145_v63 = vor.u32 %v7172_v51, %v5142_v53  ;;  %v7177_v51 = vld [vmem:[%s10206_s0 + $0xf4] sm:$0xf0]  ;;  %v5660_v53 = vld [vmem:[%s10206_s0 + $0x4e0] sm:$0xf] }
  0xcf   :  { %v1893_v8 = vpop.f32.mrf.mxu1 }
  0xd0   :  { %10261 = vst [vmem:[#allocation8_spill] sm:$0xff] %v8007_v3  ;;  %v8009_v9 = vadd.f32 %v1893_v8, %v1384_v5 }
  0xd1   :  { %1423 = vmatmul.bf16.gmra.mxu0 %v5125_v0  ;;  %1738 = vmatmul.bf16.gmra.mxu3 %v5629_v2  ;;  %v5649_v0 = vor.u32 %v7298_v54, %v5646_v55  ;;  %v7303_v54 = vld [vmem:[%s10206_s0 + $0x4e4] sm:$0xf0]  ;;  %v7176_v55 = vld [vmem:[%s10206_s0 + $0xf4] sm:$0xf] }
  0xd2   :  { %1932 = vmatmul.bf16.gmra.mxu1 %v5129_v6  ;;  %2247 = vmatmul.bf16.gmra.mxu2 %v5633_v7 }
  0xd4   :  { %v1699_v10 = vpop.f32.mrf.mxu3 }
  0xd5   :  { %v2208_v11 = vpop.f32.mrf.mxu2 }
  0xd6   :  { %v8011_v12 = vadd.f32 %v2208_v11, %v1699_v10  ;;  %v1386_v13 = vpop.f32.mrf.mxu0 }
  0xd7   :  { %v1895_v14 = vpop.f32.mrf.mxu1 }
  0xd8   :  { %v8013_v15 = vadd.f32 %v1895_v14, %v1386_v13  ;;  %v5148_v14 = vld [vmem:[%s10206_s0 + $0xe0] sm:$0xf] }
  0xda   :  { %10262 = vst [vmem:[#allocation9_spill] sm:$0xff] %v8013_v15  ;;  %v7375_v15 = vld [vmem:[%s10207_s3 + $0x68] sm:$0xff] }
  0xdc   :  { %v1701_v27 = vpop.f32.mrf.mxu3 }
  0xdd   :  { %v2210_v29 = vpop.f32.mrf.mxu2 }
  0xde   :  { %v8039_v32 = vadd.f32 %v2210_v29, %v1701_v27  ;;  %v1389_v33 = vpop.f32.mrf.mxu0  ;;  %v5149_v29 = vor.u32 %v7175_v16, %v5148_v14 }
  0xdf   :  { %v1898_v36 = vpop.f32.mrf.mxu1 }
  0xe0   :  { %10263 = vst [vmem:[#allocation10_spill] sm:$0xff] %v8039_v32  ;;  %v8041_v37 = vadd.f32 %v1898_v36, %v1389_v33 }
  0xe1   :  { %1428 = vmatmul.bf16.gmra.mxu0 %v5133_v30  ;;  %1743 = vmatmul.bf16.gmra.mxu3 %v5637_v31  ;;  %v5653_v30 = vor.u32 %v7301_v19, %v5652_v18 }
  0xe2   :  { %10264 = vst [vmem:[#allocation11_spill] sm:$0xff] %v8041_v37  ;;  %1937 = vmatmul.bf16.gmra.mxu1 %v5137_v34  ;;  %2252 = vmatmul.bf16.gmra.mxu2 %v5641_v35  ;;  %v5153_v34 = vor.u32 %v7174_v20, %v5150_v21  ;;  %v5657_v35 = vor.u32 %v7300_v23, %v5654_v24  ;;  %v5164_v24 = vld [vmem:[%s10206_s0 + $0x100] sm:$0xf] }
  0xe4   :  { %v1704_v38 = vpop.f32.mrf.mxu3 }
  0xe5   :  { %v2213_v39 = vpop.f32.mrf.mxu2 }
  0xe6   :  { %v8043_v40 = vadd.f32 %v2213_v39, %v1704_v38  ;;  %v1391_v42 = vpop.f32.mrf.mxu0 }
  0xe7   :  { %v1900_v43 = vpop.f32.mrf.mxu1 }
  0xe8   :  { %v8045_v44 = vadd.f32 %v1900_v43, %v1391_v42 }
  0xea   :  { %10265 = vst [vmem:[#allocation12_spill] sm:$0xff] %v8045_v44 }
  0xec   :  { %v1706_v56 = vpop.f32.mrf.mxu3 }
  0xed   :  { %v2215_v57 = vpop.f32.mrf.mxu2 }
  0xee   :  { %v8071_v60 = vadd.f32 %v2215_v57, %v1706_v56  ;;  %v1394_v61 = vpop.f32.mrf.mxu0  ;;  %v5158_v56 = vld [vmem:[%s10206_s0 + $0xf8] sm:$0xf0]  ;;  %v7302_v57 = vld [vmem:[%s10206_s0 + $0x4e4] sm:$0xf] }
  0xef   :  { %v1903_v2 = vpop.f32.mrf.mxu1 }
  0xf0   :  { %10266 = vst [vmem:[#allocation13_spill] sm:$0xff] %v8071_v60  ;;  %v8073_v5 = vadd.f32 %v1903_v2, %v1394_v61 }
  0xf1   :  { %1433 = vmatmul.bf16.gmra.mxu0 %v5141_v58  ;;  %1748 = vmatmul.bf16.gmra.mxu3 %v5645_v59  ;;  %v5662_v58 = vld [vmem:[%s10206_s0 + $0x4e8] sm:$0xf0] }
  0xf2   :  { %10267 = vst [vmem:[#allocation14_spill] sm:$0xff] %v8073_v5  ;;  %1942 = vmatmul.bf16.gmra.mxu1 %v5145_v63  ;;  %2257 = vmatmul.bf16.gmra.mxu2 %v5649_v0  ;;  %v5157_v63 = vor.u32 %v7177_v51, %v5156_v50  ;;  %v5661_v0 = vor.u32 %v7303_v54, %v5660_v53 }
  0xf4   :  { %v1709_v6 = vpop.f32.mrf.mxu3 }
  0xf5   :  { %v2218_v7 = vpop.f32.mrf.mxu2 }
  0xf6   :  { %v8075_v8 = vadd.f32 %v2218_v7, %v1709_v6  ;;  %v1396_v10 = vpop.f32.mrf.mxu0  ;;  %v5161_v7 = vor.u32 %v7176_v55, %v5158_v56 }
  0xf7   :  { %v1905_v11 = vpop.f32.mrf.mxu1 }
  0xf8   :  { %v8077_v13 = vadd.f32 %v1905_v11, %v1396_v10  ;;  %v5665_v10 = vor.u32 %v7302_v57, %v5662_v58 }
  0xfa   :  { %10268 = vst [vmem:[#allocation15_spill] sm:$0xff] %v8077_v13 }
  0xfc   :  { %v1711_v26 = vpop.f32.mrf.mxu3 }
  0xfd   :  { %v2220_v27 = vpop.f32.mrf.mxu2 }
  0xfe   :  { %v8103_v31 = vadd.f32 %v2220_v27, %v1711_v26  ;;  %v1399_v33 = vpop.f32.mrf.mxu0  ;;  %v7179_v26 = vld [vmem:[%s10206_s0 + $0x104] sm:$0xf0]  ;;  %v5668_v27 = vld [vmem:[%s10206_s0 + $0x4f0] sm:$0xf] }
  0xff   :  { %v1908_v36 = vpop.f32.mrf.mxu1 }
 0x100   :  { %10269 = vst [vmem:[#allocation16_spill] sm:$0xff] %v8103_v31  ;;  %v8105_v38 = vadd.f32 %v1908_v36, %v1399_v33  ;;  %v5166_v33 = vld [vmem:[%s10206_s0 + $0x108] sm:$0xf0] }
 0x101   :  { %1438 = vmatmul.bf16.gmra.mxu0 %v5149_v29  ;;  %1753 = vmatmul.bf16.gmra.mxu3 %v5653_v30  ;;  %v7305_v29 = vld [vmem:[%s10206_s0 + $0x4f4] sm:$0xf0]  ;;  %v7178_v30 = vld [vmem:[%s10206_s0 + $0x104] sm:$0xf] }
 0x102   :  { %10270 = vst [vmem:[#allocation17_spill] sm:$0xff] %v8105_v38  ;;  %1947 = vmatmul.bf16.gmra.mxu1 %v5153_v34  ;;  %2262 = vmatmul.bf16.gmra.mxu2 %v5657_v35  ;;  %v7304_v34 = vld [vmem:[%s10206_s0 + $0x4f4] sm:$0xf]  ;;  %v5670_v35 = vld [vmem:[%s10206_s0 + $0x4f8] sm:$0xf0]  ;;  %v5169_v51 = vor.u32 %v7178_v30, %v5166_v33 }
 0x103   :  { %v5673_v53 = vor.u32 %v7304_v34, %v5670_v35 }
 0x104   :  { %v1714_v39 = vpop.f32.mrf.mxu3 }
 0x105   :  { %v2223_v42 = vpop.f32.mrf.mxu2 }
 0x106   :  { %v8107_v43 = vadd.f32 %v2223_v42, %v1714_v39  ;;  %v1401_v45 = vpop.f32.mrf.mxu0  ;;  %v5165_v42 = vor.u32 %v7179_v26, %v5164_v24 }
 0x107   :  { %v1910_v47 = vpop.f32.mrf.mxu1 }
 0x108   :  { %v8109_v48 = vadd.f32 %v1910_v47, %v1401_v45  ;;  %v5669_v45 = vor.u32 %v7305_v29, %v5668_v27 }
 0x10a   :  { %10271 = vst [vmem:[#allocation18_spill] sm:$0xff] %v8109_v48 }
 0x10c   :  { %v1716_v59 = vpop.f32.mrf.mxu3 }
 0x10d   :  { %v2225_v61 = vpop.f32.mrf.mxu2 }
 0x10e   :  { %v8135_v2 = vadd.f32 %v2225_v61, %v1716_v59  ;;  %v1404_v6 = vpop.f32.mrf.mxu0 }
 0x10f   :  { %v1913_v11 = vpop.f32.mrf.mxu1 }
 0x110   :  { %10272 = vst [vmem:[#allocation19_spill] sm:$0xff] %v8135_v2  ;;  %v8137_v14 = vadd.f32 %v1913_v11, %v1404_v6  ;;  %v7181_v6 = vld [vmem:[%s10206_s0 + $0x114] sm:$0xf0]  ;;  %v7180_v11 = vld [vmem:[%s10206_s0 + $0x114] sm:$0xf] }
 0x111   :  { %1443 = vmatmul.bf16.gmra.mxu0 %v5157_v63  ;;  %1758 = vmatmul.bf16.gmra.mxu3 %v5661_v0  ;;  %v5172_v0 = vld [vmem:[%s10206_s0 + $0x110] sm:$0xf] }
 0x112   :  { %1952 = vmatmul.bf16.gmra.mxu1 %v5161_v7  ;;  %2267 = vmatmul.bf16.gmra.mxu2 %v5665_v10  ;;  %v5676_v7 = vld [vmem:[%s10206_s0 + $0x500] sm:$0xf]  ;;  %v7307_v10 = vld [vmem:[%s10206_s0 + $0x504] sm:$0xf0]  ;;  %v5173_v26 = vor.u32 %v7181_v6, %v5172_v0  ;;  %v5182_v0 = vld [vmem:[%s10206_s0 + $0x128] sm:$0xf0] }
 0x113   :  { %v5677_v27 = vor.u32 %v7307_v10, %v5676_v7  ;;  %v7308_v6 = vld [vmem:[%s10206_s0 + $0x514] sm:$0xf]  ;;  %v5686_v7 = vld [vmem:[%s10206_s0 + $0x518] sm:$0xf0] }
 0x114   :  { %v1719_v16 = vpop.f32.mrf.mxu3 }
 0x115   :  { %v2228_v18 = vpop.f32.mrf.mxu2 }
 0x116   :  { %v8139_v19 = vadd.f32 %v2228_v18, %v1719_v16  ;;  %v1406_v20 = vpop.f32.mrf.mxu0  ;;  %v5174_v16 = vld [vmem:[%s10206_s0 + $0x118] sm:$0xf0]  ;;  %v7306_v18 = vld [vmem:[%s10206_s0 + $0x504] sm:$0xf] }
 0x117   :  { %v1915_v21 = vpop.f32.mrf.mxu1  ;;  %v5177_v33 = vor.u32 %v7180_v11, %v5174_v16 }
 0x118   :  { %v8141_v23 = vadd.f32 %v1915_v21, %v1406_v20  ;;  %v5678_v20 = vld [vmem:[%s10206_s0 + $0x508] sm:$0xf0] }
 0x119   :  { %v5681_v34 = vor.u32 %v7306_v18, %v5678_v20 }
 0x11a   :  { %10273 = vst [vmem:[#allocation20_spill] sm:$0xff] %v8141_v23 }
 0x11c   :  { %v1721_v36 = vpop.f32.mrf.mxu3 }
 0x11d   :  { %v2230_v39 = vpop.f32.mrf.mxu2 }
 0x11e   :  { %v8167_v47 = vadd.f32 %v2230_v39, %v1721_v36  ;;  %v1409_v50 = vpop.f32.mrf.mxu0 }
 0x11f   :  { %v1918_v54 = vpop.f32.mrf.mxu1 }
 0x120   :  { %10274 = vst [vmem:[#allocation21_spill] sm:$0xff] %v8167_v47  ;;  %v8169_v55 = vadd.f32 %v1918_v54, %v1409_v50  ;;  %v5180_v54 = vld [vmem:[%s10206_s0 + $0x120] sm:$0xf] }
 0x121   :  { %1448 = vmatmul.bf16.gmra.mxu0 %v5165_v42  ;;  %1763 = vmatmul.bf16.gmra.mxu3 %v5669_v45 }
 0x122   :  { %1957 = vmatmul.bf16.gmra.mxu1 %v5169_v51  ;;  %2272 = vmatmul.bf16.gmra.mxu2 %v5673_v53 }
 0x124   :  { %v1724_v56 = vpop.f32.mrf.mxu3 }
 0x125   :  { %v2233_v57 = vpop.f32.mrf.mxu2 }
 0x126   :  { %v8171_v58 = vadd.f32 %v2233_v57, %v1724_v56  ;;  %v1411_v59 = vpop.f32.mrf.mxu0  ;;  %v7183_v56 = vld [vmem:[%s10206_s0 + $0x124] sm:$0xf0]  ;;  %v5684_v57 = vld [vmem:[%s10206_s0 + $0x510] sm:$0xf] }
 0x127   :  { %v1920_v61 = vpop.f32.mrf.mxu1  ;;  %v5181_v16 = vor.u32 %v7183_v56, %v5180_v54  ;;  %v7185_v54 = vld [vmem:[%s10206_s0 + $0x134] sm:$0xf0]  ;;  %v5692_v56 = vld [vmem:[%s10206_s0 + $0x520] sm:$0xf] }
 0x128   :  { %10275 = vst [vmem:[#allocation22_spill] sm:$0xff] %v8171_v58  ;;  %v8173_v63 = vadd.f32 %v1920_v61, %v1411_v59  ;;  %v7309_v59 = vld [vmem:[%s10206_s0 + $0x514] sm:$0xf0]  ;;  %v7182_v61 = vld [vmem:[%s10206_s0 + $0x124] sm:$0xf] }
 0x129   :  { %v5685_v18 = vor.u32 %v7309_v59, %v5684_v57  ;;  %v7311_v57 = vld [vmem:[%s10206_s0 + $0x524] sm:$0xf0]  ;;  %v7184_v59 = vld [vmem:[%s10206_s0 + $0x134] sm:$0xf] }
 0x12a   :  { %10276 = vst [vmem:[#allocation23_spill] sm:$0xff] %v8173_v63 }
 0x12c   :  { %v1726_v21 = vpop.f32.mrf.mxu3 }
 0x12d   :  { %v2235_v24 = vpop.f32.mrf.mxu2 }
 0x12e   :  { %v8199_v29 = vadd.f32 %v2235_v24, %v1726_v21  ;;  %v1414_v30 = vpop.f32.mrf.mxu0  ;;  %v5185_v24 = vor.u32 %v7182_v61, %v5182_v0  ;;  %v5190_v61 = vld [vmem:[%s10206_s0 + $0x138] sm:$0xf0]  ;;  %v7310_v0 = vld [vmem:[%s10206_s0 + $0x524] sm:$0xf] }
 0x12f   :  { %v1923_v35 = vpop.f32.mrf.mxu1 }
 0x130   :  { %10277 = vst [vmem:[#allocation24_spill] sm:$0xff] %v8199_v29  ;;  %v8201_v36 = vadd.f32 %v1923_v35, %v1414_v30 }
 0x131   :  { %1453 = vmatmul.bf16.gmra.mxu0 %v5173_v26  ;;  %1768 = vmatmul.bf16.gmra.mxu3 %v5677_v27  ;;  %v5689_v26 = vor.u32 %v7308_v6, %v5686_v7  ;;  %v5694_v6 = vld [vmem:[%s10206_s0 + $0x528] sm:$0xf0] }
 0x132   :  { %1962 = vmatmul.bf16.gmra.mxu1 %v5177_v33  ;;  %2277 = vmatmul.bf16.gmra.mxu2 %v5681_v34 }
 0x134   :  { %v1729_v39 = vpop.f32.mrf.mxu3 }
 0x135   :  { %v2238_v42 = vpop.f32.mrf.mxu2 }
 0x136   :  { %v8203_v45 = vadd.f32 %v2238_v42, %v1729_v39  ;;  %v1416_v50 = vpop.f32.mrf.mxu0 }
 0x137   :  { %v1925_v51 = vpop.f32.mrf.mxu1 }
 0x138   :  { %10278 = vst [vmem:[#allocation25_spill] sm:$0xff] %v8203_v45  ;;  %v8205_v53 = vadd.f32 %v1925_v51, %v1416_v50  ;;  %v5188_v51 = vld [vmem:[%s10206_s0 + $0x130] sm:$0xf] }
 0x13a   :  { %10279 = vst [vmem:[#allocation26_spill] sm:$0xff] %v8205_v53 }
 0x13c   :  { %v1731_v10 = vpop.f32.mrf.mxu3 }
 0x13d   :  { %v2240_v11 = vpop.f32.mrf.mxu2 }
 0x13e   :  { %v8231_v20 = vadd.f32 %v2240_v11, %v1731_v10  ;;  %v1419_v21 = vpop.f32.mrf.mxu0  ;;  %v5189_v11 = vor.u32 %v7185_v54, %v5188_v51  ;;  %v5196_v54 = vld [vmem:[%s10206_s0 + $0x140] sm:$0xf] }
 0x13f   :  { %v1928_v27 = vpop.f32.mrf.mxu1 }
 0x140   :  { %10280 = vst [vmem:[#allocation27_spill] sm:$0xff] %v8231_v20  ;;  %v8233_v30 = vadd.f32 %v1928_v27, %v1419_v21 }
 0x141   :  { %1458 = vmatmul.bf16.gmra.mxu0 %v5181_v16  ;;  %1773 = vmatmul.bf16.gmra.mxu3 %v5685_v18  ;;  %v5693_v16 = vor.u32 %v7311_v57, %v5692_v56  ;;  %v7187_v56 = vld [vmem:[%s10206_s0 + $0x144] sm:$0xf0]  ;;  %v5700_v57 = vld [vmem:[%s10206_s0 + $0x530] sm:$0xf] }
 0x142   :  { %1967 = vmatmul.bf16.gmra.mxu1 %v5185_v24  ;;  %2282 = vmatmul.bf16.gmra.mxu2 %v5689_v26  ;;  %v5193_v24 = vor.u32 %v7184_v59, %v5190_v61  ;;  %v5697_v26 = vor.u32 %v7310_v0, %v5694_v6  ;;  %v7313_v59 = vld [vmem:[%s10206_s0 + $0x534] sm:$0xf0]  ;;  %v7312_v61 = vld [vmem:[%s10206_s0 + $0x534] sm:$0xf]  ;;  %v5702_v0 = vld [vmem:[%s10206_s0 + $0x538] sm:$0xf0] }
 0x144   :  { %v1734_v33 = vpop.f32.mrf.mxu3 }
 0x145   :  { %v2243_v34 = vpop.f32.mrf.mxu2 }
 0x146   :  { %v8235_v35 = vadd.f32 %v2243_v34, %v1734_v33  ;;  %v1421_v39 = vpop.f32.mrf.mxu0 }
 0x147   :  { %v1930_v42 = vpop.f32.mrf.mxu1 }
 0x148   :  { %10281 = vst [vmem:[#allocation28_spill] sm:$0xff] %v8235_v35  ;;  %v8237_v50 = vadd.f32 %v1930_v42, %v1421_v39 }
 0x14a   :  { %10282 = vst [vmem:[#allocation29_spill] sm:$0xff] %v8237_v50 }
 0x14c   :  { %v1736_v7 = vpop.f32.mrf.mxu3 }
 0x14d   :  { %v2245_v10 = vpop.f32.mrf.mxu2 }
 0x14e   :  { %v8263_v18 = vadd.f32 %v2245_v10, %v1736_v7  ;;  %v1424_v21 = vpop.f32.mrf.mxu0  ;;  %v5197_v10 = vor.u32 %v7187_v56, %v5196_v54  ;;  %v5204_v56 = vld [vmem:[%s10206_s0 + $0x150] sm:$0xf] }
 0x14f   :  { %v1933_v27 = vpop.f32.mrf.mxu1 }
 0x150   :  { %10283 = vst [vmem:[#allocation30_spill] sm:$0xff] %v8263_v18  ;;  %v8265_v33 = vadd.f32 %v1933_v27, %v1424_v21 }
 0x151   :  { %1463 = vmatmul.bf16.gmra.mxu0 %v5189_v11  ;;  %1778 = vmatmul.bf16.gmra.mxu3 %v5693_v16  ;;  %v5701_v11 = vor.u32 %v7313_v59, %v5700_v57  ;;  %v7189_v57 = vld [vmem:[%s10206_s0 + $0x154] sm:$0xf0]  ;;  %v5708_v59 = vld [vmem:[%s10206_s0 + $0x540] sm:$0xf] }
 0x152   :  { %1972 = vmatmul.bf16.gmra.mxu1 %v5193_v24  ;;  %2287 = vmatmul.bf16.gmra.mxu2 %v5697_v26  ;;  %v5705_v26 = vor.u32 %v7312_v61, %v5702_v0 }
 0x154   :  { %v1739_v34 = vpop.f32.mrf.mxu3 }
 0x155   :  { %v2248_v39 = vpop.f32.mrf.mxu2 }
 0x156   :  { %v8267_v42 = vadd.f32 %v2248_v39, %v1739_v34  ;;  %v1426_v35 = vpop.f32.mrf.mxu0 }
 0x157   :  { %v1935_v20 = vpop.f32.mrf.mxu1 }
 0x158   :  { %10284 = vst [vmem:[#allocation31_spill] sm:$0xff] %v8267_v42  ;;  %v8269_v51 = vadd.f32 %v1935_v20, %v1426_v35  ;;  %v7186_v20 = vld [vmem:[%s10206_s0 + $0x144] sm:$0xf]  ;;  %v5198_v35 = vld [vmem:[%s10206_s0 + $0x148] sm:$0xf0] }
 0x159   :  { %v5201_v24 = vor.u32 %v7186_v20, %v5198_v35  ;;  %v7314_v20 = vld [vmem:[%s10206_s0 + $0x544] sm:$0xf]  ;;  %v5710_v35 = vld [vmem:[%s10206_s0 + $0x548] sm:$0xf0] }
 0x15c   :  { %v1741_v6 = vpop.f32.mrf.mxu3 }
 0x15d   :  { %v2250_v7 = vpop.f32.mrf.mxu2 }
 0x15e   :  { %v8295_v16 = vadd.f32 %v2250_v7, %v1741_v6  ;;  %v1429_v21 = vpop.f32.mrf.mxu0  ;;  %v5205_v6 = vor.u32 %v7189_v57, %v5204_v56  ;;  %v5212_v57 = vld [vmem:[%s10206_s0 + $0x160] sm:$0xf] }
 0x15f   :  { %v1938_v27 = vpop.f32.mrf.mxu1 }
 0x160   :  { %10285 = vst [vmem:[#allocation32_spill] sm:$0xff] %v8295_v16  ;;  %v8297_v34 = vadd.f32 %v1938_v27, %v1429_v21 }
 0x161   :  { %1468 = vmatmul.bf16.gmra.mxu0 %v5197_v10  ;;  %1783 = vmatmul.bf16.gmra.mxu3 %v5701_v11 }
 0x162   :  { %1977 = vmatmul.bf16.gmra.mxu1 %v5201_v24  ;;  %2292 = vmatmul.bf16.gmra.mxu2 %v5705_v26  ;;  %v5713_v24 = vor.u32 %v7314_v20, %v5710_v35 }
 0x164   :  { %v1744_v39 = vpop.f32.mrf.mxu3 }
 0x165   :  { %v2253_v42 = vpop.f32.mrf.mxu2 }
 0x166   :  { %v8299_v18 = vadd.f32 %v2253_v42, %v1744_v39  ;;  %v1431_v45 = vpop.f32.mrf.mxu0  ;;  %v7315_v42 = vld [vmem:[%s10206_s0 + $0x544] sm:$0xf0] }
 0x167   :  { %v1940_v29 = vpop.f32.mrf.mxu1  ;;  %v5709_v7 = vor.u32 %v7315_v42, %v5708_v59  ;;  %v7191_v59 = vld [vmem:[%s10206_s0 + $0x164] sm:$0xf0]  ;;  %v5716_v42 = vld [vmem:[%s10206_s0 + $0x550] sm:$0xf] }
 0x168   :  { %10286 = vst [vmem:[#allocation33_spill] sm:$0xff] %v8299_v18  ;;  %v8301_v54 = vadd.f32 %v1940_v29, %v1431_v45  ;;  %v7188_v29 = vld [vmem:[%s10206_s0 + $0x154] sm:$0xf]  ;;  %v5206_v45 = vld [vmem:[%s10206_s0 + $0x158] sm:$0xf0] }
 0x169   :  { %v5209_v21 = vor.u32 %v7188_v29, %v5206_v45  ;;  %v7316_v29 = vld [vmem:[%s10206_s0 + $0x554] sm:$0xf]  ;;  %v5718_v45 = vld [vmem:[%s10206_s0 + $0x558] sm:$0xf0] }
 0x16a   :  { %10287 = vst [vmem:[#allocation34_spill] sm:$0xff] %v8301_v54 }
 0x16c   :  { %v1746_v61 = vpop.f32.mrf.mxu3 }
 0x16d   :  { %v2255_v0 = vpop.f32.mrf.mxu2 }
 0x16e   :  { %v8327_v10 = vadd.f32 %v2255_v0, %v1746_v61  ;;  %v1434_v11 = vpop.f32.mrf.mxu0  ;;  %v5213_v61 = vor.u32 %v7191_v59, %v5212_v57  ;;  %v5220_v59 = vld [vmem:[%s10206_s0 + $0x170] sm:$0xf] }
 0x16f   :  { %v1943_v26 = vpop.f32.mrf.mxu1 }
 0x170   :  { %10288 = vst [vmem:[#allocation35_spill] sm:$0xff] %v8327_v10  ;;  %v8329_v27 = vadd.f32 %v1943_v26, %v1434_v11 }
 0x171   :  { %1473 = vmatmul.bf16.gmra.mxu0 %v5205_v6  ;;  %1788 = vmatmul.bf16.gmra.mxu3 %v5709_v7 }
 0x172   :  { %1982 = vmatmul.bf16.gmra.mxu1 %v5209_v21  ;;  %2297 = vmatmul.bf16.gmra.mxu2 %v5713_v24  ;;  %v5721_v21 = vor.u32 %v7316_v29, %v5718_v45 }
 0x174   :  { %v1749_v39 = vpop.f32.mrf.mxu3 }
 0x175   :  { %v2258_v18 = vpop.f32.mrf.mxu2 }
 0x176   :  { %v8331_v16 = vadd.f32 %v2258_v18, %v1749_v39  ;;  %v1436_v58 = vpop.f32.mrf.mxu0  ;;  %v7317_v18 = vld [vmem:[%s10206_s0 + $0x554] sm:$0xf0] }
 0x177   :  { %v1945_v47 = vpop.f32.mrf.mxu1  ;;  %v5717_v0 = vor.u32 %v7317_v18, %v5716_v42  ;;  %v7193_v42 = vld [vmem:[%s10206_s0 + $0x174] sm:$0xf0]  ;;  %v5724_v18 = vld [vmem:[%s10206_s0 + $0x560] sm:$0xf] }
 0x178   :  { %10289 = vst [vmem:[#allocation36_spill] sm:$0xff] %v8331_v16  ;;  %v8333_v56 = vadd.f32 %v1945_v47, %v1436_v58  ;;  %v7190_v47 = vld [vmem:[%s10206_s0 + $0x164] sm:$0xf]  ;;  %v5214_v58 = vld [vmem:[%s10206_s0 + $0x168] sm:$0xf0] }
 0x179   :  { %v5217_v11 = vor.u32 %v7190_v47, %v5214_v58  ;;  %v7318_v47 = vld [vmem:[%s10206_s0 + $0x564] sm:$0xf]  ;;  %v5726_v58 = vld [vmem:[%s10206_s0 + $0x568] sm:$0xf0] }
 0x17c   :  { %v1751_v20 = vpop.f32.mrf.mxu3 }
 0x17d   :  { %v2260_v35 = vpop.f32.mrf.mxu2 }
 0x17e   :  { %v8359_v6 = vadd.f32 %v2260_v35, %v1751_v20  ;;  %v1439_v7 = vpop.f32.mrf.mxu0  ;;  %v5221_v20 = vor.u32 %v7193_v42, %v5220_v59  ;;  %v5228_v42 = vld [vmem:[%s10206_s0 + $0x180] sm:$0xf] }
 0x17f   :  { %v1948_v24 = vpop.f32.mrf.mxu1 }
 0x180   :  { %10290 = vst [vmem:[#allocation37_spill] sm:$0xff] %v8359_v6  ;;  %v8361_v26 = vadd.f32 %v1948_v24, %v1439_v7 }
 0x181   :  { %1478 = vmatmul.bf16.gmra.mxu0 %v5213_v61  ;;  %1793 = vmatmul.bf16.gmra.mxu3 %v5717_v0 }
 0x182   :  { %1987 = vmatmul.bf16.gmra.mxu1 %v5217_v11  ;;  %2302 = vmatmul.bf16.gmra.mxu2 %v5721_v21  ;;  %v5729_v11 = vor.u32 %v7318_v47, %v5726_v58 }
 0x184   :  { %v1754_v39 = vpop.f32.mrf.mxu3 }
 0x185   :  { %v2263_v16 = vpop.f32.mrf.mxu2 }
 0x186   :  { %v8363_v10 = vadd.f32 %v2263_v16, %v1754_v39  ;;  %v1441_v2 = vpop.f32.mrf.mxu0  ;;  %v7319_v16 = vld [vmem:[%s10206_s0 + $0x564] sm:$0xf0] }
 0x187   :  { %v1950_v31 = vpop.f32.mrf.mxu1  ;;  %v5725_v35 = vor.u32 %v7319_v16, %v5724_v18  ;;  %v7195_v18 = vld [vmem:[%s10206_s0 + $0x184] sm:$0xf0]  ;;  %v5732_v16 = vld [vmem:[%s10206_s0 + $0x570] sm:$0xf] }
 0x188   :  { %10291 = vst [vmem:[#allocation38_spill] sm:$0xff] %v8363_v10  ;;  %v8365_v57 = vadd.f32 %v1950_v31, %v1441_v2  ;;  %v7192_v31 = vld [vmem:[%s10206_s0 + $0x174] sm:$0xf]  ;;  %v5222_v2 = vld [vmem:[%s10206_s0 + $0x178] sm:$0xf0] }
 0x189   :  { %v5225_v7 = vor.u32 %v7192_v31, %v5222_v2  ;;  %v7320_v31 = vld [vmem:[%s10206_s0 + $0x574] sm:$0xf]  ;;  %v5734_v2 = vld [vmem:[%s10206_s0 + $0x578] sm:$0xf0] }
 0x18c   :  { %v1756_v29 = vpop.f32.mrf.mxu3 }
 0x18d   :  { %v2265_v45 = vpop.f32.mrf.mxu2 }
 0x18e   :  { %v8391_v61 = vadd.f32 %v2265_v45, %v1756_v29  ;;  %v1444_v0 = vpop.f32.mrf.mxu0  ;;  %v5229_v29 = vor.u32 %v7195_v18, %v5228_v42  ;;  %v5236_v18 = vld [vmem:[%s10206_s0 + $0x190] sm:$0xf] }
 0x18f   :  { %v1953_v21 = vpop.f32.mrf.mxu1 }
 0x190   :  { %10292 = vst [vmem:[#allocation39_spill] sm:$0xff] %v8391_v61  ;;  %v8393_v24 = vadd.f32 %v1953_v21, %v1444_v0 }
 0x191   :  { %1483 = vmatmul.bf16.gmra.mxu0 %v5221_v20  ;;  %1798 = vmatmul.bf16.gmra.mxu3 %v5725_v35 }
 0x192   :  { %1992 = vmatmul.bf16.gmra.mxu1 %v5225_v7  ;;  %2307 = vmatmul.bf16.gmra.mxu2 %v5729_v11  ;;  %v5737_v7 = vor.u32 %v7320_v31, %v5734_v2 }
 0x194   :  { %v1759_v39 = vpop.f32.mrf.mxu3 }
 0x195   :  { %v2268_v10 = vpop.f32.mrf.mxu2 }
 0x196   :  { %v8395_v6 = vadd.f32 %v2268_v10, %v1759_v39  ;;  %v1446_v60 = vpop.f32.mrf.mxu0  ;;  %v7321_v10 = vld [vmem:[%s10206_s0 + $0x574] sm:$0xf0] }
 0x197   :  { %v1955_v32 = vpop.f32.mrf.mxu1  ;;  %v5733_v45 = vor.u32 %v7321_v10, %v5732_v16  ;;  %v7197_v16 = vld [vmem:[%s10206_s0 + $0x194] sm:$0xf0]  ;;  %v5740_v10 = vld [vmem:[%s10206_s0 + $0x580] sm:$0xf] }
 0x198   :  { %10293 = vst [vmem:[#allocation40_spill] sm:$0xff] %v8395_v6  ;;  %v8397_v59 = vadd.f32 %v1955_v32, %v1446_v60  ;;  %v7194_v32 = vld [vmem:[%s10206_s0 + $0x184] sm:$0xf]  ;;  %v5230_v60 = vld [vmem:[%s10206_s0 + $0x188] sm:$0xf0] }
 0x199   :  { %v5233_v0 = vor.u32 %v7194_v32, %v5230_v60  ;;  %v7322_v32 = vld [vmem:[%s10206_s0 + $0x584] sm:$0xf]  ;;  %v5742_v60 = vld [vmem:[%s10206_s0 + $0x588] sm:$0xf0] }
 0x19a   :  { %10294 = vst [vmem:[#allocation41_spill] sm:$0xff] %v8397_v59 }
 0x19c   :  { %v1761_v47 = vpop.f32.mrf.mxu3 }
 0x19d   :  { %v2270_v58 = vpop.f32.mrf.mxu2 }
 0x19e   :  { %v8423_v20 = vadd.f32 %v2270_v58, %v1761_v47  ;;  %v1449_v35 = vpop.f32.mrf.mxu0  ;;  %v5237_v47 = vor.u32 %v7197_v16, %v5236_v18  ;;  %v5244_v16 = vld [vmem:[%s10206_s0 + $0x1a0] sm:$0xf] }
 0x19f   :  { %v1958_v11 = vpop.f32.mrf.mxu1 }
 0x1a0   :  { %10295 = vst [vmem:[#allocation42_spill] sm:$0xff] %v8423_v20  ;;  %v8425_v21 = vadd.f32 %v1958_v11, %v1449_v35 }
 0x1a1   :  { %1488 = vmatmul.bf16.gmra.mxu0 %v5229_v29  ;;  %1803 = vmatmul.bf16.gmra.mxu3 %v5733_v45 }
 0x1a2   :  { %10296 = vst [vmem:[#allocation43_spill] sm:$0xff] %v8425_v21  ;;  %1997 = vmatmul.bf16.gmra.mxu1 %v5233_v0  ;;  %2312 = vmatmul.bf16.gmra.mxu2 %v5737_v7  ;;  %v5745_v0 = vor.u32 %v7322_v32, %v5742_v60 }
 0x1a4   :  { %v1764_v39 = vpop.f32.mrf.mxu3 }
 0x1a5   :  { %v2273_v6 = vpop.f32.mrf.mxu2 }
 0x1a6   :  { %v8427_v61 = vadd.f32 %v2273_v6, %v1764_v39  ;;  %v1451_v59 = vpop.f32.mrf.mxu0  ;;  %v7323_v6 = vld [vmem:[%s10206_s0 + $0x584] sm:$0xf0] }
 0x1a7   :  { %v1960_v3 = vpop.f32.mrf.mxu1  ;;  %v5741_v58 = vor.u32 %v7323_v6, %v5740_v10  ;;  %v7199_v10 = vld [vmem:[%s10206_s0 + $0x1a4] sm:$0xf0]  ;;  %v5748_v6 = vld [vmem:[%s10206_s0 + $0x590] sm:$0xf] }
 0x1a8   :  { %10297 = vst [vmem:[#allocation44_spill] sm:$0xff] %v8427_v61  ;;  %v8429_v42 = vadd.f32 %v1960_v3, %v1451_v59  ;;  %v7196_v3 = vld [vmem:[%s10206_s0 + $0x194] sm:$0xf]  ;;  %v5238_v59 = vld [vmem:[%s10206_s0 + $0x198] sm:$0xf0] }
 0x1a9   :  { %v5241_v35 = vor.u32 %v7196_v3, %v5238_v59  ;;  %v7324_v3 = vld [vmem:[%s10206_s0 + $0x594] sm:$0xf]  ;;  %v5750_v59 = vld [vmem:[%s10206_s0 + $0x598] sm:$0xf0] }
 0x1aa   :  { %10298 = vst [vmem:[#allocation45_spill] sm:$0xff] %v8429_v42 }
 0x1ac   :  { %v1766_v31 = vpop.f32.mrf.mxu3 }
 0x1ad   :  { %v2275_v2 = vpop.f32.mrf.mxu2 }
 0x1ae   :  { %v8455_v29 = vadd.f32 %v2275_v2, %v1766_v31  ;;  %v1454_v45 = vpop.f32.mrf.mxu0  ;;  %v5245_v31 = vor.u32 %v7199_v10, %v5244_v16  ;;  %v5252_v10 = vld [vmem:[%s10206_s0 + $0x1b0] sm:$0xf] }
 0x1af   :  { %v1963_v7 = vpop.f32.mrf.mxu1 }
 0x1b0   :  { %10299 = vst [vmem:[#allocation46_spill] sm:$0xff] %v8455_v29  ;;  %v8457_v11 = vadd.f32 %v1963_v7, %v1454_v45 }
 0x1b1   :  { %1493 = vmatmul.bf16.gmra.mxu0 %v5237_v47  ;;  %1808 = vmatmul.bf16.gmra.mxu3 %v5741_v58 }
 0x1b2   :  { %10300 = vst [vmem:[#allocation47_spill] sm:$0xff] %v8457_v11  ;;  %2002 = vmatmul.bf16.gmra.mxu1 %v5241_v35  ;;  %2317 = vmatmul.bf16.gmra.mxu2 %v5745_v0  ;;  %v5753_v35 = vor.u32 %v7324_v3, %v5750_v59 }
 0x1b4   :  { %v1769_v39 = vpop.f32.mrf.mxu3 }
 0x1b5   :  { %v2278_v61 = vpop.f32.mrf.mxu2 }
 0x1b6   :  { %v8459_v20 = vadd.f32 %v2278_v61, %v1769_v39  ;;  %v1456_v42 = vpop.f32.mrf.mxu0  ;;  %v7325_v61 = vld [vmem:[%s10206_s0 + $0x594] sm:$0xf0] }
 0x1b7   :  { %v1965_v21 = vpop.f32.mrf.mxu1  ;;  %v5749_v2 = vor.u32 %v7325_v61, %v5748_v6  ;;  %v7201_v6 = vld [vmem:[%s10206_s0 + $0x1b4] sm:$0xf0]  ;;  %v5756_v61 = vld [vmem:[%s10206_s0 + $0x5a0] sm:$0xf] }
 0x1b8   :  { %10301 = vst [vmem:[#allocation48_spill] sm:$0xff] %v8459_v20  ;;  %v8461_v18 = vadd.f32 %v1965_v21, %v1456_v42  ;;  %v7198_v21 = vld [vmem:[%s10206_s0 + $0x1a4] sm:$0xf]  ;;  %v5246_v42 = vld [vmem:[%s10206_s0 + $0x1a8] sm:$0xf0] }
 0x1b9   :  { %v5249_v45 = vor.u32 %v7198_v21, %v5246_v42  ;;  %v7326_v21 = vld [vmem:[%s10206_s0 + $0x5a4] sm:$0xf]  ;;  %v5758_v42 = vld [vmem:[%s10206_s0 + $0x5a8] sm:$0xf0] }
 0x1ba   :  { %10302 = vst [vmem:[#allocation49_spill] sm:$0xff] %v8461_v18 }
 0x1bc   :  { %v1771_v32 = vpop.f32.mrf.mxu3 }
 0x1bd   :  { %v2280_v60 = vpop.f32.mrf.mxu2 }
 0x1be   :  { %v8487_v47 = vadd.f32 %v2280_v60, %v1771_v32  ;;  %v1459_v58 = vpop.f32.mrf.mxu0  ;;  %v5253_v32 = vor.u32 %v7201_v6, %v5252_v10  ;;  %v5260_v6 = vld [vmem:[%s10206_s0 + $0x1c0] sm:$0xf] }
 0x1bf   :  { %v1968_v0 = vpop.f32.mrf.mxu1 }
 0x1c0   :  { %10303 = vst [vmem:[#allocation50_spill] sm:$0xff] %v8487_v47  ;;  %v8489_v7 = vadd.f32 %v1968_v0, %v1459_v58 }
 0x1c1   :  { %1498 = vmatmul.bf16.gmra.mxu0 %v5245_v31  ;;  %1813 = vmatmul.bf16.gmra.mxu3 %v5749_v2 }
 0x1c2   :  { %10304 = vst [vmem:[#allocation51_spill] sm:$0xff] %v8489_v7  ;;  %2007 = vmatmul.bf16.gmra.mxu1 %v5249_v45  ;;  %2322 = vmatmul.bf16.gmra.mxu2 %v5753_v35  ;;  %v5761_v45 = vor.u32 %v7326_v21, %v5758_v42 }
 0x1c4   :  { %v1774_v39 = vpop.f32.mrf.mxu3 }
 0x1c5   :  { %v2283_v20 = vpop.f32.mrf.mxu2 }
 0x1c6   :  { %v8491_v29 = vadd.f32 %v2283_v20, %v1774_v39  ;;  %v1461_v18 = vpop.f32.mrf.mxu0  ;;  %v7327_v20 = vld [vmem:[%s10206_s0 + $0x5a4] sm:$0xf0] }
 0x1c7   :  { %v1970_v11 = vpop.f32.mrf.mxu1  ;;  %v5757_v60 = vor.u32 %v7327_v20, %v5756_v61  ;;  %v7203_v61 = vld [vmem:[%s10206_s0 + $0x1c4] sm:$0xf0]  ;;  %v5764_v20 = vld [vmem:[%s10206_s0 + $0x5b0] sm:$0xf] }
 0x1c8   :  { %10305 = vst [vmem:[#allocation52_spill] sm:$0xff] %v8491_v29  ;;  %v8493_v16 = vadd.f32 %v1970_v11, %v1461_v18  ;;  %v7200_v11 = vld [vmem:[%s10206_s0 + $0x1b4] sm:$0xf]  ;;  %v5254_v18 = vld [vmem:[%s10206_s0 + $0x1b8] sm:$0xf0] }
 0x1c9   :  { %v5257_v58 = vor.u32 %v7200_v11, %v5254_v18  ;;  %v7328_v11 = vld [vmem:[%s10206_s0 + $0x5b4] sm:$0xf]  ;;  %v5766_v18 = vld [vmem:[%s10206_s0 + $0x5b8] sm:$0xf0] }
 0x1ca   :  { %10306 = vst [vmem:[#allocation53_spill] sm:$0xff] %v8493_v16 }
 0x1cc   :  { %v1776_v3 = vpop.f32.mrf.mxu3 }
 0x1cd   :  { %v2285_v59 = vpop.f32.mrf.mxu2 }
 0x1ce   :  { %v8519_v31 = vadd.f32 %v2285_v59, %v1776_v3  ;;  %v1464_v2 = vpop.f32.mrf.mxu0  ;;  %v5261_v3 = vor.u32 %v7203_v61, %v5260_v6  ;;  %v5268_v61 = vld [vmem:[%s10206_s0 + $0x1d0] sm:$0xf] }
 0x1cf   :  { %v1973_v35 = vpop.f32.mrf.mxu1 }
 0x1d0   :  { %10307 = vst [vmem:[#allocation54_spill] sm:$0xff] %v8519_v31  ;;  %v8521_v0 = vadd.f32 %v1973_v35, %v1464_v2 }
 0x1d1   :  { %1503 = vmatmul.bf16.gmra.mxu0 %v5253_v32  ;;  %1818 = vmatmul.bf16.gmra.mxu3 %v5757_v60 }
 0x1d2   :  { %10308 = vst [vmem:[#allocation55_spill] sm:$0xff] %v8521_v0  ;;  %2012 = vmatmul.bf16.gmra.mxu1 %v5257_v58  ;;  %2327 = vmatmul.bf16.gmra.mxu2 %v5761_v45  ;;  %v5769_v58 = vor.u32 %v7328_v11, %v5766_v18 }
 0x1d4   :  { %v1779_v39 = vpop.f32.mrf.mxu3 }
 0x1d5   :  { %v2288_v29 = vpop.f32.mrf.mxu2 }
 0x1d6   :  { %v8523_v47 = vadd.f32 %v2288_v29, %v1779_v39  ;;  %v1466_v16 = vpop.f32.mrf.mxu0  ;;  %v7329_v29 = vld [vmem:[%s10206_s0 + $0x5b4] sm:$0xf0] }
 0x1d7   :  { %v1975_v7 = vpop.f32.mrf.mxu1  ;;  %v5765_v59 = vor.u32 %v7329_v29, %v5764_v20  ;;  %v7205_v20 = vld [vmem:[%s10206_s0 + $0x1d4] sm:$0xf0]  ;;  %v5772_v29 = vld [vmem:[%s10206_s0 + $0x5c0] sm:$0xf] }
 0x1d8   :  { %10309 = vst [vmem:[#allocation56_spill] sm:$0xff] %v8523_v47  ;;  %v8525_v10 = vadd.f32 %v1975_v7, %v1466_v16  ;;  %v7202_v7 = vld [vmem:[%s10206_s0 + $0x1c4] sm:$0xf]  ;;  %v5262_v16 = vld [vmem:[%s10206_s0 + $0x1c8] sm:$0xf0] }
 0x1d9   :  { %v5265_v2 = vor.u32 %v7202_v7, %v5262_v16  ;;  %v7330_v7 = vld [vmem:[%s10206_s0 + $0x5c4] sm:$0xf]  ;;  %v5774_v16 = vld [vmem:[%s10206_s0 + $0x5c8] sm:$0xf0] }
 0x1da   :  { %10310 = vst [vmem:[#allocation57_spill] sm:$0xff] %v8525_v10 }
 0x1dc   :  { %v1781_v21 = vpop.f32.mrf.mxu3 }
 0x1dd   :  { %v2290_v42 = vpop.f32.mrf.mxu2 }
 0x1de   :  { %v8551_v32 = vadd.f32 %v2290_v42, %v1781_v21  ;;  %v1469_v60 = vpop.f32.mrf.mxu0  ;;  %v5269_v21 = vor.u32 %v7205_v20, %v5268_v61  ;;  %v7377_v20 = vld [vmem:[%s10207_s3 + $0x78] sm:$0xff] }
 0x1df   :  { %v1978_v45 = vpop.f32.mrf.mxu1  ;;  %2769 = vmatpush.bf16.msrb.mxu2 %v7377_v20 }
 0x1e0   :  { %10311 = vst [vmem:[#allocation58_spill] sm:$0xff] %v8551_v32  ;;  %v8553_v35 = vadd.f32 %v1978_v45, %v1469_v60 }
 0x1e1   :  { %1508 = vmatmul.bf16.gmra.mxu0 %v5261_v3  ;;  %1823 = vmatmul.bf16.gmra.mxu3 %v5765_v59 }
 0x1e2   :  { %10312 = vst [vmem:[#allocation59_spill] sm:$0xff] %v8553_v35  ;;  %2017 = vmatmul.bf16.gmra.mxu1 %v5265_v2  ;;  %2332 = vmatmul.bf16.gmra.mxu2 %v5769_v58  ;;  %v5777_v2 = vor.u32 %v7330_v7, %v5774_v16  ;;  %v5782_v7 = vld [vmem:[%s10206_s0 + $0x5d8] sm:$0xf0] }
 0x1e4   :  { %v1784_v39 = vpop.f32.mrf.mxu3 }
 0x1e5   :  { %v2293_v47 = vpop.f32.mrf.mxu2 }
 0x1e6   :  { %v8555_v31 = vadd.f32 %v2293_v47, %v1784_v39  ;;  %v1471_v10 = vpop.f32.mrf.mxu0  ;;  %v7331_v47 = vld [vmem:[%s10206_s0 + $0x5c4] sm:$0xf0] }
 0x1e7   :  { %v1980_v0 = vpop.f32.mrf.mxu1  ;;  %v5773_v42 = vor.u32 %v7331_v47, %v5772_v29  ;;  %v5276_v29 = vld [vmem:[%s10206_s0 + $0x1e0] sm:$0xf]  ;;  %v7207_v47 = vld [vmem:[%s10206_s0 + $0x1e4] sm:$0xf0] }
 0x1e8   :  { %10313 = vst [vmem:[#allocation60_spill] sm:$0xff] %v8555_v31  ;;  %v8557_v6 = vadd.f32 %v1980_v0, %v1471_v10  ;;  %v7204_v0 = vld [vmem:[%s10206_s0 + $0x1d4] sm:$0xf]  ;;  %v5270_v10 = vld [vmem:[%s10206_s0 + $0x1d8] sm:$0xf0] }
 0x1e9   :  { %v5273_v60 = vor.u32 %v7204_v0, %v5270_v10  ;;  %v5278_v0 = vld [vmem:[%s10206_s0 + $0x1e8] sm:$0xf0]  ;;  %v7332_v10 = vld [vmem:[%s10206_s0 + $0x5d4] sm:$0xf] }
 0x1ea   :  { %10314 = vst [vmem:[#allocation61_spill] sm:$0xff] %v8557_v6 }
 0x1ec   :  { %v1786_v11 = vpop.f32.mrf.mxu3 }
 0x1ed   :  { %v2295_v18 = vpop.f32.mrf.mxu2 }
 0x1ee   :  { %v8583_v3 = vadd.f32 %v2295_v18, %v1786_v11  ;;  %v1474_v59 = vpop.f32.mrf.mxu0  ;;  %v5277_v18 = vor.u32 %v7207_v47, %v5276_v29  ;;  %v7369_v47 = vld [vmem:[%s10207_s3 + $0x38] sm:$0xff] }
 0x1ef   :  { %v1983_v58 = vpop.f32.mrf.mxu1  ;;  %2837 = vmatpush.bf16.msrb.mxu3 %v7369_v47 }
 0x1f0   :  { %10315 = vst [vmem:[#allocation62_spill] sm:$0xff] %v8583_v3  ;;  %v8585_v45 = vadd.f32 %v1983_v58, %v1474_v59 }
 0x1f1   :  { %1513 = vmatmul.bf16.gmra.mxu0 %v5269_v21  ;;  %1828 = vmatmul.bf16.gmra.mxu3 %v5773_v42 }
 0x1f2   :  { %10316 = vst [vmem:[#allocation63_spill] sm:$0xff] %v8585_v45  ;;  %2022 = vmatmul.bf16.gmra.mxu1 %v5273_v60  ;;  %2337 = vmatmul.bf16.gmra.mxu2 %v5777_v2  ;;  %v5785_v2 = vor.u32 %v7332_v10, %v5782_v7  ;;  %v5790_v10 = vld [vmem:[%s10206_s0 + $0x5e8] sm:$0xf0] }
 0x1f3   :  { %2838 = vmatpush.bf16.msrb.mxu3 %v7368_v28 }
 0x1f4   :  { %v1789_v39 = vpop.f32.mrf.mxu3 }
 0x1f5   :  { %v2298_v31 = vpop.f32.mrf.mxu2 }
 0x1f6   :  { %v8587_v32 = vadd.f32 %v2298_v31, %v1789_v39  ;;  %v1476_v6 = vpop.f32.mrf.mxu0  ;;  %v5780_v31 = vld [vmem:[%s10206_s0 + $0x5d0] sm:$0xf] }
 0x1f7   :  { %v1985_v35 = vpop.f32.mrf.mxu1 }
 0x1f8   :  { %10317 = vst [vmem:[#allocation64_spill] sm:$0xff] %v8587_v32  ;;  %v8589_v61 = vadd.f32 %v1985_v35, %v1476_v6  ;;  %v7333_v35 = vld [vmem:[%s10206_s0 + $0x5d4] sm:$0xf0]  ;;  %v7206_v6 = vld [vmem:[%s10206_s0 + $0x1e4] sm:$0xf] }
 0x1f9   :  { %v5781_v21 = vor.u32 %v7333_v35, %v5780_v31  ;;  %v5281_v60 = vor.u32 %v7206_v6, %v5278_v0  ;;  %v5284_v31 = vld [vmem:[%s10206_s0 + $0x1f0] sm:$0xf]  ;;  %v7209_v35 = vld [vmem:[%s10206_s0 + $0x1f4] sm:$0xf0]  ;;  %v5286_v6 = vld [vmem:[%s10206_s0 + $0x1f8] sm:$0xf0] }
 0x1fa   :  { %10318 = vst [vmem:[#allocation65_spill] sm:$0xff] %v8589_v61  ;;  %v7334_v0 = vld [vmem:[%s10206_s0 + $0x5e4] sm:$0xf] }
 0x1fc   :  { %v1791_v16 = vpop.f32.mrf.mxu3 }
 0x1fd   :  { %v2300_v11 = vpop.f32.mrf.mxu2 }
 0x1fe   :  { %v8618_v42 = vadd.f32 %v2300_v11, %v1791_v16  ;;  %v1479_v59 = vpop.f32.mrf.mxu0  ;;  %v5285_v11 = vor.u32 %v7209_v35, %v5284_v31  ;;  %v5292_v35 = vld [vmem:[%s10206_s0 + $0x200] sm:$0xf] }
 0x1ff   :  { %v1988_v58 = vpop.f32.mrf.mxu1 }
 0x200   :  { %10319 = vst [vmem:[#allocation66_spill] sm:$0xff] %v8618_v42  ;;  %v8620_v39 = vadd.f32 %v1988_v58, %v1479_v59 }
 0x201   :  { %1518 = vmatmul.bf16.gmra.mxu0 %v5277_v18  ;;  %1833 = vmatmul.bf16.gmra.mxu3 %v5781_v21 }
 0x202   :  { %10320 = vst [vmem:[#allocation67_spill] sm:$0xff] %v8620_v39  ;;  %2027 = vmatmul.bf16.gmra.mxu1 %v5281_v60  ;;  %2342 = vmatmul.bf16.gmra.mxu2 %v5785_v2  ;;  %v5793_v2 = vor.u32 %v7334_v0, %v5790_v10 }
 0x204   :  { %v1794_v20 = vpop.f32.mrf.mxu3 }
 0x205   :  { %v2303_v32 = vpop.f32.mrf.mxu2 }
 0x206   :  { %v8622_v3 = vadd.f32 %v2303_v32, %v1794_v20  ;;  %v1481_v61 = vpop.f32.mrf.mxu0  ;;  %v5788_v32 = vld [vmem:[%s10206_s0 + $0x5e0] sm:$0xf] }
 0x207   :  { %v1990_v45 = vpop.f32.mrf.mxu1 }
 0x208   :  { %10321 = vst [vmem:[#allocation68_spill] sm:$0xff] %v8622_v3  ;;  %v8624_v29 = vadd.f32 %v1990_v45, %v1481_v61  ;;  %v7335_v45 = vld [vmem:[%s10206_s0 + $0x5e4] sm:$0xf0]  ;;  %v7208_v61 = vld [vmem:[%s10206_s0 + $0x1f4] sm:$0xf] }
 0x209   :  { %v5789_v18 = vor.u32 %v7335_v45, %v5788_v32  ;;  %v5289_v60 = vor.u32 %v7208_v61, %v5286_v6  ;;  %v7211_v32 = vld [vmem:[%s10206_s0 + $0x204] sm:$0xf0]  ;;  %v5796_v45 = vld [vmem:[%s10206_s0 + $0x5f0] sm:$0xf]  ;;  %v7336_v61 = vld [vmem:[%s10206_s0 + $0x5f4] sm:$0xf] }
 0x20a   :  { %10322 = vst [vmem:[#allocation69_spill] sm:$0xff] %v8624_v29  ;;  %v5798_v6 = vld [vmem:[%s10206_s0 + $0x5f8] sm:$0xf0] }
 0x20c   :  { %v1796_v7 = vpop.f32.mrf.mxu3 }
 0x20d   :  { %v2305_v16 = vpop.f32.mrf.mxu2 }
 0x20e   :  { %v8653_v21 = vadd.f32 %v2305_v16, %v1796_v7  ;;  %v1484_v59 = vpop.f32.mrf.mxu0  ;;  %v5293_v7 = vor.u32 %v7211_v32, %v5292_v35  ;;  %v5300_v32 = vld [vmem:[%s10206_s0 + $0x210] sm:$0xf] }
 0x20f   :  { %v1993_v58 = vpop.f32.mrf.mxu1 }
 0x210   :  { %10323 = vst [vmem:[#allocation70_spill] sm:$0xff] %v8653_v21  ;;  %v8655_v20 = vadd.f32 %v1993_v58, %v1484_v59 }
 0x211   :  { %1523 = vmatmul.bf16.gmra.mxu0 %v5285_v11  ;;  %1838 = vmatmul.bf16.gmra.mxu3 %v5789_v18 }
 0x212   :  { %10324 = vst [vmem:[#allocation71_spill] sm:$0xff] %v8655_v20  ;;  %2032 = vmatmul.bf16.gmra.mxu1 %v5289_v60  ;;  %2347 = vmatmul.bf16.gmra.mxu2 %v5793_v2  ;;  %v5801_v60 = vor.u32 %v7336_v61, %v5798_v6 }
 0x214   :  { %v1799_v47 = vpop.f32.mrf.mxu3 }
 0x215   :  { %v2308_v3 = vpop.f32.mrf.mxu2 }
 0x216   :  { %v8657_v42 = vadd.f32 %v2308_v3, %v1799_v47  ;;  %v1486_v29 = vpop.f32.mrf.mxu0  ;;  %v7337_v3 = vld [vmem:[%s10206_s0 + $0x5f4] sm:$0xf0] }
 0x217   :  { %v1995_v39 = vpop.f32.mrf.mxu1  ;;  %v5797_v16 = vor.u32 %v7337_v3, %v5796_v45  ;;  %v7213_v45 = vld [vmem:[%s10206_s0 + $0x214] sm:$0xf0]  ;;  %v5804_v3 = vld [vmem:[%s10206_s0 + $0x600] sm:$0xf] }
 0x218   :  { %10325 = vst [vmem:[#allocation72_spill] sm:$0xff] %v8657_v42  ;;  %v8659_v31 = vadd.f32 %v1995_v39, %v1486_v29  ;;  %v7210_v39 = vld [vmem:[%s10206_s0 + $0x204] sm:$0xf]  ;;  %v5294_v29 = vld [vmem:[%s10206_s0 + $0x208] sm:$0xf0] }
 0x219   :  { %v5297_v59 = vor.u32 %v7210_v39, %v5294_v29  ;;  %v7338_v39 = vld [vmem:[%s10206_s0 + $0x604] sm:$0xf]  ;;  %v5806_v29 = vld [vmem:[%s10206_s0 + $0x608] sm:$0xf0] }
 0x21a   :  { %10326 = vst [vmem:[#allocation73_spill] sm:$0xff] %v8659_v31 }
 0x21c   :  { %v1801_v0 = vpop.f32.mrf.mxu3 }
 0x21d   :  { %v2310_v10 = vpop.f32.mrf.mxu2 }
 0x21e   :  { %v8685_v11 = vadd.f32 %v2310_v10, %v1801_v0  ;;  %v1489_v18 = vpop.f32.mrf.mxu0  ;;  %v5301_v0 = vor.u32 %v7213_v45, %v5300_v32 }
 0x21f   :  { %v1998_v2 = vpop.f32.mrf.mxu1 }
 0x220   :  { %10327 = vst [vmem:[#allocation74_spill] sm:$0xff] %v8685_v11  ;;  %v8687_v58 = vadd.f32 %v1998_v2, %v1489_v18 }
 0x221   :  { %1528 = vmatmul.bf16.gmra.mxu0 %v5293_v7  ;;  %1843 = vmatmul.bf16.gmra.mxu3 %v5797_v16 }
 0x222   :  { %10328 = vst [vmem:[#allocation75_spill] sm:$0xff] %v8687_v58  ;;  %2037 = vmatmul.bf16.gmra.mxu1 %v5297_v59  ;;  %2352 = vmatmul.bf16.gmra.mxu2 %v5801_v60  ;;  %v5809_v59 = vor.u32 %v7338_v39, %v5806_v29  ;;  %v7214_v29 = vld [vmem:[%s10206_s0 + $0x224] sm:$0xf] }
 0x224   :  { %v1804_v47 = vpop.f32.mrf.mxu3 }
 0x225   :  { %v2313_v42 = vpop.f32.mrf.mxu2 }
 0x226   :  { %v8689_v21 = vadd.f32 %v2313_v42, %v1804_v47  ;;  %v1491_v31 = vpop.f32.mrf.mxu0  ;;  %v7339_v42 = vld [vmem:[%s10206_s0 + $0x604] sm:$0xf0] }
 0x227   :  { %v2000_v20 = vpop.f32.mrf.mxu1  ;;  %v5805_v10 = vor.u32 %v7339_v42, %v5804_v3 }
 0x228   :  { %10329 = vst [vmem:[#allocation76_spill] sm:$0xff] %v8689_v21  ;;  %v8691_v35 = vadd.f32 %v2000_v20, %v1491_v31  ;;  %v7212_v20 = vld [vmem:[%s10206_s0 + $0x214] sm:$0xf]  ;;  %v5302_v31 = vld [vmem:[%s10206_s0 + $0x218] sm:$0xf0] }
 0x229   :  { %v5305_v18 = vor.u32 %v7212_v20, %v5302_v31  ;;  %v5308_v20 = vld [vmem:[%s10206_s0 + $0x220] sm:$0xf]  ;;  %v7215_v31 = vld [vmem:[%s10206_s0 + $0x224] sm:$0xf0] }
 0x22a   :  { %10330 = vst [vmem:[#allocation77_spill] sm:$0xff] %v8691_v35 }
 0x22c   :  { %v1806_v61 = vpop.f32.mrf.mxu3 }
 0x22d   :  { %v2315_v6 = vpop.f32.mrf.mxu2 }
 0x22e   :  { %v8717_v7 = vadd.f32 %v2315_v6, %v1806_v61  ;;  %v1494_v16 = vpop.f32.mrf.mxu0  ;;  %v5310_v61 = vld [vmem:[%s10206_s0 + $0x228] sm:$0xf0]  ;;  %v7340_v6 = vld [vmem:[%s10206_s0 + $0x614] sm:$0xf] }
 0x22f   :  { %v2003_v60 = vpop.f32.mrf.mxu1 }
 0x230   :  { %10331 = vst [vmem:[#allocation78_spill] sm:$0xff] %v8717_v7  ;;  %v8719_v2 = vadd.f32 %v2003_v60, %v1494_v16 }
 0x231   :  { %1533 = vmatmul.bf16.gmra.mxu0 %v5301_v0  ;;  %1848 = vmatmul.bf16.gmra.mxu3 %v5805_v10  ;;  %v5814_v0 = vld [vmem:[%s10206_s0 + $0x618] sm:$0xf0] }
 0x232   :  { %10332 = vst [vmem:[#allocation79_spill] sm:$0xff] %v8719_v2  ;;  %2042 = vmatmul.bf16.gmra.mxu1 %v5305_v18  ;;  %2357 = vmatmul.bf16.gmra.mxu2 %v5809_v59  ;;  %v5309_v18 = vor.u32 %v7215_v31, %v5308_v20 }
 0x234   :  { %v1809_v21 = vpop.f32.mrf.mxu3 }
 0x235   :  { %v2318_v11 = vpop.f32.mrf.mxu2 }
 0x236   :  { %v8723_v35 = vadd.f32 %v2318_v11, %v1809_v21  ;;  %v1496_v32 = vpop.f32.mrf.mxu0  ;;  %v5812_v21 = vld [vmem:[%s10206_s0 + $0x610] sm:$0xf]  ;;  %v7341_v11 = vld [vmem:[%s10206_s0 + $0x614] sm:$0xf0] }
 0x237   :  { %v2005_v45 = vpop.f32.mrf.mxu1  ;;  %v5813_v59 = vor.u32 %v7341_v11, %v5812_v21  ;;  %v5316_v11 = vld [vmem:[%s10206_s0 + $0x230] sm:$0xf] }
 0x238   :  { %v8727_v42 = vadd.f32 %v2005_v45, %v1496_v32  ;;  %v5313_v32 = vor.u32 %v7214_v29, %v5310_v61  ;;  %v5817_v45 = vor.u32 %v7340_v6, %v5814_v0  ;;  %v7343_v29 = vld [vmem:[%s10206_s0 + $0x624] sm:$0xf0]  ;;  %v7216_v61 = vld [vmem:[%s10206_s0 + $0x234] sm:$0xf]  ;;  %v5318_v6 = vld [vmem:[%s10206_s0 + $0x238] sm:$0xf0] }
 0x239   :  { %v7342_v0 = vld [vmem:[%s10206_s0 + $0x624] sm:$0xf] }
 0x23a   :  { %10333 = vst [vmem:[#allocation80_spill] sm:$0xff] %v8727_v42 }
 0x23c   :  { %v8755_v10 = vpop.f32.mrf.mxu3 }
 0x23d   :  { %v8757_v16 = vpop.f32.mrf.mxu2 }
 0x23e   :  { %v1499_v60 = vpop.f32.mrf.mxu0 }
 0x23f   :  { %v2008_v39 = vpop.f32.mrf.mxu1 }
 0x240   :  { %v8759_v47 = vadd.f32 %v2008_v39, %v1499_v60  ;;  %v7376_v39 = vld [vmem:[%s10207_s3 + $0x70] sm:$0xff] }
 0x241   :  { %1538 = vmatmul.bf16.gmra.mxu0 %v5309_v18  ;;  %1853 = vmatmul.bf16.gmra.mxu3 %v5813_v59  ;;  %v5822_v18 = vld [vmem:[%s10206_s0 + $0x628] sm:$0xf0] }
 0x242   :  { %10334 = vst [vmem:[#allocation81_spill] sm:$0xff] %v8759_v47  ;;  %2047 = vmatmul.bf16.gmra.mxu1 %v5313_v32  ;;  %2362 = vmatmul.bf16.gmra.mxu2 %v5817_v45 }
 0x243   :  { %2770 = vmatpush.bf16.msrb.mxu2 %v7376_v39  ;;  %v5321_v39 = vor.u32 %v7216_v61, %v5318_v6  ;;  %v7219_v6 = vld [vmem:[%s10206_s0 + $0x244] sm:$0xf0] }
 0x244   :  { %v1814_v7 = vpop.f32.mrf.mxu3 }
 0x245   :  { %v2323_v42 = vpop.f32.mrf.mxu2 }
 0x246   :  { %v8763_v4 = vadd.f32 %v2323_v42, %v1814_v7  ;;  %v1501_v2 = vpop.f32.mrf.mxu0  ;;  %v7217_v7 = vld [vmem:[%s10206_s0 + $0x234] sm:$0xf0]  ;;  %v5825_v42 = vor.u32 %v7342_v0, %v5822_v18  ;;  %v7218_v18 = vld [vmem:[%s10206_s0 + $0x244] sm:$0xf] }
 0x247   :  { %v2010_v20 = vpop.f32.mrf.mxu1  ;;  %v5317_v32 = vor.u32 %v7217_v7, %v5316_v11  ;;  %v7345_v0 = vld [vmem:[%s10206_s0 + $0x634] sm:$0xf0]  ;;  %2771 = vmatpush.bf16.msrb.mxu2 %v7375_v15  ;;  %v7227_v15 = vld [vmem:[%s10206_s0 + $0x284] sm:$0xf0] }
 0x248   :  { %v8767_v21 = vadd.f32 %v2010_v20, %v1501_v2  ;;  %v5820_v2 = vld [vmem:[%s10206_s0 + $0x620] sm:$0xf] }
 0x249   :  { %v5821_v45 = vor.u32 %v7343_v29, %v5820_v2 }
 0x24a   :  { %10335 = vst [vmem:[#allocation82_spill] sm:$0xff] %v8767_v21 }
 0x24c   :  { %v8798_v59 = vpop.f32.mrf.mxu3 }
 0x24d   :  { %v8800_v60 = vpop.f32.mrf.mxu2 }
 0x24e   :  { %v1504_v20 = vpop.f32.mrf.mxu0 }
 0x24f   :  { %v2013_v3 = vpop.f32.mrf.mxu1 }
 0x250   :  { %v8802_v31 = vadd.f32 %v2013_v3, %v1504_v20  ;;  %v5830_v20 = vld [vmem:[%s10206_s0 + $0x638] sm:$0xf0] }
 0x251   :  { %1543 = vmatmul.bf16.gmra.mxu0 %v5317_v32  ;;  %1858 = vmatmul.bf16.gmra.mxu3 %v5821_v45  ;;  %v5326_v32 = vld [vmem:[%s10206_s0 + $0x248] sm:$0xf0]  ;;  %v7344_v45 = vld [vmem:[%s10206_s0 + $0x634] sm:$0xf] }
 0x252   :  { %10336 = vst [vmem:[#allocation83_spill] sm:$0xff] %v8802_v31  ;;  %2052 = vmatmul.bf16.gmra.mxu1 %v5321_v39  ;;  %2367 = vmatmul.bf16.gmra.mxu2 %v5825_v42  ;;  %v5324_v42 = vld [vmem:[%s10206_s0 + $0x240] sm:$0xf]  ;;  %v5329_v21 = vor.u32 %v7218_v18, %v5326_v32  ;;  %v5833_v3 = vor.u32 %v7344_v45, %v5830_v20 }
 0x254   :  { %v1819_v47 = vpop.f32.mrf.mxu3 }
 0x255   :  { %v2328_v11 = vpop.f32.mrf.mxu2 }
 0x256   :  { %v8809_v7 = vadd.f32 %v2328_v11, %v1819_v47  ;;  %v1506_v2 = vpop.f32.mrf.mxu0  ;;  %v5828_v47 = vld [vmem:[%s10206_s0 + $0x630] sm:$0xf] }
 0x257   :  { %v2015_v29 = vpop.f32.mrf.mxu1 }
 0x258   :  { %v8813_v61 = vadd.f32 %v2015_v29, %v1506_v2  ;;  %v5325_v2 = vor.u32 %v7219_v6, %v5324_v42  ;;  %v5829_v29 = vor.u32 %v7345_v0, %v5828_v47 }
 0x25a   :  { %10337 = vst [vmem:[#allocation84_spill] sm:$0xff] %v8813_v61 }
 0x25c   :  { %v8841_v39 = vpop.f32.mrf.mxu3 }
 0x25d   :  { %v8843_v11 = vpop.f32.mrf.mxu2 }
 0x25e   :  { %v1509_v28 = vpop.f32.mrf.mxu0 }
 0x25f   :  { %v2018_v61 = vpop.f32.mrf.mxu1 }
 0x260   :  { %v8845_v52 = vadd.f32 %v2018_v61, %v1509_v28  ;;  %v5332_v28 = vld [vmem:[%s10206_s0 + $0x250] sm:$0xf] }
 0x261   :  { %1548 = vmatmul.bf16.gmra.mxu0 %v5325_v2  ;;  %1863 = vmatmul.bf16.gmra.mxu3 %v5829_v29 }
 0x262   :  { %2057 = vmatmul.bf16.gmra.mxu1 %v5329_v21  ;;  %2372 = vmatmul.bf16.gmra.mxu2 %v5833_v3  ;;  %v7221_v21 = vld [vmem:[%s10206_s0 + $0x254] sm:$0xf0] }
 0x263   :  { %v5333_v0 = vor.u32 %v7221_v21, %v5332_v28 }
 0x264   :  { %v1824_v46 = vpop.f32.mrf.mxu3 }
 0x265   :  { %v2333_v22 = vpop.f32.mrf.mxu2 }
 0x266   :  { %v8849_v62 = vadd.f32 %v2333_v22, %v1824_v46  ;;  %v1511_v58 = vpop.f32.mrf.mxu0  ;;  %v7220_v22 = vld [vmem:[%s10206_s0 + $0x254] sm:$0xf]  ;;  %v5334_v46 = vld [vmem:[%s10206_s0 + $0x258] sm:$0xf0] }
 0x267   :  { %v2020_v42 = vpop.f32.mrf.mxu1  ;;  %v5337_v32 = vor.u32 %v7220_v22, %v5334_v46  ;;  %v5340_v22 = vld [vmem:[%s10206_s0 + $0x260] sm:$0xf]  ;;  %v7223_v46 = vld [vmem:[%s10206_s0 + $0x264] sm:$0xf0] }
 0x268   :  { %v8853_v47 = vadd.f32 %v2020_v42, %v1511_v58 }
 0x26a   :  { %10338 = vst [vmem:[#allocation85_spill] sm:$0xff] %v8853_v47 }
 0x26c   :  { %v8869_v58 = vpop.f32.mrf.mxu3 }
 0x26d   :  { %v8871_v3 = vpop.f32.mrf.mxu2 }
 0x26e   :  { %v1514_v18 = vpop.f32.mrf.mxu0 }
 0x26f   :  { %v2023_v45 = vpop.f32.mrf.mxu1 }
 0x270   :  { %v8873_v20 = vadd.f32 %v2023_v45, %v1514_v18 }
 0x271   :  { %1553 = vmatmul.bf16.gmra.mxu0 %v5333_v0  ;;  %v7222_v0 = vld [vmem:[%s10206_s0 + $0x264] sm:$0xf] }
 0x272   :  { %10339 = vst [vmem:[#allocation86_spill] sm:$0xff] %v8873_v20  ;;  %2062 = vmatmul.bf16.gmra.mxu1 %v5337_v32  ;;  %v5341_v32 = vor.u32 %v7223_v46, %v5340_v22 }
 0x274   :  { %v1829_v29 = vpop.f32.mrf.mxu3 }
 0x275   :  { %v2338_v42 = vpop.f32.mrf.mxu2 }
 0x276   :  { %v8877_v61 = vadd.f32 %v2338_v42, %v1829_v29  ;;  %v1516_v31 = vpop.f32.mrf.mxu0 }
 0x277   :  { %v2025_v6 = vpop.f32.mrf.mxu1 }
 0x278   :  { %v8881_v28 = vadd.f32 %v2025_v6, %v1516_v31  ;;  %v5342_v31 = vld [vmem:[%s10206_s0 + $0x268] sm:$0xf0] }
 0x279   :  { %v5345_v29 = vor.u32 %v7222_v0, %v5342_v31  ;;  %v5348_v0 = vld [vmem:[%s10206_s0 + $0x270] sm:$0xf]  ;;  %v7225_v31 = vld [vmem:[%s10206_s0 + $0x274] sm:$0xf0] }
 0x27a   :  { %10340 = vst [vmem:[#allocation87_spill] sm:$0xff] %v8881_v28 }
 0x27c   :  { %v8897_v6 = vpop.f32.mrf.mxu3 }
 0x27d   :  { %v8899_v18 = vpop.f32.mrf.mxu2 }
 0x27e   :  { %v1519_v45 = vpop.f32.mrf.mxu0 }
 0x27f   :  { %v2028_v42 = vpop.f32.mrf.mxu1 }
 0x280   :  { %v8901_v21 = vadd.f32 %v2028_v42, %v1519_v45 }
 0x281   :  { %1558 = vmatmul.bf16.gmra.mxu0 %v5341_v32  ;;  %v5349_v32 = vor.u32 %v7225_v31, %v5348_v0 }
 0x282   :  { %10341 = vst [vmem:[#allocation88_spill] sm:$0xff] %v8901_v21  ;;  %2067 = vmatmul.bf16.gmra.mxu1 %v5345_v29 }
 0x284   :  { %v1834_v47 = vpop.f32.mrf.mxu3 }
 0x285   :  { %v2343_v28 = vpop.f32.mrf.mxu2 }
 0x286   :  { %v8905_v44 = vadd.f32 %v2343_v28, %v1834_v47  ;;  %v1521_v20 = vpop.f32.mrf.mxu0  ;;  %v7224_v47 = vld [vmem:[%s10206_s0 + $0x274] sm:$0xf] }
 0x287   :  { %v2030_v37 = vpop.f32.mrf.mxu1 }
 0x288   :  { %v8909_v22 = vadd.f32 %v2030_v37, %v1521_v20  ;;  %v5350_v37 = vld [vmem:[%s10206_s0 + $0x278] sm:$0xf0] }
 0x289   :  { %v5353_v29 = vor.u32 %v7224_v47, %v5350_v37 }
 0x28a   :  { %10342 = vst [vmem:[#allocation89_spill] sm:$0xff] %v8909_v22 }
 0x28c   :  { %v8925_v20 = vpop.f32.mrf.mxu3 }
 0x28d   :  { %v8927_v28 = vpop.f32.mrf.mxu2 }
 0x28e   :  { %v1524_v45 = vpop.f32.mrf.mxu0 }
 0x28f   :  { %v2033_v42 = vpop.f32.mrf.mxu1 }
 0x290   :  { %v8929_v46 = vadd.f32 %v2033_v42, %v1524_v45  ;;  %v5356_v45 = vld [vmem:[%s10206_s0 + $0x280] sm:$0xf] }
 0x291   :  { %1563 = vmatmul.bf16.gmra.mxu0 %v5349_v32 }
 0x292   :  { %10343 = vst [vmem:[#allocation90_spill] sm:$0xff] %v8929_v46  ;;  %2072 = vmatmul.bf16.gmra.mxu1 %v5353_v29 }
 0x294   :  { %v1839_v22 = vpop.f32.mrf.mxu3 }
 0x295   :  { %v2348_v13 = vpop.f32.mrf.mxu2 }
 0x296   :  { %v8936_v21 = vadd.f32 %v2348_v13, %v1839_v22  ;;  %v1526_v0 = vpop.f32.mrf.mxu0  ;;  %v7226_v13 = vld [vmem:[%s10206_s0 + $0x284] sm:$0xf]  ;;  %v5358_v22 = vld [vmem:[%s10206_s0 + $0x288] sm:$0xf0] }
 0x297   :  { %v2035_v31 = vpop.f32.mrf.mxu1  ;;  %v5361_v32 = vor.u32 %v7226_v13, %v5358_v22 }
 0x298   :  { %v8940_v37 = vadd.f32 %v2035_v31, %v1526_v0  ;;  %v5357_v0 = vor.u32 %v7227_v15, %v5356_v45 }
 0x29a   :  { %10344 = vst [vmem:[#allocation91_spill] sm:$0xff] %v8940_v37  ;;  %v7367_v37 = vld [vmem:[%s10207_s3 + $0x28] sm:$0xff] }
 0x29b   :  { %2839 = vmatpush.bf16.msrb.mxu3 %v7367_v37  ;;  %v7229_v37 = vld [vmem:[%s10206_s0 + $0x294] sm:$0xf0] }
 0x29c   :  { %v8956_v29 = vpop.f32.mrf.mxu3 }
 0x29d   :  { %v8958_v42 = vpop.f32.mrf.mxu2 }
 0x29e   :  { %v1529_v31 = vpop.f32.mrf.mxu0 }
 0x29f   :  { %v2038_v2 = vpop.f32.mrf.mxu1 }
 0x2a0   :  { %v8960_v47 = vadd.f32 %v2038_v2, %v1529_v31 }
 0x2a1   :  { %1568 = vmatmul.bf16.gmra.mxu0 %v5357_v0  ;;  %v5364_v0 = vld [vmem:[%s10206_s0 + $0x290] sm:$0xf] }
 0x2a2   :  { %10345 = vst [vmem:[#allocation92_spill] sm:$0xff] %v8960_v47  ;;  %2077 = vmatmul.bf16.gmra.mxu1 %v5361_v32  ;;  %v5365_v32 = vor.u32 %v7229_v37, %v5364_v0  ;;  %v5372_v0 = vld [vmem:[%s10206_s0 + $0x2a0] sm:$0xf]  ;;  %v7231_v37 = vld [vmem:[%s10206_s0 + $0x2a4] sm:$0xf0] }
 0x2a4   :  { %v1844_v46 = vpop.f32.mrf.mxu3 }
 0x2a5   :  { %v2353_v38 = vpop.f32.mrf.mxu2 }
 0x2a6   :  { %v8967_v5 = vadd.f32 %v2353_v38, %v1844_v46  ;;  %v1531_v45 = vpop.f32.mrf.mxu0  ;;  %v7228_v38 = vld [vmem:[%s10206_s0 + $0x294] sm:$0xf]  ;;  %v5366_v46 = vld [vmem:[%s10206_s0 + $0x298] sm:$0xf0] }
 0x2a7   :  { %v2040_v15 = vpop.f32.mrf.mxu1 }
 0x2a8   :  { %v8971_v13 = vadd.f32 %v2040_v15, %v1531_v45  ;;  %v5369_v45 = vor.u32 %v7228_v38, %v5366_v46  ;;  %v7230_v38 = vld [vmem:[%s10206_s0 + $0x2a4] sm:$0xf] }
 0x2aa   :  { %10346 = vst [vmem:[#allocation93_spill] sm:$0xff] %v8971_v13 }
 0x2ae   :  { %v1534_v31 = vpop.f32.mrf.mxu0 }
 0x2af   :  { %v2043_v15 = vpop.f32.mrf.mxu1 }
 0x2b0   :  { %v8987_v22 = vadd.f32 %v2043_v15, %v1534_v31 }
 0x2b1   :  { %1573 = vmatmul.bf16.gmra.mxu0 %v5365_v32 }
 0x2b2   :  { %2082 = vmatmul.bf16.gmra.mxu1 %v5369_v45 }
 0x2b6   :  { %v1536_v2 = vpop.f32.mrf.mxu0 }
 0x2b7   :  { %v2045_v13 = vpop.f32.mrf.mxu1 }
 0x2b8   :  { %v8991_v23 = vadd.f32 %v2045_v13, %v1536_v2  ;;  %v5374_v2 = vld [vmem:[%s10206_s0 + $0x2a8] sm:$0xf0]  ;;  %v5373_v13 = vor.u32 %v7231_v37, %v5372_v0  ;;  %v5380_v0 = vld [vmem:[%s10206_s0 + $0x2b0] sm:$0xf]  ;;  %v7233_v37 = vld [vmem:[%s10206_s0 + $0x2b4] sm:$0xf0] }
 0x2b9   :  { %v5377_v32 = vor.u32 %v7230_v38, %v5374_v2  ;;  %v7232_v38 = vld [vmem:[%s10206_s0 + $0x2b4] sm:$0xf] }
 0x2ba   :  { %10347 = vst [vmem:[#allocation94_spill] sm:$0xff] %v8991_v23 }
 0x2be   :  { %v1539_v46 = vpop.f32.mrf.mxu0 }
 0x2bf   :  { %v2048_v31 = vpop.f32.mrf.mxu1 }
 0x2c0   :  { %v9007_v45 = vadd.f32 %v2048_v31, %v1539_v46 }
 0x2c1   :  { %1578 = vmatmul.bf16.gmra.mxu0 %v5373_v13 }
 0x2c2   :  { %2087 = vmatmul.bf16.gmra.mxu1 %v5377_v32 }
 0x2c6   :  { %v1541_v47 = vpop.f32.mrf.mxu0 }
 0x2c7   :  { %v2050_v48 = vpop.f32.mrf.mxu1 }
 0x2c8   :  { %v9011_v23 = vadd.f32 %v2050_v48, %v1541_v47  ;;  %v5382_v48 = vld [vmem:[%s10206_s0 + $0x2b8] sm:$0xf0]  ;;  %v5381_v47 = vor.u32 %v7233_v37, %v5380_v0  ;;  %v5388_v0 = vld [vmem:[%s10206_s0 + $0x2c0] sm:$0xf]  ;;  %v7235_v37 = vld [vmem:[%s10206_s0 + $0x2c4] sm:$0xf0] }
 0x2c9   :  { %v5385_v13 = vor.u32 %v7232_v38, %v5382_v48  ;;  %v7374_v38 = vld [vmem:[%s10207_s3 + $0x60] sm:$0xff]  ;;  %v5389_v48 = vor.u32 %v7235_v37, %v5388_v0  ;;  %v5396_v0 = vld [vmem:[%s10206_s0 + $0x2d0] sm:$0xf]  ;;  %v7237_v37 = vld [vmem:[%s10206_s0 + $0x2d4] sm:$0xf0] }
 0x2ca   :  { %10348 = vst [vmem:[#allocation95_spill] sm:$0xff] %v9011_v23  ;;  %2772 = vmatpush.bf16.msrb.mxu2 %v7374_v38  ;;  %v7236_v38 = vld [vmem:[%s10206_s0 + $0x2d4] sm:$0xf] }
 0x2ce   :  { %v1544_v2 = vpop.f32.mrf.mxu0 }
 0x2cf   :  { %v2053_v46 = vpop.f32.mrf.mxu1 }
 0x2d0   :  { %v9027_v32 = vadd.f32 %v2053_v46, %v1544_v2 }
 0x2d1   :  { %1583 = vmatmul.bf16.gmra.mxu0 %v5381_v47 }
 0x2d2   :  { %10349 = vst [vmem:[#allocation96_spill] sm:$0xff] %v9027_v32  ;;  %2092 = vmatmul.bf16.gmra.mxu1 %v5385_v13  ;;  %v7366_v32 = vld [vmem:[%s10207_s3 + $0x20] sm:$0xff] }
 0x2d3   :  { %2840 = vmatpush.bf16.msrb.mxu3 %v7366_v32 }
 0x2d6   :  { %v1546_v63 = vpop.f32.mrf.mxu0 }
 0x2d7   :  { %v2055_v15 = vpop.f32.mrf.mxu1 }
 0x2d8   :  { %v9031_v23 = vadd.f32 %v2055_v15, %v1546_v63  ;;  %v7234_v63 = vld [vmem:[%s10206_s0 + $0x2c4] sm:$0xf]  ;;  %v5390_v15 = vld [vmem:[%s10206_s0 + $0x2c8] sm:$0xf0] }
 0x2d9   :  { %v5393_v2 = vor.u32 %v7234_v63, %v5390_v15 }
 0x2da   :  { %10350 = vst [vmem:[#allocation97_spill] sm:$0xff] %v9031_v23 }
 0x2de   :  { %v1549_v47 = vpop.f32.mrf.mxu0 }
 0x2df   :  { %v2058_v13 = vpop.f32.mrf.mxu1 }
 0x2e0   :  { %v9050_v46 = vadd.f32 %v2058_v13, %v1549_v47 }
 0x2e1   :  { %1588 = vmatmul.bf16.gmra.mxu0 %v5389_v48 }
 0x2e2   :  { %2097 = vmatmul.bf16.gmra.mxu1 %v5393_v2 }
 0x2e6   :  { %v1551_v31 = vpop.f32.mrf.mxu0 }
 0x2e7   :  { %v2060_v23 = vpop.f32.mrf.mxu1 }
 0x2e8   :  { %v9054_v50 = vadd.f32 %v2060_v23, %v1551_v31  ;;  %v5398_v23 = vld [vmem:[%s10206_s0 + $0x2d8] sm:$0xf0]  ;;  %v5397_v31 = vor.u32 %v7237_v37, %v5396_v0  ;;  %v5404_v37 = vld [vmem:[%s10206_s0 + $0x2e0] sm:$0xf]  ;;  %v10354_v0 = vmax.f32 %v7915_v1, %v8723_v35  ;;  %v5412_v1 = vld [vmem:[%s10206_s0 + $0x2f0] sm:$0xf] }
 0x2e9   :  { %v5401_v15 = vor.u32 %v7236_v38, %v5398_v23  ;;  %v7239_v38 = vld [vmem:[%s10206_s0 + $0x2e4] sm:$0xf0]  ;;  %v7238_v23 = vld [vmem:[%s10206_s0 + $0x2e4] sm:$0xf]  ;;  %v7241_v35 = vld [vmem:[%s10206_s0 + $0x2f4] sm:$0xf0] }
 0x2ea   :  { %10351 = vst [vmem:[#allocation98_spill] sm:$0xff] %v9054_v50  ;;  %v5405_v32 = vor.u32 %v7239_v38, %v5404_v37  ;;  %v2321_v37 = vadd.f32 %v8757_v16, %v8755_v10  ;;  %v7240_v10 = vld [vmem:[%s10206_s0 + $0x2f4] sm:$0xf]  ;;  %v5414_v16 = vld [vmem:[%s10206_s0 + $0x2f8] sm:$0xf0] }
 0x2ee   :  { %v1554_v63 = vpop.f32.mrf.mxu0 }
 0x2ef   :  { %v2063_v48 = vpop.f32.mrf.mxu1 }
 0x2f0   :  { %v9070_v47 = vadd.f32 %v2063_v48, %v1554_v63 }
 0x2f1   :  { %1593 = vmatmul.bf16.gmra.mxu0 %v5397_v31 }
 0x2f2   :  { %10352 = vst [vmem:[#allocation99_spill] sm:$0xff] %v9070_v47  ;;  %2102 = vmatmul.bf16.gmra.mxu1 %v5401_v15 }
 0x2f6   :  { %v1556_v13 = vpop.f32.mrf.mxu0 }
 0x2f7   :  { %v2065_v53 = vpop.f32.mrf.mxu1 }
 0x2f8   :  { %v9077_v50 = vadd.f32 %v2065_v53, %v1556_v13  ;;  %v5406_v53 = vld [vmem:[%s10206_s0 + $0x2e8] sm:$0xf0] }
 0x2f9   :  { %v5409_v63 = vor.u32 %v7238_v23, %v5406_v53 }
 0x2fa   :  { %10353 = vst [vmem:[#allocation100_spill] sm:$0xff] %v9077_v50  ;;  %v9100_v50 = vld [vmem:[%s10208_s2] ss:$0 sm:$0xff] }
 0x2fe   :  { %v1559_v31 = vpop.f32.mrf.mxu0 }
 0x2ff   :  { %v2068_v15 = vpop.f32.mrf.mxu1 }
 0x300   :  { %v2069_v48 = vadd.f32 %v2068_v15, %v1559_v31  ;;  %v5417_v15 = vor.u32 %v7240_v10, %v5414_v16 }
 0x301   :  { %1598 = vmatmul.bf16.gmra.mxu0 %v5405_v32 }
 0x302   :  { %v2404_v13 = vmax.f32 %v8329_v27, %v2069_v48  ;;  %2107 = vmatmul.bf16.gmra.mxu1 %v5409_v63  ;;  %v2455_v27 = vmax.f32 %v7943_v17, %v2321_v37 }
 0x304   :  { %v2504_v2 = vmax.f32 %v2404_v13, %v10354_v0  ;;  %v5413_v0 = vor.u32 %v7241_v35, %v5412_v1 }
 0x306   :  { %v1561_v38 = vpop.f32.mrf.mxu0  ;;  %v2558_v53 = vadd.f32 %v9100_v50, %v2504_v2 }
 0x307   :  { %v2070_v23 = vpop.f32.mrf.mxu1 }
 0x308   :  { %v2071_v32 = vadd.f32 %v2070_v23, %v1561_v38  ;;  %v2608_v2 = vmax.f32 %v2558_v53, 0.0  ;;  %v10355_v53 = vmax.f32 %v7947_v25, %v8763_v4  ;;  %v7243_v4 = vld [vmem:[%s10206_s0 + $0x304] sm:$0xf0]  ;;  %v7242_v25 = vld [vmem:[%s10206_s0 + $0x304] sm:$0xf] }
 0x30a   :  { %v2405_v31 = vmax.f32 %v8333_v56, %v2071_v32  ;;  %v2658_v13 = vpack.c.bf16 %v2608_v2, %v2608_v2 }
 0x30c   :  { %v2505_v17 = vmax.f32 %v2405_v31, %v2455_v27  ;;  %v3827_v54 = vunpack.c.l.b16 %v2658_v13  ;;  %v2326_v31 = vadd.f32 %v8800_v60, %v8798_v59 }
 0x30e   :  { %v2559_v56 = vadd.f32 %v9100_v50, %v2505_v17  ;;  %v1564_v63 = vpop.f32.mrf.mxu0  ;;  %v2457_v17 = vmax.f32 %v7975_v41, %v2326_v31  ;;  %v2331_v31 = vadd.f32 %v8843_v11, %v8841_v39  ;;  %v5430_v39 = vld [vmem:[%s10206_s0 + $0x318] sm:$0xf0] }
 0x30f   :  { %v2073_v48 = vpop.f32.mrf.mxu1 }
 0x310   :  { %v2609_v37 = vmax.f32 %v2559_v56, 0.0  ;;  %v2074_v38 = vadd.f32 %v2073_v48, %v1564_v63 }
 0x311   :  { %1603 = vmatmul.bf16.gmra.mxu0 %v5413_v0  ;;  %v5420_v0 = vld [vmem:[%s10206_s0 + $0x300] sm:$0xf] }
 0x312   :  { %v2659_v23 = vpack.c.bf16 %v2609_v37, %v2609_v37  ;;  %v2406_v32 = vmax.f32 %v8361_v26, %v2074_v38  ;;  %2112 = vmatmul.bf16.gmra.mxu1 %v5417_v15  ;;  %v5421_v60 = vor.u32 %v7243_v4, %v5420_v0 }
 0x314   :  { %v3828_v47 = vunpack.c.l.b16 %v2659_v23  ;;  %v2506_v27 = vmax.f32 %v2406_v32, %v10355_v53  ;;  %v10356_v53 = vmax.f32 %v7979_v49, %v8809_v7  ;;  %v7245_v49 = vld [vmem:[%s10206_s0 + $0x314] sm:$0xf0]  ;;  %v7244_v7 = vld [vmem:[%s10206_s0 + $0x314] sm:$0xf] }
 0x316   :  { %v9126_v1 = vpack.c.b16 %v3828_v47, %v3827_v54  ;;  %v1566_v35 = vpop.f32.mrf.mxu0  ;;  %v2560_v16 = vadd.f32 %v9100_v50, %v2506_v27  ;;  %v5422_v54 = vld [vmem:[%s10206_s0 + $0x308] sm:$0xf0] }
 0x317   :  { %v2075_v10 = vpop.f32.mrf.mxu1  ;;  %v5425_v56 = vor.u32 %v7242_v25, %v5422_v54  ;;  %v5428_v25 = vld [vmem:[%s10206_s0 + $0x310] sm:$0xf] }
 0x318   :  { %v2076_v2 = vadd.f32 %v2075_v10, %v1566_v35  ;;  %v2610_v59 = vmax.f32 %v2560_v16, 0.0 }
 0x31a   :  { %v2407_v26 = vmax.f32 %v8365_v57, %v2076_v2  ;;  %v2660_v15 = vpack.c.bf16 %v2610_v59, %v2610_v59  ;;  %v7373_v59 = vld [vmem:[%s10207_s3 + $0x58] sm:$0xff] }
 0x31b   :  { %2773 = vmatpush.bf16.msrb.mxu2 %v7373_v59 }
 0x31c   :  { %v2507_v41 = vmax.f32 %v2407_v26, %v2457_v17  ;;  %v3914_v23 = vunpack.c.l.b16 %v2660_v15  ;;  %v10357_v26 = vld [vmem:[#allocation8_spill] sm:$0xff] }
 0x31d   :  { %v2459_v0 = vmax.f32 %v10357_v26, %v2331_v31  ;;  %v2336_v31 = vadd.f32 %v8871_v3, %v8869_v58  ;;  %v5438_v58 = vld [vmem:[%s10206_s0 + $0x328] sm:$0xf0] }
 0x31e   :  { %v2561_v57 = vadd.f32 %v9100_v50, %v2507_v41  ;;  %v1569_v47 = vpop.f32.mrf.mxu0  ;;  %v5429_v41 = vor.u32 %v7245_v49, %v5428_v25  ;;  %v5436_v49 = vld [vmem:[%s10206_s0 + $0x320] sm:$0xf] }
 0x31f   :  { %v2078_v63 = vpop.f32.mrf.mxu1 }
 0x320   :  { %v2611_v48 = vmax.f32 %v2561_v57, 0.0  ;;  %v2079_v13 = vadd.f32 %v2078_v63, %v1569_v47  ;;  %v5433_v47 = vor.u32 %v7244_v7, %v5430_v39  ;;  %v7365_v39 = vld [vmem:[%s10207_s3 + $0x18] sm:$0xff] }
 0x321   :  { %1608 = vmatmul.bf16.gmra.mxu0 %v5421_v60  ;;  %2841 = vmatpush.bf16.msrb.mxu3 %v7365_v39 }
 0x322   :  { %v2661_v37 = vpack.c.bf16 %v2611_v48, %v2611_v48  ;;  %v2408_v38 = vmax.f32 %v8393_v24, %v2079_v13  ;;  %2117 = vmatmul.bf16.gmra.mxu1 %v5425_v56  ;;  %v10358_v24 = vld [vmem:[#allocation41_spill] sm:$0xff] }
 0x324   :  { %v3915_v32 = vunpack.c.l.b16 %v2661_v37  ;;  %v2508_v27 = vmax.f32 %v2408_v38, %v10356_v53  ;;  %v10359_v37 = vld [vmem:[#allocation43_spill] sm:$0xff]  ;;  %v10360_v53 = vmax.f32 %v8011_v12, %v8849_v62  ;;  %v7246_v12 = vld [vmem:[%s10206_s0 + $0x324] sm:$0xf] }
 0x325   :  { %v7247_v62 = vld [vmem:[%s10206_s0 + $0x324] sm:$0xf0] }
 0x326   :  { %v9150_v35 = vpack.c.b16 %v3915_v32, %v3914_v23  ;;  %v1571_v10 = vpop.f32.mrf.mxu0  ;;  %v2562_v2 = vadd.f32 %v9100_v50, %v2508_v27 }
 0x327   :  { %v2080_v16 = vpop.f32.mrf.mxu1 }
 0x328   :  { %v2081_v17 = vadd.f32 %v2080_v16, %v1571_v10  ;;  %v2612_v11 = vmax.f32 %v2562_v2, 0.0 }
 0x32a   :  { %v2409_v4 = vmax.f32 %v10358_v24, %v2081_v17  ;;  %v2662_v63 = vpack.c.bf16 %v2612_v11, %v2612_v11  ;;  %v5437_v11 = vor.u32 %v7247_v62, %v5436_v49 }
 0x32c   :  { %v2509_v54 = vmax.f32 %v2409_v4, %v2459_v0  ;;  %v4001_v23 = vunpack.c.l.b16 %v2662_v63  ;;  %v10361_v0 = vld [vmem:[#allocation10_spill] sm:$0xff]  ;;  %v10362_v4 = vld [vmem:[#allocation45_spill] sm:$0xff] }
 0x32d   :  { %v2461_v24 = vmax.f32 %v10361_v0, %v2336_v31  ;;  %v10366_v0 = vld [vmem:[#allocation49_spill] sm:$0xff] }
 0x32e   :  { %v2563_v60 = vadd.f32 %v9100_v50, %v2509_v54  ;;  %v1574_v57 = vpop.f32.mrf.mxu0 }
 0x32f   :  { %v2083_v56 = vpop.f32.mrf.mxu1 }
 0x330   :  { %v2613_v15 = vmax.f32 %v2563_v60, 0.0  ;;  %v2084_v48 = vadd.f32 %v2083_v56, %v1574_v57 }
 0x331   :  { %1613 = vmatmul.bf16.gmra.mxu0 %v5429_v41  ;;  %v5441_v41 = vor.u32 %v7246_v12, %v5438_v58 }
 0x332   :  { %v2663_v13 = vpack.c.bf16 %v2613_v15, %v2613_v15  ;;  %v2410_v38 = vmax.f32 %v10359_v37, %v2084_v48  ;;  %2122 = vmatmul.bf16.gmra.mxu1 %v5433_v47  ;;  %v10363_v15 = vld [vmem:[#allocation47_spill] sm:$0xff] }
 0x334   :  { %v4002_v32 = vunpack.c.l.b16 %v2663_v13  ;;  %v2510_v27 = vmax.f32 %v2410_v38, %v10360_v53  ;;  %v10364_v38 = vmax.f32 %v8043_v40, %v8877_v61  ;;  %v7249_v40 = vld [vmem:[%s10206_s0 + $0x334] sm:$0xf0]  ;;  %v7248_v61 = vld [vmem:[%s10206_s0 + $0x334] sm:$0xf] }
 0x336   :  { %v9177_v10 = vpack.c.b16 %v4002_v32, %v4001_v23  ;;  %v1576_v16 = vpop.f32.mrf.mxu0  ;;  %v2564_v17 = vadd.f32 %v9100_v50, %v2510_v27  ;;  %v2341_v32 = vadd.f32 %v8899_v18, %v8897_v6  ;;  %v5446_v6 = vld [vmem:[%s10206_s0 + $0x338] sm:$0xf0] }
 0x337   :  { %v2085_v2 = vpop.f32.mrf.mxu1  ;;  %v5449_v58 = vor.u32 %v7248_v61, %v5446_v6 }
 0x338   :  { %v2086_v26 = vadd.f32 %v2085_v2, %v1576_v16  ;;  %v2614_v3 = vmax.f32 %v2564_v17, 0.0  ;;  %v10365_v17 = vld [vmem:[#allocation13_spill] sm:$0xff] }
 0x33a   :  { %v2411_v25 = vmax.f32 %v10362_v4, %v2086_v26  ;;  %v2664_v57 = vpack.c.bf16 %v2614_v3, %v2614_v3  ;;  %v2463_v26 = vmax.f32 %v10365_v17, %v2341_v32  ;;  %v5444_v4 = vld [vmem:[%s10206_s0 + $0x330] sm:$0xf] }
 0x33b   :  { %v5445_v49 = vor.u32 %v7249_v40, %v5444_v4 }
 0x33c   :  { %v2511_v7 = vmax.f32 %v2411_v25, %v2461_v24  ;;  %v4088_v13 = vunpack.c.l.b16 %v2664_v57 }
 0x33e   :  { %v2565_v54 = vadd.f32 %v9100_v50, %v2511_v7  ;;  %v1579_v59 = vpop.f32.mrf.mxu0 }
 0x33f   :  { %v2088_v60 = vpop.f32.mrf.mxu1 }
 0x340   :  { %v2615_v47 = vmax.f32 %v2565_v54, 0.0  ;;  %v2089_v56 = vadd.f32 %v2088_v60, %v1579_v59  ;;  %v10367_v59 = vld [vmem:[#allocation51_spill] sm:$0xff] }
 0x341   :  { %1618 = vmatmul.bf16.gmra.mxu0 %v5437_v11 }
 0x342   :  { %v2665_v63 = vpack.c.bf16 %v2615_v47, %v2615_v47  ;;  %v2412_v48 = vmax.f32 %v10363_v15, %v2089_v56  ;;  %2127 = vmatmul.bf16.gmra.mxu1 %v5441_v41  ;;  %v10368_v47 = vmax.f32 %v8075_v8, %v8905_v44  ;;  %v7251_v44 = vld [vmem:[%s10206_s0 + $0x344] sm:$0xf0]  ;;  %v7250_v8 = vld [vmem:[%s10206_s0 + $0x344] sm:$0xf] }
 0x344   :  { %v4089_v37 = vunpack.c.l.b16 %v2665_v63  ;;  %v2512_v23 = vmax.f32 %v2412_v48, %v10364_v38  ;;  %v2346_v63 = vadd.f32 %v8927_v28, %v8925_v20  ;;  %v5454_v20 = vld [vmem:[%s10206_s0 + $0x348] sm:$0xf0] }
 0x346   :  { %v9204_v53 = vpack.c.b16 %v4089_v37, %v4088_v13  ;;  %v1581_v27 = vpop.f32.mrf.mxu0  ;;  %v2566_v16 = vadd.f32 %v9100_v50, %v2512_v23  ;;  %v10369_v23 = vld [vmem:[#allocation16_spill] sm:$0xff] }
 0x347   :  { %v2090_v31 = vpop.f32.mrf.mxu1  ;;  %v2465_v32 = vmax.f32 %v10369_v23, %v2346_v63  ;;  %v10374_v63 = vld [vmem:[#allocation57_spill] sm:$0xff] }
 0x348   :  { %v2091_v2 = vadd.f32 %v2090_v31, %v1581_v27  ;;  %v2616_v18 = vmax.f32 %v2566_v16, 0.0  ;;  %v10370_v27 = vld [vmem:[#allocation53_spill] sm:$0xff]  ;;  %v5452_v16 = vld [vmem:[%s10206_s0 + $0x340] sm:$0xf] }
 0x349   :  { %v5453_v17 = vor.u32 %v7251_v44, %v5452_v16 }
 0x34a   :  { %v2413_v24 = vmax.f32 %v10366_v0, %v2091_v2  ;;  %v2666_v7 = vpack.c.bf16 %v2616_v18, %v2616_v18  ;;  %v1846_v18 = vpop.f32.mrf.mxu3 }
 0x34c   :  { %v2513_v25 = vmax.f32 %v2413_v24, %v2463_v26  ;;  %v4175_v60 = vunpack.c.l.b16 %v2666_v7  ;;  %v5457_v24 = vor.u32 %v7250_v8, %v5454_v20  ;;  %v10372_v7 = vmax.f32 %v8107_v43, %v8936_v21  ;;  %v7253_v43 = vld [vmem:[%s10206_s0 + $0x354] sm:$0xf0]  ;;  %v7252_v21 = vld [vmem:[%s10206_s0 + $0x354] sm:$0xf] }
 0x34e   :  { %v2567_v62 = vadd.f32 %v9100_v50, %v2513_v25  ;;  %v1584_v12 = vpop.f32.mrf.mxu0 }
 0x34f   :  { %v2093_v3 = vpop.f32.mrf.mxu1 }
 0x350   :  { %v2617_v39 = vmax.f32 %v2567_v62, 0.0  ;;  %v2094_v11 = vadd.f32 %v2093_v3, %v1584_v12  ;;  %v2355_v12 = vpop.f32.mrf.mxu2 }
 0x351   :  { %1623 = vmatmul.bf16.gmra.mxu0 %v5445_v49  ;;  %v10371_v49 = vld [vmem:[#allocation55_spill] sm:$0xff] }
 0x352   :  { %v2667_v54 = vpack.c.bf16 %v2617_v39, %v2617_v39  ;;  %v2414_v41 = vmax.f32 %v10367_v59, %v2094_v11  ;;  %2132 = vmatmul.bf16.gmra.mxu1 %v5449_v58  ;;  %v2351_v11 = vadd.f32 %v8958_v42, %v8956_v29  ;;  %v5462_v29 = vld [vmem:[%s10206_s0 + $0x358] sm:$0xf0]  ;;  %v1849_v42 = vpop.f32.mrf.mxu3 }
 0x353   :  { %v5465_v16 = vor.u32 %v7252_v21, %v5462_v29 }
 0x354   :  { %v4176_v57 = vunpack.c.l.b16 %v2667_v54  ;;  %v2514_v56 = vmax.f32 %v2414_v41, %v10368_v47  ;;  %v10373_v47 = vld [vmem:[#allocation19_spill] sm:$0xff] }
 0x356   :  { %v9228_v15 = vpack.c.b16 %v4176_v57, %v4175_v60  ;;  %v1586_v48 = vpop.f32.mrf.mxu0  ;;  %v2568_v37 = vadd.f32 %v9100_v50, %v2514_v56  ;;  %v2467_v56 = vmax.f32 %v10373_v47, %v2351_v11  ;;  %v10377_v11 = vld [vmem:[#allocation21_spill] sm:$0xff] }
 0x357   :  { %v2095_v13 = vpop.f32.mrf.mxu1 }
 0x358   :  { %v2096_v38 = vadd.f32 %v2095_v13, %v1586_v48  ;;  %v2618_v28 = vmax.f32 %v2568_v37, 0.0  ;;  %v5460_v13 = vld [vmem:[%s10206_s0 + $0x350] sm:$0xf]  ;;  %v2358_v23 = vpop.f32.mrf.mxu2 }
 0x35a   :  { %v2415_v31 = vmax.f32 %v10370_v27, %v2096_v38  ;;  %v2668_v40 = vpack.c.bf16 %v2618_v28, %v2618_v28 }
 0x35c   :  { %v2515_v2 = vmax.f32 %v2415_v31, %v2465_v32  ;;  %v4262_v58 = vunpack.c.l.b16 %v2668_v40  ;;  %v5461_v32 = vor.u32 %v7253_v43, %v5460_v13 }
 0x35e   :  { %v2569_v26 = vadd.f32 %v9100_v50, %v2515_v2  ;;  %v1589_v0 = vpop.f32.mrf.mxu0 }
 0x35f   :  { %v2098_v4 = vpop.f32.mrf.mxu1 }
 0x360   :  { %v2619_v61 = vmax.f32 %v2569_v26, 0.0  ;;  %v2099_v6 = vadd.f32 %v2098_v4, %v1589_v0  ;;  %v10376_v4 = vmax.f32 %v8139_v19, %v8967_v5  ;;  %v5468_v19 = vld [vmem:[%s10206_s0 + $0x360] sm:$0xf] }
 0x361   :  { %1628 = vmatmul.bf16.gmra.mxu0 %v5453_v17  ;;  %v10375_v17 = vld [vmem:[#allocation59_spill] sm:$0xff] }
 0x362   :  { %v2669_v25 = vpack.c.bf16 %v2619_v61, %v2619_v61  ;;  %v2416_v62 = vmax.f32 %v10371_v49, %v2099_v6  ;;  %2137 = vmatmul.bf16.gmra.mxu1 %v5457_v24  ;;  %v2356_v61 = vadd.f32 %v2355_v12, %v1846_v18  ;;  %v1851_v6 = vpop.f32.mrf.mxu3  ;;  %v7255_v18 = vld [vmem:[%s10206_s0 + $0x364] sm:$0xf0]  ;;  %v7254_v12 = vld [vmem:[%s10206_s0 + $0x364] sm:$0xf] }
 0x364   :  { %v4263_v3 = vunpack.c.l.b16 %v2669_v25  ;;  %v2516_v39 = vmax.f32 %v2416_v62, %v10372_v7  ;;  %v7372_v62 = vld [vmem:[%s10207_s3 + $0x50] sm:$0xff] }
 0x365   :  { %2774 = vmatpush.bf16.msrb.mxu2 %v7372_v62 }
 0x366   :  { %v9252_v54 = vpack.c.b16 %v4263_v3, %v4262_v58  ;;  %v1591_v59 = vpop.f32.mrf.mxu0  ;;  %v2570_v60 = vadd.f32 %v9100_v50, %v2516_v39  ;;  %v2360_v58 = vpop.f32.mrf.mxu2 }
 0x367   :  { %v2100_v41 = vpop.f32.mrf.mxu1 }
 0x368   :  { %v2101_v57 = vadd.f32 %v2100_v41, %v1591_v59  ;;  %v2620_v37 = vmax.f32 %v2570_v60, 0.0  ;;  %v2469_v59 = vmax.f32 %v10377_v11, %v2356_v61  ;;  %v10378_v41 = vld [vmem:[#allocation61_spill] sm:$0xff]  ;;  %v5470_v60 = vld [vmem:[%s10206_s0 + $0x368] sm:$0xf0]  ;;  %v10381_v61 = vld [vmem:[#allocation24_spill] sm:$0xff] }
 0x369   :  { %v5473_v43 = vor.u32 %v7254_v12, %v5470_v60  ;;  %v7256_v11 = vld [vmem:[%s10206_s0 + $0x374] sm:$0xf] }
 0x36a   :  { %v2417_v48 = vmax.f32 %v10374_v63, %v2101_v57  ;;  %v2670_v8 = vpack.c.bf16 %v2620_v37, %v2620_v37  ;;  %v2359_v63 = vadd.f32 %v2358_v23, %v1849_v42  ;;  %v1854_v29 = vpop.f32.mrf.mxu3  ;;  %v2361_v23 = vadd.f32 %v2360_v58, %v1851_v6  ;;  %v5476_v6 = vld [vmem:[%s10206_s0 + $0x370] sm:$0xf]  ;;  %v7257_v58 = vld [vmem:[%s10206_s0 + $0x374] sm:$0xf0] }
 0x36c   :  { %v2517_v38 = vmax.f32 %v2417_v48, %v2467_v56  ;;  %v4349_v0 = vunpack.c.l.b16 %v2670_v8  ;;  %v5469_v56 = vor.u32 %v7255_v18, %v5468_v19  ;;  %v10380_v8 = vld [vmem:[#allocation63_spill] sm:$0xff]  ;;  %v5477_v19 = vor.u32 %v7257_v58, %v5476_v6 }
 0x36e   :  { %v2571_v27 = vadd.f32 %v9100_v50, %v2517_v38  ;;  %v1594_v31 = vpop.f32.mrf.mxu0 }
 0x36f   :  { %v2103_v44 = vpop.f32.mrf.mxu1 }
 0x370   :  { %v2621_v20 = vmax.f32 %v2571_v27, 0.0  ;;  %v2104_v28 = vadd.f32 %v2103_v44, %v1594_v31  ;;  %v2363_v27 = vpop.f32.mrf.mxu2  ;;  %v10379_v31 = vld [vmem:[#allocation22_spill] sm:$0xff] }
 0x371   :  { %1633 = vmatmul.bf16.gmra.mxu0 %v5461_v32  ;;  %v2364_v18 = vadd.f32 %v2363_v27, %v1854_v29 }
 0x372   :  { %v2671_v2 = vpack.c.bf16 %v2621_v20, %v2621_v20  ;;  %v2418_v26 = vmax.f32 %v10375_v17, %v2104_v28  ;;  %2142 = vmatmul.bf16.gmra.mxu1 %v5465_v16  ;;  %v2470_v16 = vmax.f32 %v10379_v31, %v2359_v63  ;;  %v1856_v62 = vpop.f32.mrf.mxu3 }
 0x374   :  { %v4350_v24 = vunpack.c.l.b16 %v2671_v2  ;;  %v2518_v40 = vmax.f32 %v2418_v26, %v10376_v4 }
 0x376   :  { %v9274_v25 = vpack.c.b16 %v4350_v24, %v4349_v0  ;;  %v1596_v49 = vpop.f32.mrf.mxu0  ;;  %v2572_v7 = vadd.f32 %v9100_v50, %v2518_v40  ;;  %v7364_v0 = vld [vmem:[%s10207_s3 + $0x10] sm:$0xff] }
 0x377   :  { %v2105_v3 = vpop.f32.mrf.mxu1  ;;  %2842 = vmatpush.bf16.msrb.mxu3 %v7364_v0  ;;  %v10386_v0 = vld [vmem:[#allocation69_spill] sm:$0xff] }
 0x378   :  { %v2106_v39 = vadd.f32 %v2105_v3, %v1596_v49  ;;  %v2622_v57 = vmax.f32 %v2572_v7, 0.0  ;;  %v2471_v49 = vmax.f32 %v10381_v61, %v2361_v23  ;;  %v10382_v3 = vld [vmem:[#allocation65_spill] sm:$0xff]  ;;  %v10385_v23 = vld [vmem:[#allocation27_spill] sm:$0xff]  ;;  %v7258_v61 = vld [vmem:[%s10206_s0 + $0x384] sm:$0xf] }
 0x37a   :  { %v2419_v5 = vmax.f32 %v10378_v41, %v2106_v39  ;;  %v2672_v37 = vpack.c.bf16 %v2622_v57, %v2622_v57  ;;  %v2365_v39 = vpop.f32.mrf.mxu2 }
 0x37b   :  { %v2366_v27 = vadd.f32 %v2365_v39, %v1856_v62 }
 0x37c   :  { %v2519_v47 = vmax.f32 %v2419_v5, %v2469_v59  ;;  %v4436_v28 = vunpack.c.l.b16 %v2672_v37  ;;  %v5478_v59 = vld [vmem:[%s10206_s0 + $0x378] sm:$0xf0]  ;;  %v10384_v37 = vld [vmem:[#allocation67_spill] sm:$0xff] }
 0x37d   :  { %v5481_v57 = vor.u32 %v7256_v11, %v5478_v59 }
 0x37e   :  { %v2573_v48 = vadd.f32 %v9100_v50, %v2519_v47  ;;  %v1599_v13 = vpop.f32.mrf.mxu0 }
 0x37f   :  { %v2108_v21 = vpop.f32.mrf.mxu1 }
 0x380   :  { %v2623_v38 = vmax.f32 %v2573_v48, 0.0  ;;  %v2109_v32 = vadd.f32 %v2108_v21, %v1599_v13  ;;  %v10383_v13 = vld [vmem:[#allocation25_spill] sm:$0xff] }
 0x381   :  { %1638 = vmatmul.bf16.gmra.mxu0 %v5469_v56 }
 0x382   :  { %v2673_v44 = vpack.c.bf16 %v2623_v38, %v2623_v38  ;;  %v2420_v20 = vmax.f32 %v10380_v8, %v2109_v32  ;;  %2147 = vmatmul.bf16.gmra.mxu1 %v5473_v43  ;;  %v2472_v43 = vmax.f32 %v10383_v13, %v2364_v18  ;;  %v1859_v32 = vpop.f32.mrf.mxu3  ;;  %v2368_v29 = vpop.f32.mrf.mxu2 }
 0x383   :  { %v2369_v6 = vadd.f32 %v2368_v29, %v1859_v32  ;;  %v7371_v32 = vld [vmem:[%s10207_s3 + $0x48] sm:$0xff] }
 0x384   :  { %v4437_v2 = vunpack.c.l.b16 %v2673_v44  ;;  %v2520_v42 = vmax.f32 %v2420_v20, %v2470_v16  ;;  %2775 = vmatpush.bf16.msrb.mxu2 %v7371_v32 }
 0x386   :  { %v9297_v17 = vpack.c.b16 %v4437_v2, %v4436_v28  ;;  %v1601_v26 = vpop.f32.mrf.mxu0  ;;  %v2574_v4 = vadd.f32 %v9100_v50, %v2520_v42 }
 0x387   :  { %v2110_v24 = vpop.f32.mrf.mxu1 }
 0x388   :  { %v2111_v40 = vadd.f32 %v2110_v24, %v1601_v26  ;;  %v2624_v41 = vmax.f32 %v2574_v4, 0.0  ;;  %v2473_v26 = vmax.f32 %v10385_v23, %v2366_v27  ;;  %v5484_v4 = vld [vmem:[%s10206_s0 + $0x380] sm:$0xf]  ;;  %v5492_v23 = vld [vmem:[%s10206_s0 + $0x390] sm:$0xf] }
 0x38a   :  { %v2421_v7 = vmax.f32 %v10382_v3, %v2111_v40  ;;  %v2674_v56 = vpack.c.bf16 %v2624_v41, %v2624_v41  ;;  %v7259_v40 = vld [vmem:[%s10206_s0 + $0x384] sm:$0xf0]  ;;  %v1861_v58 = vpop.f32.mrf.mxu3  ;;  %v2370_v41 = vpop.f32.mrf.mxu2 }
 0x38c   :  { %v2521_v5 = vmax.f32 %v2421_v7, %v2471_v49  ;;  %v4523_v31 = vunpack.c.l.b16 %v2674_v56  ;;  %v5486_v49 = vld [vmem:[%s10206_s0 + $0x388] sm:$0xf0]  ;;  %v5485_v7 = vor.u32 %v7259_v40, %v5484_v4  ;;  %v5494_v4 = vld [vmem:[%s10206_s0 + $0x398] sm:$0xf0] }
 0x38d   :  { %v5489_v59 = vor.u32 %v7258_v61, %v5486_v49  ;;  %v10388_v56 = vld [vmem:[#allocation71_spill] sm:$0xff]  ;;  %v7385_v40 = vld [vmem:[%s10207_s3 + $0xb8] sm:$0xff] }
 0x38e   :  { %v2575_v12 = vadd.f32 %v9100_v50, %v2521_v5  ;;  %v1604_v60 = vpop.f32.mrf.mxu0 }
 0x38f   :  { %v2113_v47 = vpop.f32.mrf.mxu1 }
 0x390   :  { %v2625_v63 = vmax.f32 %v2575_v12, 0.0  ;;  %v2114_v48 = vadd.f32 %v2113_v47, %v1604_v60  ;;  %v10387_v60 = vld [vmem:[#allocation28_spill] sm:$0xff] }
 0x391   :  { %1643 = vmatmul.bf16.gmra.mxu0 %v5477_v19 }
 0x392   :  { %v2675_v21 = vpack.c.bf16 %v2625_v63, %v2625_v63  ;;  %v2422_v38 = vmax.f32 %v10384_v37, %v2114_v48  ;;  %2152 = vmatmul.bf16.gmra.mxu1 %v5481_v57  ;;  %v2474_v57 = vmax.f32 %v10387_v60, %v2369_v6  ;;  %v1864_v29 = vpop.f32.mrf.mxu3  ;;  %v2373_v27 = vpop.f32.mrf.mxu2 }
 0x394   :  { %v4524_v16 = vunpack.c.l.b16 %v2675_v21  ;;  %v2522_v44 = vmax.f32 %v2422_v38, %v2472_v43  ;;  %v2371_v21 = vadd.f32 %v2370_v41, %v1861_v58 }
 0x396   :  { %v9320_v8 = vpack.c.b16 %v4524_v16, %v4523_v31  ;;  %v1606_v20 = vpop.f32.mrf.mxu0  ;;  %v2576_v2 = vadd.f32 %v9100_v50, %v2522_v44 }
 0x397   :  { %v2115_v28 = vpop.f32.mrf.mxu1 }
 0x398   :  { %v2116_v42 = vadd.f32 %v2115_v28, %v1606_v20  ;;  %v2626_v62 = vmax.f32 %v2576_v2, 0.0  ;;  %v10389_v20 = vld [vmem:[#allocation30_spill] sm:$0xff]  ;;  %v10390_v2 = vld [vmem:[#allocation73_spill] sm:$0xff] }
 0x399   :  { %v2475_v28 = vmax.f32 %v10389_v20, %v2371_v21 }
 0x39a   :  { %v2423_v24 = vmax.f32 %v10386_v0, %v2116_v42  ;;  %v2676_v19 = vpack.c.bf16 %v2626_v62, %v2626_v62  ;;  %v7370_v0 = vld [vmem:[%s10207_s3 + $0x40] sm:$0xff] }
 0x39b   :  { %2776 = vmatpush.bf16.msrb.mxu2 %v7370_v0  ;;  %v5500_v0 = vld [vmem:[%s10206_s0 + $0x3a0] sm:$0xf] }
 0x39c   :  { %v2523_v3 = vmax.f32 %v2423_v24, %v2473_v26  ;;  %v4610_v48 = vunpack.c.l.b16 %v2676_v19  ;;  %v7261_v26 = vld [vmem:[%s10206_s0 + $0x394] sm:$0xf0]  ;;  %v7260_v24 = vld [vmem:[%s10206_s0 + $0x394] sm:$0xf] }
 0x39d   :  { %v5493_v62 = vor.u32 %v7261_v26, %v5492_v23  ;;  %v5497_v58 = vor.u32 %v7260_v24, %v5494_v4  ;;  %v10394_v23 = vld [vmem:[#allocation77_spill] sm:$0xff]  ;;  %v7263_v24 = vld [vmem:[%s10206_s0 + $0x3a4] sm:$0xf0]  ;;  %v7262_v4 = vld [vmem:[%s10206_s0 + $0x3a4] sm:$0xf] }
 0x39e   :  { %v2577_v39 = vadd.f32 %v9100_v50, %v2523_v3  ;;  %v1609_v11 = vpop.f32.mrf.mxu0  ;;  %v2374_v3 = vadd.f32 %v2373_v27, %v1864_v29  ;;  %v7382_v29 = vld [vmem:[%s10207_s3 + $0xa0] sm:$0xff] }
 0x39f   :  { %v2118_v5 = vpop.f32.mrf.mxu1  ;;  %2922 = vmatpush.bf16.msra.mxu2 %v7385_v40  ;;  %v5502_v40 = vld [vmem:[%s10206_s0 + $0x3a8] sm:$0xf0] }
 0x3a0   :  { %v2627_v18 = vmax.f32 %v2577_v39, 0.0  ;;  %v2119_v12 = vadd.f32 %v2118_v5, %v1609_v11  ;;  %v7363_v11 = vld [vmem:[%s10207_s3 + $0x8] sm:$0xff] }
 0x3a1   :  { %1648 = vmatmul.bf16.gmra.mxu0 %v5485_v7  ;;  %2843 = vmatpush.bf16.msrb.mxu3 %v7363_v11 }
 0x3a2   :  { %v2677_v47 = vpack.c.bf16 %v2627_v18, %v2627_v18  ;;  %v2424_v63 = vmax.f32 %v10388_v56, %v2119_v12  ;;  %2157 = vmatmul.bf16.gmra.mxu1 %v5489_v59  ;;  %v7384_v59 = vld [vmem:[%s10207_s3 + $0xb0] sm:$0xff]  ;;  %v10391_v18 = vld [vmem:[#allocation31_spill] sm:$0xff]  ;;  %v1866_v56 = vpop.f32.mrf.mxu3 }
 0x3a3   :  { %v2476_v12 = vmax.f32 %v10391_v18, %v2374_v3  ;;  %2923 = vmatpush.bf16.msra.mxu2 %v7384_v59  ;;  %v7392_v3 = vld [vmem:[%s10207_s3 + $0xf0] sm:$0xff]  ;;  %v7391_v18 = vld [vmem:[%s10207_s3 + $0xe8] sm:$0xff] }
 0x3a4   :  { %v4611_v13 = vunpack.c.l.b16 %v2677_v47  ;;  %v2524_v43 = vmax.f32 %v2424_v63, %v2474_v57  ;;  %v10392_v57 = vld [vmem:[#allocation75_spill] sm:$0xff]  ;;  %v2375_v63 = vpop.f32.mrf.mxu2  ;;  %v7380_v59 = vld [vmem:[%s10207_s3 + $0x90] sm:$0xff] }
 0x3a5   :  { %v2376_v32 = vadd.f32 %v2375_v63, %v1866_v56 }
 0x3a6   :  { %v9340_v37 = vpack.c.b16 %v4611_v13, %v4610_v48  ;;  %v1611_v38 = vpop.f32.mrf.mxu0  ;;  %v2578_v16 = vadd.f32 %v9100_v50, %v2524_v43  ;;  %v7362_v48 = vld [vmem:[%s10207_s3] sm:$0xff]  ;;  %v7383_v13 = vld [vmem:[%s10207_s3 + $0xa8] sm:$0xff] }
 0x3a7   :  { %v2120_v31 = vpop.f32.mrf.mxu1  ;;  %2844 = vmatpush.bf16.msrb.mxu3 %v7362_v48  ;;  %2924 = vmatpush.bf16.msra.mxu2 %v7383_v13  ;;  %v10396_v48 = vld [vmem:[#allocation2_spill] sm:$0xff]  ;;  %v10397_v13 = vld [vmem:[#allocation79_spill] sm:$0xff] }
 0x3a8   :  { %v2121_v44 = vadd.f32 %v2120_v31, %v1611_v38  ;;  %v2628_v61 = vmax.f32 %v2578_v16, 0.0 }
 0x3aa   :  { %v2425_v42 = vmax.f32 %v10390_v2, %v2121_v44  ;;  %v2678_v41 = vpack.c.bf16 %v2628_v61, %v2628_v61  ;;  %v10393_v2 = vld [vmem:[#allocation32_spill] sm:$0xff]  ;;  %v7381_v61 = vld [vmem:[%s10207_s3 + $0x98] sm:$0xff] }
 0x3ab   :  { %2925 = vmatpush.bf16.msra.mxu2 %v7382_v29  ;;  %v7378_v29 = vld [vmem:[%s10207_s3 + $0x80] sm:$0xff] }
 0x3ac   :  { %v2525_v49 = vmax.f32 %v2425_v42, %v2475_v28  ;;  %v4697_v43 = vunpack.c.l.b16 %v2678_v41  ;;  %v7393_v28 = vld [vmem:[%s10207_s3 + $0xf8] sm:$0xff]  ;;  %v2477_v42 = vmax.f32 %v10393_v2, %v2376_v32  ;;  %v10399_v2 = vld [vmem:[#allocation35_spill] sm:$0xff] }
 0x3ad   :  { %3009 = vmatpush.bf16.msra.mxu3 %v7393_v28  ;;  %v7389_v28 = vld [vmem:[%s10207_s3 + $0xd8] sm:$0xff] }
 0x3ae   :  { %v2579_v7 = vadd.f32 %v9100_v50, %v2525_v49  ;;  %v1614_v6 = vpop.f32.mrf.mxu0 }
 0x3af   :  { %v2123_v39 = vpop.f32.mrf.mxu1  ;;  %2926 = vmatpush.bf16.msra.mxu2 %v7381_v61  ;;  %v10401_v61 = vld [vmem:[#allocation80_spill] sm:$0xff] }
 0x3b0   :  { %v2629_v5 = vmax.f32 %v2579_v7, 0.0  ;;  %v2124_v19 = vadd.f32 %v2123_v39, %v1614_v6  ;;  %v5501_v7 = vor.u32 %v7263_v24, %v5500_v0  ;;  %v5505_v39 = vor.u32 %v7262_v4, %v5502_v40  ;;  %v7264_v0 = vld [vmem:[%s10206_s0 + $0x3b4] sm:$0xf]  ;;  %v5510_v24 = vld [vmem:[%s10206_s0 + $0x3b8] sm:$0xf0]  ;;  %v10400_v40 = vld [vmem:[#allocation3_spill] sm:$0xff] }
 0x3b1   :  { %1653 = vmatmul.bf16.gmra.mxu0 %v5493_v62  ;;  %3010 = vmatpush.bf16.msra.mxu3 %v7392_v3  ;;  %v7388_v3 = vld [vmem:[%s10207_s3 + $0xd0] sm:$0xff] }
 0x3b2   :  { %v2679_v60 = vpack.c.bf16 %v2629_v5, %v2629_v5  ;;  %v2426_v47 = vmax.f32 %v10392_v57, %v2124_v19  ;;  %2162 = vmatmul.bf16.gmra.mxu1 %v5497_v58 }
 0x3b3   :  { %2927 = vmatpush.bf16.msra.mxu2 %v7380_v59 }
 0x3b4   :  { %v4698_v21 = vunpack.c.l.b16 %v2679_v60  ;;  %v2526_v38 = vmax.f32 %v2426_v47, %v2476_v12  ;;  %v10395_v60 = vld [vmem:[#allocation33_spill] sm:$0xff]  ;;  %v7379_v47 = vld [vmem:[%s10207_s3 + $0x88] sm:$0xff] }
 0x3b5   :  { %3011 = vmatpush.bf16.msra.mxu3 %v7391_v18 }
 0x3b6   :  { %v9381_v31 = vpack.c.b16 %v4698_v21, %v4697_v43  ;;  %v1616_v16 = vpop.f32.mrf.mxu0  ;;  %v2580_v27 = vadd.f32 %v9100_v50, %v2526_v38  ;;  %v10398_v43 = vmax.f32 %v10396_v48, %v10397_v13  ;;  %v7390_v38 = vld [vmem:[%s10207_s3 + $0xe0] sm:$0xff] }
 0x3b7   :  { %v2125_v44 = vpop.f32.mrf.mxu1  ;;  %2928 = vmatpush.bf16.msra.mxu2 %v7379_v47 }
 0x3b8   :  { %v2126_v20 = vadd.f32 %v2125_v44, %v1616_v16  ;;  %v2630_v49 = vmax.f32 %v2580_v27, 0.0 }
 0x3b9   :  { %3012 = vmatpush.bf16.msra.mxu3 %v7390_v38 }
 0x3ba   :  { %v2427_v26 = vmax.f32 %v10394_v23, %v2126_v20  ;;  %v2680_v41 = vpack.c.bf16 %v2630_v49, %v2630_v49  ;;  %v5508_v23 = vld [vmem:[%s10206_s0 + $0x3b0] sm:$0xf]  ;;  %v10402_v49 = vmax.f32 %v10400_v40, %v10401_v61  ;;  %v10409_v40 = vld [vmem:[#allocation82_spill] sm:$0xff] }
 0x3bb   :  { %2929 = vmatpush.bf16.msra.mxu2 %v7378_v29 }
 0x3bc   :  { %v2527_v62 = vmax.f32 %v2427_v26, %v2477_v42  ;;  %v4784_v56 = vunpack.c.l.b16 %v2680_v41  ;;  %v7265_v26 = vld [vmem:[%s10206_s0 + $0x3b4] sm:$0xf0] }
 0x3bd   :  { %3013 = vmatpush.bf16.msra.mxu3 %v7389_v28  ;;  %v10407_v28 = vld [vmem:[#allocation37_spill] sm:$0xff] }
 0x3be   :  { %v2581_v6 = vadd.f32 %v9100_v50, %v2527_v62  ;;  %v1619_v58 = vpop.f32.mrf.mxu0 }
 0x3bf   :  { %v2128_v11 = vpop.f32.mrf.mxu1 }
 0x3c0   :  { %v2631_v5 = vmax.f32 %v2581_v6, 0.0  ;;  %v2129_v19 = vadd.f32 %v2128_v11, %v1619_v58 }
 0x3c1   :  { %1658 = vmatmul.bf16.gmra.mxu0 %v5501_v7  ;;  %v5509_v7 = vor.u32 %v7265_v26, %v5508_v23  ;;  %3014 = vmatpush.bf16.msra.mxu3 %v7388_v3  ;;  %v7267_v23 = vld [vmem:[%s10206_s0 + $0x3c4] sm:$0xf0]  ;;  %v7266_v26 = vld [vmem:[%s10206_s0 + $0x3c4] sm:$0xf] }
 0x3c2   :  { %v2681_v12 = vpack.c.bf16 %v2631_v5, %v2631_v5  ;;  %v2428_v57 = vmax.f32 %v2129_v19, %v10395_v60  ;;  %2167 = vmatmul.bf16.gmra.mxu1 %v5505_v39  ;;  %v5513_v39 = vor.u32 %v7264_v0, %v5510_v24  ;;  %v7387_v19 = vld [vmem:[%s10207_s3 + $0xc8] sm:$0xff] }
 0x3c3   :  { %v5518_v0 = vld [vmem:[%s10206_s0 + $0x3c8] sm:$0xf0] }
 0x3c4   :  { %v4785_v63 = vunpack.c.l.b16 %v2681_v12  ;;  %v2478_v21 = vmax.f32 %v10398_v43, %v2428_v57  ;;  %v10403_v12 = vld [vmem:[#allocation36_spill] sm:$0xff]  ;;  %v7386_v43 = vld [vmem:[%s10207_s3 + $0xc0] sm:$0xff]  ;;  %v7407_v3 = vld [vmem:[%s10207_s3 + $0x168] sm:$0xff] }
 0x3c5   :  { %3015 = vmatpush.bf16.msra.mxu3 %v7387_v19 }
 0x3c6   :  { %v9427_v32 = vpack.c.b16 %v4785_v63, %v4784_v56  ;;  %v1621_v16 = vpop.f32.mrf.mxu0  ;;  %v2532_v27 = vadd.f32 %v9100_v50, %v2478_v21  ;;  %v10404_v56 = vld [vmem:[#allocation4_spill] sm:$0xff]  ;;  %v10405_v63 = vld [vmem:[#allocation81_spill] sm:$0xff] }
 0x3c7   :  { %v2130_v44 = vpop.f32.mrf.mxu1  ;;  %v10406_v48 = vmax.f32 %v10404_v56, %v10405_v63  ;;  %v7409_v21 = vld [vmem:[%s10207_s3 + $0x178] sm:$0xff]  ;;  %v10413_v56 = vld [vmem:[#allocation83_spill] sm:$0xff] }
 0x3c8   :  { %v2131_v20 = vadd.f32 %v2130_v44, %v1621_v16  ;;  %v2582_v4 = vmax.f32 %v2532_v27, 0.0 }
 0x3c9   :  { %3016 = vmatpush.bf16.msra.mxu3 %v7386_v43  ;;  %v7405_v43 = vld [vmem:[%s10207_s3 + $0x158] sm:$0xff] }
 0x3ca   :  { %v2429_v42 = vmax.f32 %v2131_v20, %v10399_v2  ;;  %v2632_v59 = vpack.c.bf16 %v2582_v4, %v2582_v4  ;;  %v7408_v20 = vld [vmem:[%s10207_s3 + $0x170] sm:$0xff]  ;;  %v10408_v4 = vld [vmem:[#allocation5_spill] sm:$0xff] }
 0x3cb   :  { %v10410_v61 = vmax.f32 %v10408_v4, %v10409_v40  ;;  %v10416_v4 = vld [vmem:[#allocation7_spill] sm:$0xff]  ;;  %v10417_v40 = vld [vmem:[#allocation84_spill] sm:$0xff] }
 0x3cc   :  { %v2479_v62 = vmax.f32 %v10402_v49, %v2429_v42  ;;  %v2785_v57 = vunpack.c.l.b16 %v2632_v59  ;;  %v5516_v42 = vld [vmem:[%s10206_s0 + $0x3c0] sm:$0xf] }
 0x3ce   :  { %v2533_v6 = vadd.f32 %v9100_v50, %v2479_v62  ;;  %v1624_v58 = vpop.f32.mrf.mxu0  ;;  %v5517_v62 = vor.u32 %v7267_v23, %v5516_v42  ;;  %v5524_v42 = vld [vmem:[%s10206_s0 + $0x3d0] sm:$0xf]  ;;  %v7269_v23 = vld [vmem:[%s10206_s0 + $0x3d4] sm:$0xf0] }
 0x3cf   :  { %v2133_v11 = vpop.f32.mrf.mxu1 }
 0x3d0   :  { %v2583_v41 = vmax.f32 %v2533_v6, 0.0  ;;  %v2134_v5 = vadd.f32 %v2133_v11, %v1624_v58  ;;  %v5521_v58 = vor.u32 %v7266_v26, %v5518_v0  ;;  %v7268_v26 = vld [vmem:[%s10206_s0 + $0x3d4] sm:$0xf]  ;;  %v5526_v0 = vld [vmem:[%s10206_s0 + $0x3d8] sm:$0xf0] }
 0x3d1   :  { %1663 = vmatmul.bf16.gmra.mxu0 %v5509_v7 }
 0x3d2   :  { %v2633_v18 = vpack.c.bf16 %v2583_v41, %v2583_v41  ;;  %v2430_v60 = vmax.f32 %v2134_v5, %v10403_v12  ;;  %2172 = vmatmul.bf16.gmra.mxu1 %v5513_v39  ;;  %v7406_v5 = vld [vmem:[%s10207_s3 + $0x160] sm:$0xff] }
 0x3d4   :  { %v2786_v47 = vunpack.c.l.b16 %v2633_v18  ;;  %v2480_v13 = vmax.f32 %v10406_v48, %v2430_v60  ;;  %v10411_v18 = vld [vmem:[#allocation38_spill] sm:$0xff] }
 0x3d6   :  { %v1626_v38 = vpop.f32.mrf.mxu0  ;;  %v2787_v16 = vpack.c.b16 %v2786_v47, %v2785_v57  ;;  %v2534_v29 = vadd.f32 %v9100_v50, %v2480_v13  ;;  %v10412_v47 = vld [vmem:[#allocation6_spill] sm:$0xff]  ;;  %v7401_v13 = vld [vmem:[%s10207_s3 + $0x138] sm:$0xff] }
 0x3d7   :  { %v2135_v44 = vpop.f32.mrf.mxu1  ;;  %v10414_v63 = vmax.f32 %v10412_v47, %v10413_v56  ;;  %v10420_v56 = vmax.f32 %v8009_v9, %v8845_v52  ;;  %v7396_v52 = vld [vmem:[%s10207_s3 + $0x110] sm:$0xff]  ;;  %v10421_v9 = vld [vmem:[#allocation42_spill] sm:$0xff] }
 0x3d8   :  { %v2136_v27 = vadd.f32 %v2135_v44, %v1626_v38  ;;  %2845 = vmatmul.bf16.vlgmr.msrb.gmra.mxu3 %v2787_v16  ;;  %v2584_v24 = vmax.f32 %v2534_v29, 0.0 }
 0x3d9   :  { %3183 = vmatpush.bf16.msrb.mxu3 %v7409_v21 }
 0x3da   :  { %v2431_v2 = vmax.f32 %v2136_v27, %v10407_v28  ;;  %v2634_v11 = vpack.c.bf16 %v2584_v24, %v2584_v24  ;;  %v7400_v27 = vld [vmem:[%s10207_s3 + $0x130] sm:$0xff]  ;;  %v10415_v28 = vld [vmem:[#allocation39_spill] sm:$0xff] }
 0x3dc   :  { %v2481_v49 = vmax.f32 %v10410_v61, %v2431_v2  ;;  %v2717_v60 = vunpack.c.l.b16 %v2634_v11  ;;  %v10418_v61 = vmax.f32 %v10416_v4, %v10417_v40  ;;  %v7395_v40 = vld [vmem:[%s10207_s3 + $0x108] sm:$0xff] }
 0x3dd   :  { %3184 = vmatpush.bf16.msrb.mxu3 %v7408_v20  ;;  %v7404_v20 = vld [vmem:[%s10207_s3 + $0x150] sm:$0xff] }
 0x3de   :  { %v2535_v7 = vadd.f32 %v9100_v50, %v2481_v49  ;;  %v1629_v6 = vpop.f32.mrf.mxu0 }
 0x3df   :  { %v2138_v39 = vpop.f32.mrf.mxu1 }
 0x3e0   :  { %v2585_v59 = vmax.f32 %v2535_v7, 0.0  ;;  %v2139_v41 = vadd.f32 %v2138_v39, %v1629_v6  ;;  %v7403_v39 = vld [vmem:[%s10207_s3 + $0x148] sm:$0xff] }
 0x3e1   :  { %1668 = vmatmul.bf16.gmra.mxu0 %v5517_v62  ;;  %3185 = vmatpush.bf16.msrb.mxu3 %v7407_v3  ;;  %v5525_v62 = vor.u32 %v7269_v23, %v5524_v42  ;;  %v7399_v3 = vld [vmem:[%s10207_s3 + $0x128] sm:$0xff]  ;;  %v10422_v23 = vld [vmem:[#allocation9_spill] sm:$0xff] }
 0x3e2   :  { %v2635_v19 = vpack.c.bf16 %v2585_v59, %v2585_v59  ;;  %v2432_v12 = vmax.f32 %v2139_v41, %v10411_v18  ;;  %2177 = vmatmul.bf16.gmra.mxu1 %v5521_v58  ;;  %v5529_v58 = vor.u32 %v7268_v26, %v5526_v0  ;;  %v10423_v26 = vld [vmem:[#allocation85_spill] sm:$0xff] }
 0x3e3   :  { %v10424_v0 = vmax.f32 %v10422_v23, %v10423_v26 }
 0x3e4   :  { %v2718_v57 = vunpack.c.l.b16 %v2635_v19  ;;  %v2482_v48 = vmax.f32 %v10414_v63, %v2432_v12  ;;  %v7398_v19 = vld [vmem:[%s10207_s3 + $0x120] sm:$0xff]  ;;  %v10419_v12 = vld [vmem:[#allocation40_spill] sm:$0xff] }
 0x3e5   :  { %3186 = vmatpush.bf16.msrb.mxu3 %v7406_v5 }
 0x3e6   :  { %v1631_v21 = vpop.f32.mrf.mxu0  ;;  %v2719_v38 = vpack.c.b16 %v2718_v57, %v2717_v60  ;;  %v2536_v44 = vadd.f32 %v9100_v50, %v2482_v48  ;;  %v7397_v48 = vld [vmem:[%s10207_s3 + $0x118] sm:$0xff] }
 0x3e7   :  { %v2140_v16 = vpop.f32.mrf.mxu1 }
 0x3e8   :  { %v2141_v29 = vadd.f32 %v2140_v16, %v1631_v21  ;;  %2777 = vmatmul.bf16.vlgmr.msrb.gmra.mxu2 %v2719_v38  ;;  %v2586_v24 = vmax.f32 %v2536_v44, 0.0  ;;  %v9552_v38 = vld [vmem:[%s10208_s2] ss:$0 sm:$0xff] }
 0x3e9   :  { %3096 = vmatpush.bf16.msrb.mxu2 %v7401_v13  ;;  %3187 = vmatpush.bf16.msrb.mxu3 %v7405_v43 }
 0x3ea   :  { %v2433_v2 = vmax.f32 %v2141_v29, %v10415_v28  ;;  %v2636_v59 = vpack.c.bf16 %v2586_v24, %v2586_v24  ;;  %v7270_v28 = vld [vmem:[%s10206_s0 + $0x3e4] sm:$0xf] }
 0x3ec   :  { %v2483_v49 = vmax.f32 %v10418_v61, %v2433_v2  ;;  %v2870_v57 = vunpack.c.l.b16 %v2636_v59  ;;  %v5534_v2 = vld [vmem:[%s10206_s0 + $0x3e8] sm:$0xf0]  ;;  %v10425_v59 = vld [vmem:[#allocation44_spill] sm:$0xff] }
 0x3ed   :  { %3097 = vmatpush.bf16.msrb.mxu2 %v7400_v27  ;;  %3188 = vmatpush.bf16.msrb.mxu3 %v7404_v20  ;;  %v5532_v27 = vld [vmem:[%s10206_s0 + $0x3e0] sm:$0xf]  ;;  %v7271_v20 = vld [vmem:[%s10206_s0 + $0x3e4] sm:$0xf0] }
 0x3ee   :  { %v2537_v7 = vadd.f32 %v9100_v50, %v2483_v49  ;;  %v1634_v6 = vpop.f32.mrf.mxu0  ;;  %v7402_v50 = vld [vmem:[%s10207_s3 + $0x140] sm:$0xff]  ;;  %v5533_v4 = vor.u32 %v7271_v20, %v5532_v27  ;;  %v10430_v27 = vld [vmem:[#allocation12_spill] sm:$0xff]  ;;  %v10431_v20 = vld [vmem:[#allocation87_spill] sm:$0xff] }
 0x3ef   :  { %v2143_v11 = vpop.f32.mrf.mxu1 }
 0x3f0   :  { %v2587_v41 = vmax.f32 %v2537_v7, 0.0  ;;  %v2144_v5 = vadd.f32 %v2143_v11, %v1634_v6 }
 0x3f1   :  { %1673 = vmatmul.bf16.gmra.mxu0 %v5525_v62  ;;  %3098 = vmatpush.bf16.msrb.mxu2 %v7399_v3  ;;  %v5537_v62 = vor.u32 %v7270_v28, %v5534_v2  ;;  %v10432_v28 = vmax.f32 %v10430_v27, %v10431_v20  ;;  %v7410_v20 = vld [vmem:[%s10207_s3 + $0x180] sm:$0xff] }
 0x3f2   :  { %v2637_v18 = vpack.c.bf16 %v2587_v41, %v2587_v41  ;;  %v2434_v60 = vmax.f32 %v2144_v5, %v10419_v12  ;;  %2182 = vmatmul.bf16.gmra.mxu1 %v5529_v58  ;;  %3189 = vmatpush.bf16.msrb.mxu3 %v7403_v39  ;;  %v7394_v39 = vld [vmem:[%s10207_s3 + $0x100] sm:$0xff]  ;;  %v7417_v5 = vld [vmem:[%s10207_s3 + $0x1b8] sm:$0xff]  ;;  %v10426_v12 = vld [vmem:[#allocation11_spill] sm:$0xff] }
 0x3f4   :  { %v2871_v47 = vunpack.c.l.b16 %v2637_v18  ;;  %v2484_v63 = vmax.f32 %v10420_v56, %v2434_v60  ;;  %v10427_v60 = vld [vmem:[#allocation86_spill] sm:$0xff] }
 0x3f5   :  { %3099 = vmatpush.bf16.msrb.mxu2 %v7398_v19 }
 0x3f6   :  { %v2872_v13 = vpack.c.b16 %v2871_v47, %v2870_v57  ;;  %v1636_v43 = vpop.f32.mrf.mxu0  ;;  %3190 = vmatpush.bf16.msrb.mxu3 %v7402_v50  ;;  %v2538_v16 = vadd.f32 %v9552_v38, %v2484_v63  ;;  %v10428_v50 = vmax.f32 %v10426_v12, %v10427_v60  ;;  %v7425_v47 = vld [vmem:[%s10207_s3 + $0x1f8] sm:$0xff]  ;;  %v7412_v60 = vld [vmem:[%s10207_s3 + $0x190] sm:$0xff] }
 0x3f7   :  { %v2145_v21 = vpop.f32.mrf.mxu1 }
 0x3f8   :  { %v2146_v44 = vadd.f32 %v2145_v21, %v1636_v43  ;;  %2930 = vmatmul.bf16.vlgmr.msra.gmra.mxu2 %v2872_v13  ;;  %v2588_v42 = vmax.f32 %v2538_v16, 0.0  ;;  %v7424_v16 = vld [vmem:[%s10207_s3 + $0x1f0] sm:$0xff] }
 0x3f9   :  { %3100 = vmatpush.bf16.msrb.mxu2 %v7397_v48  ;;  %v7416_v48 = vld [vmem:[%s10207_s3 + $0x1b0] sm:$0xff] }
 0x3fa   :  { %v2435_v29 = vmax.f32 %v2146_v44, %v10421_v9  ;;  %v2638_v7 = vpack.c.bf16 %v2588_v42, %v2588_v42  ;;  %v10429_v44 = vld [vmem:[#allocation46_spill] sm:$0xff]  ;;  %v7415_v9 = vld [vmem:[%s10207_s3 + $0x1a8] sm:$0xff] }
 0x3fb   :  { %v7423_v42 = vld [vmem:[%s10207_s3 + $0x1e8] sm:$0xff] }
 0x3fc   :  { %v2485_v24 = vmax.f32 %v10424_v0, %v2435_v29  ;;  %v2957_v19 = vunpack.c.l.b16 %v2638_v7  ;;  %v7414_v0 = vld [vmem:[%s10207_s3 + $0x1a0] sm:$0xff] }
 0x3fd   :  { %3101 = vmatpush.bf16.msrb.mxu2 %v7396_v52 }
 0x3fe   :  { %v2539_v61 = vadd.f32 %v9552_v38, %v2485_v24  ;;  %v1639_v49 = vpop.f32.mrf.mxu0 }
 0x3ff   :  { %v2148_v3 = vpop.f32.mrf.mxu1 }
 0x400   :  { %v2589_v6 = vmax.f32 %v2539_v61, 0.0  ;;  %v2149_v58 = vadd.f32 %v2148_v3, %v1639_v49  ;;  %v7422_v49 = vld [vmem:[%s10207_s3 + $0x1e0] sm:$0xff]  ;;  %v10433_v3 = vld [vmem:[#allocation48_spill] sm:$0xff] }
 0x401   :  { %1678 = vmatmul.bf16.gmra.mxu0 %v5533_v4  ;;  %3102 = vmatpush.bf16.msrb.mxu2 %v7395_v40 }
 0x402   :  { %v2639_v11 = vpack.c.bf16 %v2589_v6, %v2589_v6  ;;  %v2436_v41 = vmax.f32 %v2149_v58, %v10425_v59  ;;  %2187 = vmatmul.bf16.gmra.mxu1 %v5537_v62  ;;  %v7413_v6 = vld [vmem:[%s10207_s3 + $0x198] sm:$0xff]  ;;  %v10435_v59 = vld [vmem:[#allocation88_spill] sm:$0xff] }
 0x404   :  { %v2958_v18 = vunpack.c.l.b16 %v2639_v11  ;;  %v2486_v57 = vmax.f32 %v10428_v50, %v2436_v41  ;;  %v10434_v11 = vld [vmem:[#allocation14_spill] sm:$0xff] }
 0x405   :  { %3103 = vmatpush.bf16.msrb.mxu2 %v7394_v39  ;;  %v10436_v41 = vmax.f32 %v10434_v11, %v10435_v59 }
 0x406   :  { %v2959_v56 = vpack.c.b16 %v2958_v18, %v2957_v19  ;;  %v1641_v63 = vpop.f32.mrf.mxu0  ;;  %v2540_v43 = vadd.f32 %v9552_v38, %v2486_v57  ;;  %v7421_v19 = vld [vmem:[%s10207_s3 + $0x1d8] sm:$0xff] }
 0x407   :  { %v2150_v13 = vpop.f32.mrf.mxu1 }
 0x408   :  { %v2151_v21 = vadd.f32 %v2150_v13, %v1641_v63  ;;  %3017 = vmatmul.bf16.vlgmr.msra.gmra.mxu3 %v2959_v56  ;;  %v2590_v29 = vmax.f32 %v2540_v43, 0.0  ;;  %v7420_v56 = vld [vmem:[%s10207_s3 + $0x1d0] sm:$0xff]  ;;  %v10437_v63 = vld [vmem:[#allocation50_spill] sm:$0xff]  ;;  %v7411_v13 = vld [vmem:[%s10207_s3 + $0x188] sm:$0xff] }
 0x409   :  { %3270 = vmatpush.bf16.msra.mxu2 %v7417_v5  ;;  %3357 = vmatpush.bf16.msra.mxu3 %v7425_v47 }
 0x40a   :  { %v2437_v52 = vmax.f32 %v2151_v21, %v10429_v44  ;;  %v2640_v4 = vpack.c.bf16 %v2590_v29, %v2590_v29  ;;  %v10438_v21 = vld [vmem:[#allocation15_spill] sm:$0xff] }
 0x40c   :  { %v2487_v2 = vmax.f32 %v10432_v28, %v2437_v52  ;;  %v3044_v58 = vunpack.c.l.b16 %v2640_v4  ;;  %v10441_v4 = vld [vmem:[#allocation52_spill] sm:$0xff] }
 0x40d   :  { %3271 = vmatpush.bf16.msra.mxu2 %v7416_v48  ;;  %3358 = vmatpush.bf16.msra.mxu3 %v7424_v16  ;;  %v10439_v16 = vld [vmem:[#allocation89_spill] sm:$0xff] }
 0x40e   :  { %v2541_v23 = vadd.f32 %v9552_v38, %v2487_v2  ;;  %v1644_v26 = vpop.f32.mrf.mxu0  ;;  %v10440_v44 = vmax.f32 %v10438_v21, %v10439_v16  ;;  %v7433_v2 = vld [vmem:[%s10207_s3 + $0x238] sm:$0xff] }
 0x40f   :  { %v2153_v24 = vpop.f32.mrf.mxu1 }
 0x410   :  { %v2591_v40 = vmax.f32 %v2541_v23, 0.0  ;;  %v2154_v61 = vadd.f32 %v2153_v24, %v1644_v26 }
 0x411   :  { %3272 = vmatpush.bf16.msra.mxu2 %v7415_v9  ;;  %3359 = vmatpush.bf16.msra.mxu3 %v7423_v42  ;;  %v7419_v9 = vld [vmem:[%s10207_s3 + $0x1c8] sm:$0xff] }
 0x412   :  { %v2641_v62 = vpack.c.bf16 %v2591_v40, %v2591_v40  ;;  %v2438_v7 = vmax.f32 %v2154_v61, %v10433_v3  ;;  %v7432_v61 = vld [vmem:[%s10207_s3 + $0x230] sm:$0xff]  ;;  %v10442_v3 = vld [vmem:[#allocation17_spill] sm:$0xff] }
 0x414   :  { %v3045_v39 = vunpack.c.l.b16 %v2641_v62  ;;  %v2488_v5 = vmax.f32 %v10436_v41, %v2438_v7  ;;  %v10443_v7 = vld [vmem:[#allocation90_spill] sm:$0xff] }
 0x415   :  { %3273 = vmatpush.bf16.msra.mxu2 %v7414_v0  ;;  %3360 = vmatpush.bf16.msra.mxu3 %v7422_v49  ;;  %v7418_v0 = vld [vmem:[%s10207_s3 + $0x1c0] sm:$0xff] }
 0x416   :  { %v3046_v18 = vpack.c.b16 %v3045_v39, %v3044_v58  ;;  %v1646_v12 = vpop.f32.mrf.mxu0  ;;  %v2542_v57 = vadd.f32 %v9552_v38, %v2488_v5  ;;  %v7441_v39 = vld [vmem:[%s10207_s3 + $0x278] sm:$0xff]  ;;  %v7431_v5 = vld [vmem:[%s10207_s3 + $0x228] sm:$0xff] }
 0x417   :  { %v2155_v50 = vpop.f32.mrf.mxu1 }
 0x418   :  { %v2156_v47 = vadd.f32 %v2155_v50, %v1646_v12  ;;  %3104 = vmatmul.bf16.vlgmr.msrb.gmra.mxu2 %v3046_v18  ;;  %v2592_v43 = vmax.f32 %v2542_v57, 0.0  ;;  %v7440_v12 = vld [vmem:[%s10207_s3 + $0x270] sm:$0xff]  ;;  %v7430_v57 = vld [vmem:[%s10207_s3 + $0x220] sm:$0xff] }
 0x419   :  { %3274 = vmatpush.bf16.msra.mxu2 %v7413_v6  ;;  %3361 = vmatpush.bf16.msra.mxu3 %v7421_v19  ;;  %v10444_v6 = vmax.f32 %v10442_v3, %v10443_v7  ;;  %v7427_v7 = vld [vmem:[%s10207_s3 + $0x208] sm:$0xff] }
 0x41a   :  { %v2439_v48 = vmax.f32 %v2156_v47, %v10437_v63  ;;  %v2642_v42 = vpack.c.bf16 %v2592_v43, %v2592_v43  ;;  %v10447_v63 = vld [vmem:[#allocation91_spill] sm:$0xff] }
 0x41b   :  { %v7439_v43 = vld [vmem:[%s10207_s3 + $0x268] sm:$0xff] }
 0x41c   :  { %v2489_v52 = vmax.f32 %v10440_v44, %v2439_v48  ;;  %v3131_v49 = vunpack.c.l.b16 %v2642_v42 }
 0x41d   :  { %3275 = vmatpush.bf16.msra.mxu2 %v7412_v60  ;;  %3362 = vmatpush.bf16.msra.mxu3 %v7420_v56  ;;  %v10445_v60 = vld [vmem:[#allocation54_spill] sm:$0xff] }
 0x41e   :  { %v2543_v29 = vadd.f32 %v9552_v38, %v2489_v52  ;;  %v1649_v27 = vpop.f32.mrf.mxu0  ;;  %v10446_v56 = vld [vmem:[#allocation18_spill] sm:$0xff]  ;;  %v7429_v52 = vld [vmem:[%s10207_s3 + $0x218] sm:$0xff] }
 0x41f   :  { %v2158_v28 = vpop.f32.mrf.mxu1  ;;  %v10448_v48 = vmax.f32 %v10446_v56, %v10447_v63 }
 0x420   :  { %v2593_v23 = vmax.f32 %v2543_v29, 0.0  ;;  %v2159_v26 = vadd.f32 %v2158_v28, %v1649_v27 }
 0x421   :  { %3276 = vmatpush.bf16.msra.mxu2 %v7411_v13  ;;  %3363 = vmatpush.bf16.msra.mxu3 %v7419_v9 }
 0x422   :  { %v2643_v24 = vpack.c.bf16 %v2593_v23, %v2593_v23  ;;  %v2440_v40 = vmax.f32 %v2159_v26, %v10441_v4  ;;  %v7428_v23 = vld [vmem:[%s10207_s3 + $0x210] sm:$0xff] }
 0x424   :  { %v3132_v62 = vunpack.c.l.b16 %v2643_v24  ;;  %v2490_v58 = vmax.f32 %v10444_v6, %v2440_v40  ;;  %v10450_v24 = vld [vmem:[#allocation92_spill] sm:$0xff] }
 0x425   :  { %3277 = vmatpush.bf16.msra.mxu2 %v7410_v20  ;;  %3364 = vmatpush.bf16.msra.mxu3 %v7418_v0  ;;  %v7438_v20 = vld [vmem:[%s10207_s3 + $0x260] sm:$0xff]  ;;  %v10451_v4 = vmax.f32 %v8137_v14, %v10450_v24  ;;  %v7436_v14 = vld [vmem:[%s10207_s3 + $0x250] sm:$0xff] }
 0x426   :  { %v3133_v11 = vpack.c.b16 %v3132_v62, %v3131_v49  ;;  %v1651_v59 = vpop.f32.mrf.mxu0  ;;  %v2544_v19 = vadd.f32 %v9552_v38, %v2490_v58 }
 0x427   :  { %v2160_v41 = vpop.f32.mrf.mxu1 }
 0x428   :  { %v2161_v18 = vadd.f32 %v2160_v41, %v1651_v59  ;;  %3191 = vmatmul.bf16.vlgmr.msrb.gmra.mxu3 %v3133_v11  ;;  %v2594_v47 = vmax.f32 %v2544_v19, 0.0  ;;  %v7426_v59 = vld [vmem:[%s10207_s3 + $0x200] sm:$0xff]  ;;  %v10454_v19 = vld [vmem:[#allocation93_spill] sm:$0xff] }
 0x429   :  { %3444 = vmatpush.bf16.msrb.mxu2 %v7433_v2  ;;  %3531 = vmatpush.bf16.msrb.mxu3 %v7441_v39  ;;  %v10449_v2 = vld [vmem:[#allocation56_spill] sm:$0xff]  ;;  %v10452_v39 = vld [vmem:[#allocation58_spill] sm:$0xff] }
 0x42a   :  { %v2441_v50 = vmax.f32 %v2161_v18, %v10445_v60  ;;  %v2644_v9 = vpack.c.bf16 %v2594_v47, %v2594_v47  ;;  %v7449_v60 = vld [vmem:[%s10207_s3 + $0x2b8] sm:$0xff] }
 0x42c   :  { %v2491_v13 = vmax.f32 %v10448_v48, %v2441_v50  ;;  %v3218_v26 = vunpack.c.l.b16 %v2644_v9  ;;  %v7435_v50 = vld [vmem:[%s10207_s3 + $0x248] sm:$0xff] }
 0x42d   :  { %3445 = vmatpush.bf16.msrb.mxu2 %v7432_v61  ;;  %3532 = vmatpush.bf16.msrb.mxu3 %v7440_v12  ;;  %v7437_v61 = vld [vmem:[%s10207_s3 + $0x258] sm:$0xff] }
 0x42e   :  { %v2545_v21 = vadd.f32 %v9552_v38, %v2491_v13  ;;  %v1654_v16 = vpop.f32.mrf.mxu0 }
 0x42f   :  { %v2163_v44 = vpop.f32.mrf.mxu1 }
 0x430   :  { %v2595_v29 = vmax.f32 %v2545_v21, 0.0  ;;  %v2164_v27 = vadd.f32 %v2163_v44, %v1654_v16  ;;  %v7434_v21 = vld [vmem:[%s10207_s3 + $0x240] sm:$0xff]  ;;  %v10456_v44 = vld [vmem:[#allocation60_spill] sm:$0xff] }
 0x431   :  { %3446 = vmatpush.bf16.msrb.mxu2 %v7431_v5  ;;  %3533 = vmatpush.bf16.msrb.mxu3 %v7439_v43  ;;  %v10453_v5 = vld [vmem:[#allocation20_spill] sm:$0xff] }
 0x432   :  { %v2645_v28 = vpack.c.bf16 %v2595_v29, %v2595_v29  ;;  %v2442_v42 = vmax.f32 %v2164_v27, %v10449_v2  ;;  %v10455_v18 = vmax.f32 %v10453_v5, %v10454_v19  ;;  %v7448_v43 = vld [vmem:[%s10207_s3 + $0x2b0] sm:$0xff]  ;;  %v10457_v27 = vmax.f32 %v8169_v55, %v8987_v22  ;;  %v7457_v2 = vld [vmem:[%s10207_s3 + $0x2f8] sm:$0xff]  ;;  %v7446_v55 = vld [vmem:[%s10207_s3 + $0x2a0] sm:$0xff] }
 0x433   :  { %v7456_v22 = vld [vmem:[%s10207_s3 + $0x2f0] sm:$0xff] }
 0x434   :  { %v3219_v0 = vunpack.c.l.b16 %v2645_v28  ;;  %v2492_v40 = vmax.f32 %v10451_v4, %v2442_v42  ;;  %v7447_v28 = vld [vmem:[%s10207_s3 + $0x2a8] sm:$0xff]  ;;  %v10458_v4 = vld [vmem:[#allocation62_spill] sm:$0xff]  ;;  %v7444_v19 = vld [vmem:[%s10207_s3 + $0x290] sm:$0xff] }
 0x435   :  { %3447 = vmatpush.bf16.msrb.mxu2 %v7430_v57  ;;  %3534 = vmatpush.bf16.msrb.mxu3 %v7438_v20 }
 0x436   :  { %v3220_v49 = vpack.c.b16 %v3219_v0, %v3218_v26  ;;  %v1656_v62 = vpop.f32.mrf.mxu0  ;;  %v2546_v6 = vadd.f32 %v9552_v38, %v2492_v40 }
 0x437   :  { %v2165_v3 = vpop.f32.mrf.mxu1 }
 0x438   :  { %v2166_v58 = vadd.f32 %v2165_v3, %v1656_v62  ;;  %3278 = vmatmul.bf16.vlgmr.msra.gmra.mxu2 %v3220_v49  ;;  %v2596_v41 = vmax.f32 %v2546_v6, 0.0  ;;  %v10459_v49 = vld [vmem:[#allocation23_spill] sm:$0xff]  ;;  %v10460_v62 = vld [vmem:[#allocation94_spill] sm:$0xff]  ;;  %v7445_v6 = vld [vmem:[%s10207_s3 + $0x298] sm:$0xff] }
 0x439   :  { %3448 = vmatpush.bf16.msrb.mxu2 %v7429_v52  ;;  %3535 = vmatpush.bf16.msrb.mxu3 %v7437_v61  ;;  %v10461_v3 = vmax.f32 %v10459_v49, %v10460_v62  ;;  %v7450_v49 = vld [vmem:[%s10207_s3 + $0x2c0] sm:$0xff] }
 0x43a   :  { %v2443_v11 = vmax.f32 %v2166_v58, %v10452_v39  ;;  %v2646_v63 = vpack.c.bf16 %v2596_v41, %v2596_v41  ;;  %v7455_v58 = vld [vmem:[%s10207_s3 + $0x2e8] sm:$0xff] }
 0x43c   :  { %v2493_v12 = vmax.f32 %v10455_v18, %v2443_v11  ;;  %v3305_v9 = vunpack.c.l.b16 %v2646_v63  ;;  %v7454_v18 = vld [vmem:[%s10207_s3 + $0x2e0] sm:$0xff] }
 0x43d   :  { %3449 = vmatpush.bf16.msrb.mxu2 %v7428_v23  ;;  %3536 = vmatpush.bf16.msrb.mxu3 %v7436_v14 }
 0x43e   :  { %v2547_v57 = vadd.f32 %v9552_v38, %v2493_v12  ;;  %v1659_v47 = vpop.f32.mrf.mxu0 }
 0x43f   :  { %v2168_v56 = vpop.f32.mrf.mxu1 }
 0x440   :  { %v2597_v48 = vmax.f32 %v2547_v57, 0.0  ;;  %v2169_v13 = vadd.f32 %v2168_v56, %v1659_v47  ;;  %v10463_v56 = vmax.f32 %v8201_v36, %v9007_v45  ;;  %v7442_v36 = vld [vmem:[%s10207_s3 + $0x280] sm:$0xff]  ;;  %v7452_v45 = vld [vmem:[%s10207_s3 + $0x2d0] sm:$0xff] }
 0x441   :  { %3450 = vmatpush.bf16.msrb.mxu2 %v7427_v7  ;;  %3537 = vmatpush.bf16.msrb.mxu3 %v7435_v50 }
 0x442   :  { %v2647_v16 = vpack.c.bf16 %v2597_v48, %v2597_v48  ;;  %v2444_v52 = vmax.f32 %v2169_v13, %v10456_v44  ;;  %v7443_v48 = vld [vmem:[%s10207_s3 + $0x288] sm:$0xff]  ;;  %v7453_v13 = vld [vmem:[%s10207_s3 + $0x2d8] sm:$0xff] }
 0x444   :  { %v3306_v29 = vunpack.c.l.b16 %v2647_v16  ;;  %v2494_v20 = vmax.f32 %v10457_v27, %v2444_v52  ;;  %v7465_v27 = vld [vmem:[%s10207_s3 + $0x338] sm:$0xff] }
 0x445   :  { %3451 = vmatpush.bf16.msrb.mxu2 %v7426_v59  ;;  %3538 = vmatpush.bf16.msrb.mxu3 %v7434_v21 }
 0x446   :  { %v3307_v42 = vpack.c.b16 %v3306_v29, %v3305_v9  ;;  %v1661_v23 = vpop.f32.mrf.mxu0  ;;  %v2548_v0 = vadd.f32 %v9552_v38, %v2494_v20  ;;  %v10464_v9 = vld [vmem:[#allocation66_spill] sm:$0xff] }
 0x447   :  { %v2170_v26 = vpop.f32.mrf.mxu1 }
 0x448   :  { %v2171_v24 = vadd.f32 %v2170_v26, %v1661_v23  ;;  %3365 = vmatmul.bf16.vlgmr.msra.gmra.mxu3 %v3307_v42  ;;  %v2598_v61 = vmax.f32 %v2548_v0, 0.0  ;;  %v7451_v26 = vld [vmem:[%s10207_s3 + $0x2c8] sm:$0xff] }
 0x449   :  { %3618 = vmatpush.bf16.msra.mxu2 %v7449_v60  ;;  %3705 = vmatpush.bf16.msra.mxu3 %v7457_v2  ;;  %v10462_v60 = vld [vmem:[#allocation64_spill] sm:$0xff]  ;;  %v10466_v2 = vld [vmem:[#allocation95_spill] sm:$0xff] }
 0x44a   :  { %v2445_v40 = vmax.f32 %v2171_v24, %v10458_v4  ;;  %v2648_v59 = vpack.c.bf16 %v2598_v61, %v2598_v61 }
 0x44c   :  { %v2495_v7 = vmax.f32 %v10461_v3, %v2445_v40  ;;  %v3392_v57 = vunpack.c.l.b16 %v2648_v59  ;;  %v10468_v3 = vld [vmem:[#allocation68_spill] sm:$0xff] }
 0x44d   :  { %3619 = vmatpush.bf16.msra.mxu2 %v7448_v43  ;;  %3706 = vmatpush.bf16.msra.mxu3 %v7456_v22 }
 0x44e   :  { %v2549_v14 = vadd.f32 %v9552_v38, %v2495_v7  ;;  %v1664_v39 = vpop.f32.mrf.mxu0 }
 0x44f   :  { %v2173_v11 = vpop.f32.mrf.mxu1 }
 0x450   :  { %v2599_v41 = vmax.f32 %v2549_v14, 0.0  ;;  %v2174_v5 = vadd.f32 %v2173_v11, %v1664_v39  ;;  %v10469_v39 = vld [vmem:[#allocation96_spill] sm:$0xff] }
 0x451   :  { %3620 = vmatpush.bf16.msra.mxu2 %v7447_v28  ;;  %3707 = vmatpush.bf16.msra.mxu3 %v7455_v58  ;;  %v10465_v28 = vld [vmem:[#allocation26_spill] sm:$0xff]  ;;  %v10470_v11 = vmax.f32 %v8233_v30, %v10469_v39  ;;  %v7472_v30 = vld [vmem:[%s10207_s3 + $0x370] sm:$0xff] }
 0x452   :  { %v2649_v12 = vpack.c.bf16 %v2599_v41, %v2599_v41  ;;  %v2446_v50 = vmax.f32 %v2174_v5, %v10462_v60  ;;  %v10467_v42 = vmax.f32 %v10465_v28, %v10466_v2  ;;  %v7473_v41 = vld [vmem:[%s10207_s3 + $0x378] sm:$0xff]  ;;  %v10477_v39 = vld [vmem:[#allocation74_spill] sm:$0xff] }
 0x454   :  { %v3393_v47 = vunpack.c.l.b16 %v2649_v12  ;;  %v2496_v63 = vmax.f32 %v10463_v56, %v2446_v50  ;;  %v7461_v56 = vld [vmem:[%s10207_s3 + $0x318] sm:$0xff] }
 0x455   :  { %3621 = vmatpush.bf16.msra.mxu2 %v7446_v55  ;;  %3708 = vmatpush.bf16.msra.mxu3 %v7454_v18  ;;  %v7464_v55 = vld [vmem:[%s10207_s3 + $0x330] sm:$0xff]  ;;  %v7462_v18 = vld [vmem:[%s10207_s3 + $0x320] sm:$0xff] }
 0x456   :  { %v3394_v43 = vpack.c.b16 %v3393_v47, %v3392_v57  ;;  %v1666_v21 = vpop.f32.mrf.mxu0  ;;  %v2550_v44 = vadd.f32 %v9552_v38, %v2496_v63  ;;  %v10471_v57 = vld [vmem:[#allocation70_spill] sm:$0xff] }
 0x457   :  { %v2175_v16 = vpop.f32.mrf.mxu1 }
 0x458   :  { %v2176_v52 = vadd.f32 %v2175_v16, %v1666_v21  ;;  %3452 = vmatmul.bf16.vlgmr.msrb.gmra.mxu2 %v3394_v43  ;;  %v2600_v20 = vmax.f32 %v2550_v44, 0.0  ;;  %v10472_v43 = vld [vmem:[#allocation29_spill] sm:$0xff] }
 0x459   :  { %3622 = vmatpush.bf16.msra.mxu2 %v7445_v6  ;;  %3709 = vmatpush.bf16.msra.mxu3 %v7453_v13  ;;  %v7463_v6 = vld [vmem:[%s10207_s3 + $0x328] sm:$0xff]  ;;  %v10473_v21 = vld [vmem:[#allocation97_spill] sm:$0xff] }
 0x45a   :  { %v2447_v29 = vmax.f32 %v2176_v52, %v10464_v9  ;;  %v2650_v4 = vpack.c.bf16 %v2600_v20, %v2600_v20  ;;  %v10474_v16 = vmax.f32 %v10472_v43, %v10473_v21  ;;  %v10480_v21 = vld [vmem:[#allocation76_spill] sm:$0xff] }
 0x45b   :  { %v2846_v63 = vpop.f32.mrf.mxu3 }
 0x45c   :  { %v2497_v23 = vmax.f32 %v10467_v42, %v2447_v29  ;;  %v3479_v58 = vunpack.c.l.b16 %v2650_v4  ;;  %v7460_v29 = vld [vmem:[%s10207_s3 + $0x310] sm:$0xff]  ;;  %v7470_v42 = vld [vmem:[%s10207_s3 + $0x360] sm:$0xff] }
 0x45d   :  { %3623 = vmatpush.bf16.msra.mxu2 %v7444_v19  ;;  %3710 = vmatpush.bf16.msra.mxu3 %v7452_v45 }
 0x45e   :  { %v2551_v0 = vadd.f32 %v9552_v38, %v2497_v23  ;;  %v1669_v24 = vpop.f32.mrf.mxu0 }
 0x45f   :  { %v2178_v22 = vpop.f32.mrf.mxu1 }
 0x460   :  { %v2601_v40 = vmax.f32 %v2551_v0, 0.0  ;;  %v2179_v61 = vadd.f32 %v2178_v22, %v1669_v24  ;;  %v7459_v24 = vld [vmem:[%s10207_s3 + $0x308] sm:$0xff] }
 0x461   :  { %3624 = vmatpush.bf16.msra.mxu2 %v7443_v48  ;;  %3711 = vmatpush.bf16.msra.mxu3 %v7451_v26  ;;  %v10475_v26 = vld [vmem:[#allocation72_spill] sm:$0xff] }
 0x462   :  { %v2651_v62 = vpack.c.bf16 %v2601_v40, %v2601_v40  ;;  %v2448_v7 = vmax.f32 %v2179_v61, %v10468_v3  ;;  %v10476_v40 = vmax.f32 %v8265_v33, %v9050_v46 }
 0x464   :  { %v3480_v14 = vunpack.c.l.b16 %v2651_v62  ;;  %v2498_v59 = vmax.f32 %v10470_v11, %v2448_v7  ;;  %v7458_v7 = vld [vmem:[%s10207_s3 + $0x300] sm:$0xff] }
 0x465   :  { %3625 = vmatpush.bf16.msra.mxu2 %v7442_v36  ;;  %3712 = vmatpush.bf16.msra.mxu3 %v7450_v49  ;;  %v7471_v36 = vld [vmem:[%s10207_s3 + $0x368] sm:$0xff]  ;;  %v7469_v49 = vld [vmem:[%s10207_s3 + $0x358] sm:$0xff] }
 0x466   :  { %v3481_v5 = vpack.c.b16 %v3480_v14, %v3479_v58  ;;  %v1671_v19 = vpop.f32.mrf.mxu0  ;;  %v2552_v60 = vadd.f32 %v9552_v38, %v2498_v59  ;;  %v7481_v58 = vld [vmem:[%s10207_s3 + $0x3b8] sm:$0xff]  ;;  %v7468_v14 = vld [vmem:[%s10207_s3 + $0x350] sm:$0xff] }
 0x467   :  { %v2180_v12 = vpop.f32.mrf.mxu1 }
 0x468   :  { %v2181_v50 = vadd.f32 %v2180_v12, %v1671_v19  ;;  %3539 = vmatmul.bf16.vlgmr.msrb.gmra.mxu3 %v3481_v5  ;;  %v2602_v13 = vmax.f32 %v2552_v60, 0.0  ;;  %v10478_v19 = vld [vmem:[#allocation98_spill] sm:$0xff] }
 0x469   :  { %3792 = vmatpush.bf16.msrb.mxu2 %v7465_v27  ;;  %3879 = vmatpush.bf16.msrb.mxu3 %v7473_v41  ;;  %v7480_v41 = vld [vmem:[%s10207_s3 + $0x3b0] sm:$0xff] }
 0x46a   :  { %v2449_v47 = vmax.f32 %v2181_v50, %v10471_v57  ;;  %v2652_v20 = vpack.c.bf16 %v2602_v13, %v2602_v13  ;;  %v7467_v50 = vld [vmem:[%s10207_s3 + $0x348] sm:$0xff] }
 0x46b   :  { %v2778_v48 = vpop.f32.mrf.mxu2 }
 0x46c   :  { %v2499_v44 = vmax.f32 %v10474_v16, %v2449_v47  ;;  %v2847_v52 = vadd.f32 %v2846_v63, %v2778_v48  ;;  %v3566_v22 = vunpack.c.l.b16 %v2652_v20  ;;  %v7489_v20 = vld [vmem:[%s10207_s3 + $0x3f8] sm:$0xff] }
 0x46d   :  { %3793 = vmatpush.bf16.msrb.mxu2 %v7464_v55  ;;  %3880 = vmatpush.bf16.msrb.mxu3 %v7472_v30 }
 0x46e   :  { %v2553_v45 = vadd.f32 %v9552_v38, %v2499_v44  ;;  %v1674_v9 = vpop.f32.mrf.mxu0  ;;  %v2848_v44 = vpop.f32.mrf.mxu3 }
 0x46f   :  { %v2183_v27 = vpop.f32.mrf.mxu1 }
 0x470   :  { %v2603_v28 = vmax.f32 %v2553_v45, 0.0  ;;  %v2184_v2 = vadd.f32 %v2183_v27, %v1674_v9  ;;  %v10481_v9 = vld [vmem:[#allocation99_spill] sm:$0xff] }
 0x471   :  { %3794 = vmatpush.bf16.msrb.mxu2 %v7463_v6  ;;  %3881 = vmatpush.bf16.msrb.mxu3 %v7471_v36 }
 0x472   :  { %v2653_v23 = vpack.c.bf16 %v2603_v28, %v2603_v28  ;;  %v2450_v0 = vmax.f32 %v2184_v2, %v10475_v26 }
 0x473   :  { %v9829_v55 = vpop.f32.mrf.mxu2 }
 0x474   :  { %v3567_v4 = vunpack.c.l.b16 %v2653_v23  ;;  %v2500_v61 = vmax.f32 %v10476_v40, %v2450_v0  ;;  %v7477_v23 = vld [vmem:[%s10207_s3 + $0x398] sm:$0xff]  ;;  %v7476_v40 = vld [vmem:[%s10207_s3 + $0x390] sm:$0xff] }
 0x475   :  { %3795 = vmatpush.bf16.msrb.mxu2 %v7462_v18  ;;  %3882 = vmatpush.bf16.msrb.mxu3 %v7470_v42  ;;  %v10479_v18 = vmax.f32 %v8269_v51, %v10478_v19  ;;  %v7466_v51 = vld [vmem:[%s10207_s3 + $0x340] sm:$0xff] }
 0x476   :  { %v3568_v62 = vpack.c.b16 %v3567_v4, %v3566_v22  ;;  %v1676_v3 = vpop.f32.mrf.mxu0  ;;  %v2554_v33 = vadd.f32 %v9552_v38, %v2500_v61 }
 0x477   :  { %v2185_v6 = vpop.f32.mrf.mxu1 }
 0x478   :  { %v2186_v46 = vadd.f32 %v2185_v6, %v1676_v3  ;;  %3626 = vmatmul.bf16.vlgmr.msra.gmra.mxu2 %v3568_v62  ;;  %v2604_v5 = vmax.f32 %v2554_v33, 0.0  ;;  %v10485_v62 = vld [vmem:[#allocation100_spill] sm:$0xff] }
 0x479   :  { %3796 = vmatpush.bf16.msrb.mxu2 %v7461_v56  ;;  %3883 = vmatpush.bf16.msrb.mxu3 %v7469_v49  ;;  %v7479_v56 = vld [vmem:[%s10207_s3 + $0x3a8] sm:$0xff]  ;;  %v10484_v49 = vld [vmem:[#allocation34_spill] sm:$0xff] }
 0x47a   :  { %v2451_v11 = vmax.f32 %v2186_v46, %v10477_v39  ;;  %v2654_v63 = vpack.c.bf16 %v2604_v5, %v2604_v5  ;;  %v10486_v3 = vmax.f32 %v10484_v49, %v10485_v62  ;;  %v7475_v46 = vld [vmem:[%s10207_s3 + $0x388] sm:$0xff]  ;;  %v7474_v5 = vld [vmem:[%s10207_s3 + $0x380] sm:$0xff]  ;;  %v7509_v49 = vld [vmem:[%s10207_s3 + $0x498] sm:$0xff] }
 0x47b   :  { %v2931_v59 = vpop.f32.mrf.mxu2 }
 0x47c   :  { %v2501_v12 = vmax.f32 %v10479_v18, %v2451_v11  ;;  %v2936_v60 = vadd.f32 %v2931_v59, %v2847_v52  ;;  %v7478_v52 = vld [vmem:[%s10207_s3 + $0x3a0] sm:$0xff]  ;;  %v3653_v36 = vunpack.c.l.b16 %v2654_v63  ;;  %v7485_v18 = vld [vmem:[%s10207_s3 + $0x3d8] sm:$0xff]  ;;  %v2849_v63 = vadd.f32 %v2848_v44, %v9829_v55  ;;  %v7504_v44 = vld [vmem:[%s10207_s3 + $0x470] sm:$0xff] }
 0x47d   :  { %3797 = vmatpush.bf16.msrb.mxu2 %v7460_v29  ;;  %3884 = vmatpush.bf16.msrb.mxu3 %v7468_v14  ;;  %v10482_v29 = vmax.f32 %v8297_v34, %v10481_v9  ;;  %v7488_v34 = vld [vmem:[%s10207_s3 + $0x3f0] sm:$0xff]  ;;  %v7486_v11 = vld [vmem:[%s10207_s3 + $0x3e0] sm:$0xff]  ;;  %v7493_v55 = vld [vmem:[%s10207_s3 + $0x418] sm:$0xff] }
 0x47e   :  { %v2555_v30 = vadd.f32 %v9552_v38, %v2501_v12  ;;  %v1679_v57 = vpop.f32.mrf.mxu0  ;;  %v7497_v12 = vld [vmem:[%s10207_s3 + $0x438] sm:$0xff]  ;;  %v7503_v9 = vld [vmem:[%s10207_s3 + $0x468] sm:$0xff] }
 0x47f   :  { %v2188_v47 = vpop.f32.mrf.mxu1 }
 0x480   :  { %v2605_v48 = vmax.f32 %v2555_v30, 0.0  ;;  %v2189_v13 = vadd.f32 %v2188_v47, %v1679_v57  ;;  %v7496_v30 = vld [vmem:[%s10207_s3 + $0x430] sm:$0xff] }
 0x481   :  { %3798 = vmatpush.bf16.msrb.mxu2 %v7459_v24  ;;  %3885 = vmatpush.bf16.msrb.mxu3 %v7467_v50  ;;  %v10483_v24 = vld [vmem:[#allocation78_spill] sm:$0xff]  ;;  %v7484_v50 = vld [vmem:[%s10207_s3 + $0x3d0] sm:$0xff] }
 0x482   :  { %v2655_v43 = vpack.c.bf16 %v2605_v48, %v2605_v48  ;;  %v2452_v16 = vmax.f32 %v2189_v13, %v10480_v21 }
 0x484   :  { %v3654_v45 = vunpack.c.l.b16 %v2655_v43  ;;  %v2502_v27 = vmax.f32 %v10482_v29, %v2452_v16  ;;  %v7494_v43 = vld [vmem:[%s10207_s3 + $0x420] sm:$0xff]  ;;  %v7505_v16 = vld [vmem:[%s10207_s3 + $0x478] sm:$0xff] }
 0x485   :  { %3799 = vmatpush.bf16.msrb.mxu2 %v7458_v7  ;;  %3886 = vmatpush.bf16.msrb.mxu3 %v7466_v51  ;;  %v7482_v51 = vld [vmem:[%s10207_s3 + $0x3c0] sm:$0xff] }
 0x486   :  { %v3655_v28 = vpack.c.b16 %v3654_v45, %v3653_v36  ;;  %v1681_v2 = vpop.f32.mrf.mxu0  ;;  %v2556_v26 = vadd.f32 %v9552_v38, %v2502_v27  ;;  %v7492_v45 = vld [vmem:[%s10207_s3 + $0x410] sm:$0xff] }
 0x487   :  { %v2190_v42 = vpop.f32.mrf.mxu1 }
 0x488   :  { %v2191_v0 = vadd.f32 %v2190_v42, %v1681_v2  ;;  %3713 = vmatmul.bf16.vlgmr.msra.gmra.mxu3 %v3655_v28  ;;  %v2606_v61 = vmax.f32 %v2556_v26, 0.0  ;;  %v7501_v28 = vld [vmem:[%s10207_s3 + $0x458] sm:$0xff]  ;;  %v7500_v26 = vld [vmem:[%s10207_s3 + $0x450] sm:$0xff] }
 0x489   :  { %3966 = vmatpush.bf16.msra.mxu2 %v7481_v58  ;;  %4053 = vmatpush.bf16.msra.mxu3 %v7489_v20  ;;  %v7487_v58 = vld [vmem:[%s10207_s3 + $0x3e8] sm:$0xff]  ;;  %v7513_v2 = vld [vmem:[%s10207_s3 + $0x4b8] sm:$0xff] }
 0x48a   :  { %v2453_v22 = vmax.f32 %v2191_v0, %v10483_v24  ;;  %v2656_v14 = vpack.c.bf16 %v2606_v61, %v2606_v61  ;;  %v7491_v20 = vld [vmem:[%s10207_s3 + $0x408] sm:$0xff]  ;;  %v7512_v0 = vld [vmem:[%s10207_s3 + $0x4b0] sm:$0xff]  ;;  %v7521_v61 = vld [vmem:[%s10207_s3 + $0x4f8] sm:$0xff] }
 0x48b   :  { %v3018_v4 = vpop.f32.mrf.mxu3  ;;  %v7511_v24 = vld [vmem:[%s10207_s3 + $0x4a8] sm:$0xff] }
 0x48c   :  { %v2503_v7 = vmax.f32 %v10486_v3, %v2453_v22  ;;  %v3023_v6 = vadd.f32 %v3018_v4, %v2936_v60  ;;  %v7520_v3 = vld [vmem:[%s10207_s3 + $0x4f0] sm:$0xff] }
 0x48d   :  { %3967 = vmatpush.bf16.msra.mxu2 %v7480_v41  ;;  %4054 = vmatpush.bf16.msra.mxu3 %v7488_v34  ;;  %v2933_v41 = vpop.f32.mrf.mxu2  ;;  %v7499_v34 = vld [vmem:[%s10207_s3 + $0x448] sm:$0xff] }
 0x48e   :  { %v2557_v33 = vadd.f32 %v9552_v38, %v2503_v7  ;;  %v3740_v38 = vunpack.c.l.b16 %v2656_v14  ;;  %v2937_v13 = vadd.f32 %v2933_v41, %v2849_v63  ;;  %v7524_v63 = vld [vmem:[%s10207_s3 + $0x510] sm:$0xff] }
 0x490   :  { %v2607_v39 = vmax.f32 %v2557_v33, 0.0  ;;  %v7507_v33 = vld [vmem:[%s10207_s3 + $0x488] sm:$0xff] }
 0x491   :  { %3968 = vmatpush.bf16.msra.mxu2 %v7479_v56  ;;  %4055 = vmatpush.bf16.msra.mxu3 %v7487_v58  ;;  %v7483_v56 = vld [vmem:[%s10207_s3 + $0x3c8] sm:$0xff] }
 0x492   :  { %v2657_v59 = vpack.c.bf16 %v2607_v39, %v2607_v39  ;;  %v7519_v58 = vld [vmem:[%s10207_s3 + $0x4e8] sm:$0xff]  ;;  %v7506_v39 = vld [vmem:[%s10207_s3 + $0x480] sm:$0xff] }
 0x493   :  { %v3020_v48 = vpop.f32.mrf.mxu3 }
 0x494   :  { %v3741_v19 = vunpack.c.l.b16 %v2657_v59  ;;  %v3024_v21 = vadd.f32 %v3020_v48, %v2937_v13  ;;  %v7529_v59 = vld [vmem:[%s10207_s3 + $0x538] sm:$0xff]  ;;  %v7535_v13 = vld [vmem:[%s10207_s3 + $0x568] sm:$0xff] }
 0x495   :  { %3969 = vmatpush.bf16.msra.mxu2 %v7478_v52  ;;  %4056 = vmatpush.bf16.msra.mxu3 %v7486_v11  ;;  %v7517_v11 = vld [vmem:[%s10207_s3 + $0x4d8] sm:$0xff] }
 0x496   :  { %v3742_v60 = vpack.c.b16 %v3741_v19, %v3740_v38  ;;  %v7528_v38 = vld [vmem:[%s10207_s3 + $0x530] sm:$0xff] }
 0x498   :  { %3800 = vmatmul.bf16.vlgmr.msrb.gmra.mxu2 %v3742_v60  ;;  %3887 = vmatmul.bf16.vlgmr.msrb.gmra.mxu3 %v9126_v1  ;;  %v7495_v1 = vld [vmem:[%s10207_s3 + $0x428] sm:$0xff] }
 0x499   :  { %3970 = vmatpush.bf16.msra.mxu2 %v7477_v23  ;;  %4057 = vmatpush.bf16.msra.mxu3 %v7485_v18  ;;  %v7515_v18 = vld [vmem:[%s10207_s3 + $0x4c8] sm:$0xff] }
 0x49b   :  { %v3105_v57 = vpop.f32.mrf.mxu2 }
 0x49c   :  { %v3110_v47 = vadd.f32 %v3105_v57, %v3023_v6  ;;  %v7508_v6 = vld [vmem:[%s10207_s3 + $0x490] sm:$0xff]  ;;  %v7537_v57 = vld [vmem:[%s10207_s3 + $0x578] sm:$0xff] }
 0x49d   :  { %3971 = vmatpush.bf16.msra.mxu2 %v7476_v40  ;;  %4058 = vmatpush.bf16.msra.mxu3 %v7484_v50  ;;  %v7498_v40 = vld [vmem:[%s10207_s3 + $0x440] sm:$0xff] }
 0x49e   :  { %v7514_v50 = vld [vmem:[%s10207_s3 + $0x4c0] sm:$0xff] }
 0x4a1   :  { %3972 = vmatpush.bf16.msra.mxu2 %v7475_v46  ;;  %4059 = vmatpush.bf16.msra.mxu3 %v7483_v56  ;;  %v7536_v56 = vld [vmem:[%s10207_s3 + $0x570] sm:$0xff] }
 0x4a3   :  { %v3107_v52 = vpop.f32.mrf.mxu2 }
 0x4a4   :  { %v3111_v36 = vadd.f32 %v3107_v52, %v3024_v21  ;;  %v7522_v21 = vld [vmem:[%s10207_s3 + $0x500] sm:$0xff]  ;;  %v7533_v52 = vld [vmem:[%s10207_s3 + $0x558] sm:$0xff] }
 0x4a5   :  { %3973 = vmatpush.bf16.msra.mxu2 %v7474_v5  ;;  %4060 = vmatpush.bf16.msra.mxu3 %v7482_v51  ;;  %v7516_v5 = vld [vmem:[%s10207_s3 + $0x4d0] sm:$0xff]  ;;  %v7523_v51 = vld [vmem:[%s10207_s3 + $0x508] sm:$0xff] }
 0x4a8   :  { %3974 = vmatmul.bf16.vlgmr.msra.gmra.mxu2 %v9150_v35  ;;  %4061 = vmatmul.bf16.vlgmr.msra.gmra.mxu3 %v9177_v10  ;;  %v7502_v35 = vld [vmem:[%s10207_s3 + $0x460] sm:$0xff] }
 0x4a9   :  { %4140 = vmatpush.bf16.msrb.mxu2 %v7497_v12  ;;  %4227 = vmatpush.bf16.msrb.mxu3 %v7505_v16  ;;  %v7490_v10 = vld [vmem:[%s10207_s3 + $0x400] sm:$0xff]  ;;  %v7527_v12 = vld [vmem:[%s10207_s3 + $0x528] sm:$0xff] }
 0x4ab   :  { %v3192_v29 = vpop.f32.mrf.mxu3 }
 0x4ac   :  { %v3197_v27 = vadd.f32 %v3192_v29, %v3110_v47  ;;  %v7525_v47 = vld [vmem:[%s10207_s3 + $0x518] sm:$0xff]  ;;  %v7531_v29 = vld [vmem:[%s10207_s3 + $0x548] sm:$0xff] }
 0x4ad   :  { %4141 = vmatpush.bf16.msrb.mxu2 %v7496_v30  ;;  %4228 = vmatpush.bf16.msrb.mxu3 %v7504_v44  ;;  %v7544_v44 = vld [vmem:[%s10207_s3 + $0x5b0] sm:$0xff] }
 0x4b1   :  { %4142 = vmatpush.bf16.msrb.mxu2 %v7495_v1  ;;  %4229 = vmatpush.bf16.msrb.mxu3 %v7503_v9 }
 0x4b3   :  { %v3194_v42 = vpop.f32.mrf.mxu3 }
 0x4b4   :  { %v3198_v23 = vadd.f32 %v3194_v42, %v3111_v36  ;;  %v7545_v36 = vld [vmem:[%s10207_s3 + $0x5b8] sm:$0xff]  ;;  %v7552_v42 = vld [vmem:[%s10207_s3 + $0x5f0] sm:$0xff] }
 0x4b5   :  { %4143 = vmatpush.bf16.msrb.mxu2 %v7494_v43  ;;  %4230 = vmatpush.bf16.msrb.mxu3 %v7502_v35  ;;  %v7553_v35 = vld [vmem:[%s10207_s3 + $0x5f8] sm:$0xff] }
 0x4b9   :  { %4144 = vmatpush.bf16.msrb.mxu2 %v7493_v55  ;;  %4231 = vmatpush.bf16.msrb.mxu3 %v7501_v28  ;;  %v7532_v55 = vld [vmem:[%s10207_s3 + $0x550] sm:$0xff] }
 0x4bb   :  { %v3279_v22 = vpop.f32.mrf.mxu2 }
 0x4bc   :  { %v3284_v4 = vadd.f32 %v3279_v22, %v3197_v27  ;;  %v7543_v27 = vld [vmem:[%s10207_s3 + $0x5a8] sm:$0xff]  ;;  %v7538_v22 = vld [vmem:[%s10207_s3 + $0x580] sm:$0xff] }
 0x4bd   :  { %4145 = vmatpush.bf16.msrb.mxu2 %v7492_v45  ;;  %4232 = vmatpush.bf16.msrb.mxu3 %v7500_v26  ;;  %v7551_v26 = vld [vmem:[%s10207_s3 + $0x5e8] sm:$0xff] }
 0x4c1   :  { %4146 = vmatpush.bf16.msrb.mxu2 %v7491_v20  ;;  %4233 = vmatpush.bf16.msrb.mxu3 %v7499_v34  ;;  %v7530_v20 = vld [vmem:[%s10207_s3 + $0x540] sm:$0xff] }
 0x4c3   :  { %v3281_v62 = vpop.f32.mrf.mxu2 }
 0x4c4   :  { %v3285_v7 = vadd.f32 %v3281_v62, %v3198_v23  ;;  %v7540_v23 = vld [vmem:[%s10207_s3 + $0x590] sm:$0xff] }
 0x4c5   :  { %4147 = vmatpush.bf16.msrb.mxu2 %v7490_v10  ;;  %4234 = vmatpush.bf16.msrb.mxu3 %v7498_v40  ;;  %v7561_v40 = vld [vmem:[%s10207_s3 + $0x638] sm:$0xff]  ;;  %v7560_v62 = vld [vmem:[%s10207_s3 + $0x630] sm:$0xff] }
 0x4c8   :  { %4148 = vmatmul.bf16.vlgmr.msrb.gmra.mxu2 %v9204_v53  ;;  %v7510_v53 = vld [vmem:[%s10207_s3 + $0x4a0] sm:$0xff]  ;;  %4235 = vmatmul.bf16.vlgmr.msrb.gmra.mxu3 %v9228_v15 }
 0x4c9   :  { %4314 = vmatpush.bf16.msra.mxu2 %v7513_v2  ;;  %4401 = vmatpush.bf16.msra.mxu3 %v7521_v61  ;;  %v7518_v15 = vld [vmem:[%s10207_s3 + $0x4e0] sm:$0xff]  ;;  %v7541_v2 = vld [vmem:[%s10207_s3 + $0x598] sm:$0xff] }
 0x4cb   :  { %v3366_v46 = vpop.f32.mrf.mxu3 }
 0x4cc   :  { %v3371_v14 = vadd.f32 %v3366_v46, %v3284_v4  ;;  %v7549_v4 = vld [vmem:[%s10207_s3 + $0x5d8] sm:$0xff] }
 0x4cd   :  { %4315 = vmatpush.bf16.msra.mxu2 %v7512_v0  ;;  %4402 = vmatpush.bf16.msra.mxu3 %v7520_v3  ;;  %v7547_v3 = vld [vmem:[%s10207_s3 + $0x5c8] sm:$0xff]  ;;  %v7557_v46 = vld [vmem:[%s10207_s3 + $0x618] sm:$0xff] }
 0x4d1   :  { %4316 = vmatpush.bf16.msra.mxu2 %v7511_v24  ;;  %4403 = vmatpush.bf16.msra.mxu3 %v7519_v58  ;;  %v7539_v24 = vld [vmem:[%s10207_s3 + $0x588] sm:$0xff] }
 0x4d3   :  { %v3368_v41 = vpop.f32.mrf.mxu3 }
 0x4d4   :  { %v3372_v19 = vadd.f32 %v3368_v41, %v3285_v7  ;;  %v7559_v7 = vld [vmem:[%s10207_s3 + $0x628] sm:$0xff] }
 0x4d5   :  { %4317 = vmatpush.bf16.msra.mxu2 %v7510_v53  ;;  %4404 = vmatpush.bf16.msra.mxu3 %v7518_v15  ;;  %v7555_v41 = vld [vmem:[%s10207_s3 + $0x608] sm:$0xff] }
 0x4d9   :  { %4318 = vmatpush.bf16.msra.mxu2 %v7509_v49  ;;  %4405 = vmatpush.bf16.msra.mxu3 %v7517_v11  ;;  %v7548_v49 = vld [vmem:[%s10207_s3 + $0x5d0] sm:$0xff] }
 0x4da   :  { %v7556_v11 = vld [vmem:[%s10207_s3 + $0x610] sm:$0xff] }
 0x4db   :  { %v3453_v60 = vpop.f32.mrf.mxu2 }
 0x4dc   :  { %v3458_v30 = vadd.f32 %v3453_v60, %v3371_v14 }
 0x4dd   :  { %4319 = vmatpush.bf16.msra.mxu2 %v7508_v6  ;;  %4406 = vmatpush.bf16.msra.mxu3 %v7516_v5 }
 0x4e1   :  { %4320 = vmatpush.bf16.msra.mxu2 %v7507_v33  ;;  %4407 = vmatpush.bf16.msra.mxu3 %v7515_v18  ;;  %v7546_v33 = vld [vmem:[%s10207_s3 + $0x5c0] sm:$0xff] }
 0x4e3   :  { %v3455_v1 = vpop.f32.mrf.mxu2 }
 0x4e4   :  { %v3459_v48 = vadd.f32 %v3455_v1, %v3372_v19  ;;  %v7554_v19 = vld [vmem:[%s10207_s3 + $0x600] sm:$0xff] }
 0x4e5   :  { %4321 = vmatpush.bf16.msra.mxu2 %v7506_v39  ;;  %4408 = vmatpush.bf16.msra.mxu3 %v7514_v50 }
 0x4e8   :  { %4322 = vmatmul.bf16.vlgmr.msra.gmra.mxu2 %v9252_v54  ;;  %v7526_v54 = vld [vmem:[%s10207_s3 + $0x520] sm:$0xff]  ;;  %4409 = vmatmul.bf16.vlgmr.msra.gmra.mxu3 %v9274_v25 }
 0x4e9   :  { %4488 = vmatpush.bf16.msrb.mxu2 %v7529_v59  ;;  %4575 = vmatpush.bf16.msrb.mxu3 %v7537_v57  ;;  %v7534_v25 = vld [vmem:[%s10207_s3 + $0x560] sm:$0xff] }
 0x4eb   :  { %v3540_v43 = vpop.f32.mrf.mxu3 }
 0x4ec   :  { %v3545_v16 = vadd.f32 %v3540_v43, %v3458_v30 }
 0x4ed   :  { %4489 = vmatpush.bf16.msrb.mxu2 %v7528_v38  ;;  %4576 = vmatpush.bf16.msrb.mxu3 %v7536_v56 }
 0x4f1   :  { %4490 = vmatpush.bf16.msrb.mxu2 %v7527_v12  ;;  %4577 = vmatpush.bf16.msrb.mxu3 %v7535_v13 }
 0x4f3   :  { %v3542_v45 = vpop.f32.mrf.mxu3 }
 0x4f4   :  { %v3546_v9 = vadd.f32 %v3542_v45, %v3459_v48  ;;  %v7568_v48 = vld [vmem:[%s10211_s5 + $0x30] sm:$0xff]  ;;  %v7562_v45 = vld [vmem:[%s10211_s5] sm:$0xff] }
 0x4f5   :  { %4491 = vmatpush.bf16.msrb.mxu2 %v7526_v54  ;;  %4578 = vmatpush.bf16.msrb.mxu3 %v7534_v25  ;;  %v7566_v25 = vld [vmem:[%s10211_s5 + $0x20] sm:$0xff] }
 0x4f9   :  { %4492 = vmatpush.bf16.msrb.mxu2 %v7525_v47  ;;  %4579 = vmatpush.bf16.msrb.mxu3 %v7533_v52  ;;  %v7564_v52 = vld [vmem:[%s10211_s5 + $0x10] sm:$0xff] }
 0x4fb   :  { %v3627_v10 = vpop.f32.mrf.mxu2 }
 0x4fc   :  { %v3632_v28 = vadd.f32 %v3627_v10, %v3545_v16  ;;  %v7565_v16 = vld [vmem:[%s10211_s5 + $0x18] sm:$0xff]  ;;  %v7576_v10 = vld [vmem:[%s10212_s7 + $0x30] sm:$0xff] }
 0x4fd   :  { %4493 = vmatpush.bf16.msrb.mxu2 %v7524_v63  ;;  %4580 = vmatpush.bf16.msrb.mxu3 %v7532_v55  ;;  %v7569_v63 = vld [vmem:[%s10211_s5 + $0x38] sm:$0xff] }
 0x501   :  { %4494 = vmatpush.bf16.msrb.mxu2 %v7523_v51  ;;  %4581 = vmatpush.bf16.msrb.mxu3 %v7531_v29  ;;  %v7567_v51 = vld [vmem:[%s10211_s5 + $0x28] sm:$0xff] }
 0x503   :  { %v3629_v0 = vpop.f32.mrf.mxu2 }
 0x504   :  { %v3633_v34 = vadd.f32 %v3629_v0, %v3546_v9 }
 0x505   :  { %4495 = vmatpush.bf16.msrb.mxu2 %v7522_v21  ;;  %4582 = vmatpush.bf16.msrb.mxu3 %v7530_v20 }
 0x508   :  { %4496 = vmatmul.bf16.vlgmr.msrb.gmra.mxu2 %v9297_v17  ;;  %v7542_v17 = vld [vmem:[%s10207_s3 + $0x5a0] sm:$0xff]  ;;  %4583 = vmatmul.bf16.vlgmr.msrb.gmra.mxu3 %v9320_v8 }
 0x509   :  { %4662 = vmatpush.bf16.msra.mxu2 %v7545_v36  ;;  %4749 = vmatpush.bf16.msra.mxu3 %v7553_v35  ;;  %v7550_v8 = vld [vmem:[%s10207_s3 + $0x5e0] sm:$0xff] }
 0x50b   :  { %v3714_v53 = vpop.f32.mrf.mxu3 }
 0x50c   :  { %v3719_v61 = vadd.f32 %v3714_v53, %v3632_v28 }
 0x50d   :  { %4663 = vmatpush.bf16.msra.mxu2 %v7544_v44  ;;  %4750 = vmatpush.bf16.msra.mxu3 %v7552_v42  ;;  %v7563_v44 = vld [vmem:[%s10211_s5 + $0x8] sm:$0xff] }
 0x511   :  { %4664 = vmatpush.bf16.msra.mxu2 %v7543_v27  ;;  %4751 = vmatpush.bf16.msra.mxu3 %v7551_v26  ;;  %v7577_v27 = vld [vmem:[%s10212_s7 + $0x38] sm:$0xff] }
 0x513   :  { %v3716_v6 = vpop.f32.mrf.mxu3 }
 0x514   :  { %v3720_v58 = vadd.f32 %v3716_v6, %v3633_v34 }
 0x515   :  { %4665 = vmatpush.bf16.msra.mxu2 %v7542_v17  ;;  %4752 = vmatpush.bf16.msra.mxu3 %v7550_v8 }
 0x519   :  { %4666 = vmatpush.bf16.msra.mxu2 %v7541_v2  ;;  %4753 = vmatpush.bf16.msra.mxu3 %v7549_v4  ;;  %v7574_v4 = vld [vmem:[%s10212_s7 + $0x20] sm:$0xff] }
 0x51b   :  { %v3801_v15 = vpop.f32.mrf.mxu2  ;;  %v3888_v39 = vpop.f32.mrf.mxu3 }
 0x51c   :  { %v3806_v14 = vadd.f32 %v3801_v15, %v3719_v61  ;;  %v7595_v15 = vld [vmem:[%s10209_s4] ss:$0 sm:$0xff] }
 0x51d   :  { %4667 = vmatpush.bf16.msra.mxu2 %v7540_v23  ;;  %4754 = vmatpush.bf16.msra.mxu3 %v7548_v49  ;;  %v7575_v23 = vld [vmem:[%s10212_s7 + $0x28] sm:$0xff] }
 0x51e   :  { %v3893_v59 = vadd.f32 %v3888_v39, %v3806_v14 }
 0x521   :  { %4668 = vmatpush.bf16.msra.mxu2 %v7539_v24  ;;  %4755 = vmatpush.bf16.msra.mxu3 %v7547_v3 }
 0x523   :  { %v3803_v5 = vpop.f32.mrf.mxu2  ;;  %v3890_v12 = vpop.f32.mrf.mxu3 }
 0x524   :  { %v3807_v38 = vadd.f32 %v3803_v5, %v3720_v58 }
 0x525   :  { %4669 = vmatpush.bf16.msra.mxu2 %v7538_v22  ;;  %4756 = vmatpush.bf16.msra.mxu3 %v7546_v33 }
 0x526   :  { %v3894_v29 = vadd.f32 %v3890_v12, %v3807_v38  ;;  %v7571_v12 = vld [vmem:[%s10212_s7 + $0x8] sm:$0xff] }
 0x528   :  { %4670 = vmatmul.bf16.vlgmr.msra.gmra.mxu2 %v9340_v37  ;;  %v7558_v37 = vld [vmem:[%s10207_s3 + $0x620] sm:$0xff]  ;;  %4757 = vmatmul.bf16.vlgmr.msra.gmra.mxu3 %v9381_v31 }
 0x529   :  { %4836 = vmatpush.bf16.msrb.mxu2 %v7561_v40  ;;  %4929 = vmatpush.bf16.msrb.mxu3 %v7569_v63 }
 0x52b   :  { %v3975_v31 = vpop.f32.mrf.mxu2  ;;  %v4062_v50 = vpop.f32.mrf.mxu3 }
 0x52c   :  { %v3980_v18 = vadd.f32 %v3975_v31, %v3893_v59  ;;  %v7573_v31 = vld [vmem:[%s10212_s7 + $0x18] sm:$0xff] }
 0x52d   :  { %4837 = vmatpush.bf16.msrb.mxu2 %v7560_v62  ;;  %4930 = vmatpush.bf16.msrb.mxu3 %v7568_v48  ;;  %v7597_v48 = vld [vmem:[%s10213_s8] ss:$0 sm:$0xff] }
 0x52e   :  { %v4067_v17 = vadd.f32 %v4062_v50, %v3980_v18  ;;  %v7572_v18 = vld [vmem:[%s10212_s7 + $0x10] sm:$0xff] }
 0x531   :  { %4838 = vmatpush.bf16.msrb.mxu2 %v7559_v7  ;;  %4931 = vmatpush.bf16.msrb.mxu3 %v7567_v51 }
 0x533   :  { %v3977_v60 = vpop.f32.mrf.mxu2  ;;  %v4064_v30 = vpop.f32.mrf.mxu3 }
 0x534   :  { %v3981_v35 = vadd.f32 %v3977_v60, %v3894_v29  ;;  %v7570_v60 = vld [vmem:[%s10212_s7] sm:$0xff] }
 0x535   :  { %4839 = vmatpush.bf16.msrb.mxu2 %v7558_v37  ;;  %4932 = vmatpush.bf16.msrb.mxu3 %v7566_v25 }
 0x536   :  { %v4068_v2 = vadd.f32 %v4064_v30, %v3981_v35 }
 0x539   :  { %4840 = vmatpush.bf16.msrb.mxu2 %v7557_v46  ;;  %4933 = vmatpush.bf16.msrb.mxu3 %v7565_v16 }
 0x53d   :  { %4841 = vmatpush.bf16.msrb.mxu2 %v7556_v11  ;;  %4934 = vmatpush.bf16.msrb.mxu3 %v7564_v52 }
 0x541   :  { %4842 = vmatpush.bf16.msrb.mxu2 %v7555_v41  ;;  %4935 = vmatpush.bf16.msrb.mxu3 %v7563_v44 }
 0x545   :  { %4843 = vmatpush.bf16.msrb.mxu2 %v7554_v19  ;;  %4936 = vmatpush.bf16.msrb.mxu3 %v7562_v45 }
 0x548   :  { %4844 = vmatmul.bf16.vlgmr.msrb.gmra.mxu2 %v9427_v32 }
 0x549   :  { %5014 = vmatpush.bf16.msra.mxu2 %v7577_v27 }
 0x54b   :  { %v4149_v54 = vpop.f32.mrf.mxu2  ;;  %v4236_v47 = vpop.f32.mrf.mxu3 }
 0x54c   :  { %v4154_v28 = vadd.f32 %v4149_v54, %v4067_v17  ;;  %v7596_v54 = vld [vmem:[%s10210_s6] ss:$0 sm:$0xff] }
 0x54d   :  { %5015 = vmatpush.bf16.msra.mxu2 %v7576_v10 }
 0x54e   :  { %v4241_v42 = vadd.f32 %v4236_v47, %v4154_v28 }
 0x551   :  { %5016 = vmatpush.bf16.msra.mxu2 %v7575_v23 }
 0x553   :  { %v4151_v57 = vpop.f32.mrf.mxu2  ;;  %v4238_v1 = vpop.f32.mrf.mxu3 }
 0x554   :  { %v4155_v0 = vadd.f32 %v4151_v57, %v4068_v2 }
 0x555   :  { %5017 = vmatpush.bf16.msra.mxu2 %v7574_v4 }
 0x556   :  { %v4242_v8 = vadd.f32 %v4238_v1, %v4155_v0 }
 0x559   :  { %5018 = vmatpush.bf16.msra.mxu2 %v7573_v31 }
 0x55d   :  { %5019 = vmatpush.bf16.msra.mxu2 %v7572_v18 }
 0x561   :  { %5020 = vmatpush.bf16.msra.mxu2 %v7571_v12 }
 0x565   :  { %5021 = vmatpush.bf16.msra.mxu2 %v7570_v60 }
 0x56b   :  { %v4323_v56 = vpop.f32.mrf.mxu2  ;;  %v4410_v32 = vpop.f32.mrf.mxu3 }
 0x56c   :  { %v4328_v34 = vadd.f32 %v4323_v56, %v4241_v42 }
 0x56e   :  { %v4415_v22 = vadd.f32 %v4410_v32, %v4328_v34 }
 0x573   :  { %v4325_v13 = vpop.f32.mrf.mxu2  ;;  %v4412_v21 = vpop.f32.mrf.mxu3 }
 0x574   :  { %v4329_v40 = vadd.f32 %v4325_v13, %v4242_v8 }
 0x576   :  { %v4416_v61 = vadd.f32 %v4412_v21, %v4329_v40 }
 0x58b   :  { %v4497_v43 = vpop.f32.mrf.mxu2  ;;  %v4584_v55 = vpop.f32.mrf.mxu3 }
 0x58c   :  { %v4502_v53 = vadd.f32 %v4497_v43, %v4415_v22 }
 0x58e   :  { %v4589_v49 = vadd.f32 %v4584_v55, %v4502_v53 }
 0x593   :  { %v4499_v36 = vpop.f32.mrf.mxu2  ;;  %v4586_v20 = vpop.f32.mrf.mxu3 }
 0x594   :  { %v4503_v3 = vadd.f32 %v4499_v36, %v4416_v61 }
 0x596   :  { %v4590_v6 = vadd.f32 %v4586_v20, %v4503_v3 }
 0x5ab   :  { %v4671_v9 = vpop.f32.mrf.mxu2  ;;  %v4758_v24 = vpop.f32.mrf.mxu3 }
 0x5ac   :  { %v4676_v7 = vadd.f32 %v4671_v9, %v4589_v49 }
 0x5ae   :  { %v4763_v58 = vadd.f32 %v4758_v24, %v4676_v7 }
 0x5b3   :  { %v4673_v26 = vpop.f32.mrf.mxu2  ;;  %v4760_v33 = vpop.f32.mrf.mxu3 }
 0x5b4   :  { %v4677_v37 = vadd.f32 %v4673_v26, %v4590_v6 }
 0x5b6   :  { %v4764_v14 = vadd.f32 %v4760_v33, %v4677_v37 }
 0x5cb   :  { %v4845_v62 = vpop.f32.mrf.mxu2 }
 0x5cc   :  { %v4850_v46 = vadd.f32 %v4845_v62, %v4763_v58 }
 0x5ce   :  { %v4856_v11 = vadd.f32 %v7595_v15, %v4850_v46 }
 0x5d0   :  { %v4858_v5 = vmax.f32 %v4856_v11, 0.0 }
 0x5d3   :  { %v4847_v39 = vpop.f32.mrf.mxu2 }
 0x5d4   :  { %v4851_v59 = vadd.f32 %v4847_v39, %v4764_v14 }
 0x5d6   :  { %v4857_v41 = vadd.f32 %v7595_v15, %v4851_v59 }
 0x5d8   :  { %v4859_v38 = vmax.f32 %v4857_v41, 0.0 }
 0x5da   :  { %v4860_v19 = vpack.c.bf16 %v4859_v38, %v4858_v5 }
 0x5dc   :  { %4937 = vmatmul.bf16.vlgmr.msrb.gmra.mxu3 %v4860_v19 }
 0x65f   :  { %v4938_v50 = vpop.f32.mrf.mxu3 }
 0x660   :  { %v4939_v30 = vadd.f32 %v7596_v54, %v4938_v50 }
 0x662   :  { %v4943_v56 = vmax.f32 %v4939_v30, 0.0 }
 0x667   :  { %v4940_v57 = vpop.f32.mrf.mxu3 }
 0x668   :  { %v4941_v47 = vadd.f32 %v7596_v54, %v4940_v57 }
 0x66a   :  { %v4944_v1 = vmax.f32 %v4941_v47, 0.0 }
 0x66c   :  { %v4945_v63 = vpack.c.bf16 %v4944_v1, %v4943_v56 }
 0x66e   :  { %5022 = vmatmul.bf16.vlgmr.msra.gmra.mxu2 %v4945_v63 }
 0x6f1   :  { %v5023_v13 = vpop.f32.mrf.mxu2 }
 0x6f2   :  { %v5024_v32 = vadd.f32 %v7597_v48, %v5023_v13 }
 0x6f4   :  { %5028 = vst [vmem:[%s10214_s9] sm:$0xff] %v5024_v32 }
 0x6f9   :  { %v5025_v51 = vpop.f32.mrf.mxu2 }
 0x6fa   :  { %v5026_v25 = vadd.f32 %v7597_v48, %v5025_v51 }
 0x6fc   :  { %5029 = vst [vmem:[%s10214_s9 + $0x8] sm:$0xff] %v5026_v25 }

</bundles_post_ra>
